<compile_context>
chip_gen: v7x
topology: tpu7x:2x2x1
jax: 0.10.0
libtpu: 0.0.40
codegen_flags: <defaults>
</compile_context>

<pallas_src>
import functools

import jax
import jax.numpy as jnp
from jax.experimental import pallas as pl
from jax.experimental.pallas import tpu as pltpu


def _round_up(x, m):
    return ((x + m - 1) // m) * m


# ----------------------------------------------------------------------------
# Pallas kernel: one GRU layer, one (direction, time-block) grid step.
# ----------------------------------------------------------------------------
def _bidir_gru_kernel(x_ref, wih_ref, bi_ref, whh_ref, bhn_ref, out_ref,
                      gi_ref, h_ref, *, tt, hp):
    # x_ref   : (Tt, Bp, D)     input block (direction-shared)
    # wih_ref : (D, 3Hp)        input->hidden weights, per-gate 128-lane aligned chunks
    # bi_ref  : (1, 3Hp)        b_ih with b_hr/b_hz folded in
    # whh_ref : (Hp, 3Hp)       hidden->hidden weights, fused gates
    # bhn_ref : (1, Hp)         b_hn (kept separate: multiplied by r)
    # out_ref : (Tt, Bp, Hp)    hidden states; direction selects last-axis block of output
    # gi_ref  : (Tt*Bp, 3Hp)    VMEM scratch: precomputed input projections for the block
    # h_ref   : (Bp, Hp)        VMEM scratch: running hidden state (carries across blocks)
    d = pl.program_id(0)   # 0 = forward, 1 = backward
    tb = pl.program_id(1)  # time-block index (block order already reversed for d == 1)

    bp = h_ref.shape[0]
    dim = x_ref.shape[-1]

    @pl.when(tb == 0)
    def _():
        h_ref[...] = jnp.zeros_like(h_ref)

    # ---- In-kernel GI projection: one lane-dense MXU matmul per (direction, block).
    x2 = x_ref[...].reshape(tt * bp, dim)
    gi_ref[...] = (
        jnp.dot(x2, wih_ref[...], preferred_element_type=jnp.float32) + bi_ref[...]
    )

    # Loop-invariant loads / broadcasts hoisted off the serial recurrence.
    whh = whh_ref[...]                                  # (Hp, 3Hp)
    bhn = jnp.broadcast_to(bhn_ref[...], (bp, hp))      # (Bp, Hp)

    def make_step(reverse):
        def step(j, carry):
            t = (tt - 1 - j) if reverse else j          # static walk direction per branch
            row = pl.multiple_of(t * bp, bp)
            gi_t = gi_ref[pl.ds(row, bp), :]            # (Bp, 3Hp), gates lane-aligned
            h_prev = h_ref[...]                         # (Bp, Hp)
            # Single fused hidden->hidden matmul per step (the only op on the h-chain).
            gh = jnp.dot(h_prev, whh, preferred_element_type=jnp.float32)  # (Bp, 3Hp)
            r = jax.nn.sigmoid(gi_t[:, :hp] + gh[:, :hp])
            z = jax.nn.sigmoid(gi_t[:, hp:2 * hp] + gh[:, hp:2 * hp])
            n = jnp.tanh(gi_t[:, 2 * hp:] + r * (gh[:, 2 * hp:] + bhn))
            h = (1.0 - z) * n + z * h_prev
            h_ref[...] = h
            out_ref[t] = h.astype(out_ref.dtype)
            return carry
        return step

    unroll = min(4, tt)

    @pl.when(d == 0)
    def _():
        jax.lax.fori_loop(0, tt, make_step(False), 0, unroll=unroll)

    @pl.when(d == 1)
    def _():
        jax.lax.fori_loop(0, tt, make_step(True), 0, unroll=unroll)


def _run_bidir_gru_layer(x, wih, bi, whh, bhn, *, hp, time_block):
    """x: (T, Bp, D) f32.  Returns (T, Bp, 2*Hp): fwd -> cols [0:Hp], bwd -> [Hp:2Hp]."""
    T, bp, dim = x.shape
    tt = time_block
    assert T % tt == 0, (T, tt)
    nt = T // tt

    def x_map(d, tb):
        return (tb + d * (nt - 1 - 2 * tb), 0, 0)       # fwd: tb ; bwd: nt-1-tb

    def w_map(d, tb):
        return (d, 0, 0)

    def out_map(d, tb):
        return (tb + d * (nt - 1 - 2 * tb), 0, d)       # direction picks last-axis block

    kernel = functools.partial(_bidir_gru_kernel, tt=tt, hp=hp)
    return pl.pallas_call(
        kernel,
        out_shape=jax.ShapeDtypeStruct((T, bp, 2 * hp), jnp.float32),
        grid_spec=pltpu.PrefetchScalarGridSpec(
            num_scalar_prefetch=0,
            grid=(2, nt),                               # (direction, time block)
            in_specs=[
                pl.BlockSpec((tt, bp, dim), x_map),
                pl.BlockSpec((None, dim, 3 * hp), w_map),
                pl.BlockSpec((None, 1, 3 * hp), w_map),
                pl.BlockSpec((None, hp, 3 * hp), w_map),
                pl.BlockSpec((None, 1, hp), w_map),
            ],
            out_specs=pl.BlockSpec((tt, bp, hp), out_map),
            scratch_shapes=[
                pltpu.VMEM((tt * bp, 3 * hp), jnp.float32),  # GI for current time block
                pltpu.VMEM((bp, hp), jnp.float32),           # running hidden state
            ],
        ),
        compiler_params=pltpu.CompilerParams(
            # Direction axis parallel (v7x megacore can put fwd/bwd on separate TCs);
            # the time-block axis carries the serial recurrence.
            dimension_semantics=("parallel", "arbitrary"),
        ),
    )(x, wih, bi, whh, bhn)


# ----------------------------------------------------------------------------
# Parameter packing: pad gates to 128-lane chunks, fold b_hr/b_hz into GI bias.
# ----------------------------------------------------------------------------
def _pad_gate_cols(w, H, Hp):
    """(..., 3H) -> (..., 3Hp): each gate chunk zero-padded to Hp lanes."""
    pads = [(0, 0)] * (w.ndim - 1) + [(0, Hp - H)]
    parts = [jnp.pad(w[..., g * H:(g + 1) * H], pads) for g in range(3)]
    return jnp.concatenate(parts, axis=-1)


def _pack_gru_layer(layer, H, Hp, first_layer):
    wih, whh = layer["wih"], layer["whh"]       # (2, d_in, 3H), (2, H, 3H)
    bih, bhh = layer["bih"], layer["bhh"]       # (2, 3H), (2, 3H)
    if first_layer:
        wih_rows = wih
    else:
        # Deeper layers consume the padded (T, B, 2*Hp) output of the previous layer:
        # scatter the logical 2H input rows to [0:H] (fwd) and [Hp:Hp+H] (bwd).
        wih_rows = jnp.zeros((2, 2 * Hp, 3 * H), wih.dtype)
        wih_rows = wih_rows.at[:, :H, :].set(wih[:, :H, :])
        wih_rows = wih_rows.at[:, Hp:Hp + H, :].set(wih[:, H:, :])
    wih_p = _pad_gate_cols(wih_rows, H, Hp)                           # (2, D, 3Hp)
    whh_rows = jnp.zeros((2, Hp, 3 * H), whh.dtype).at[:, :H, :].set(whh)
    whh_p = _pad_gate_cols(whh_rows, H, Hp)                           # (2, Hp, 3Hp)
    # Fold b_hr / b_hz into the GI bias; keep b_hn separate (it is scaled by r).
    bi = jnp.concatenate([bih[:, :2 * H] + bhh[:, :2 * H], bih[:, 2 * H:]], axis=-1)
    bi_p = _pad_gate_cols(bi, H, Hp)[:, None, :]                      # (2, 1, 3Hp)
    bhn_p = jnp.pad(bhh[:, 2 * H:], ((0, 0), (0, Hp - H)))[:, None, :]  # (2, 1, Hp)
    return wih_p, bi_p, whh_p, bhn_p


# ----------------------------------------------------------------------------
# Parameter construction (deterministic, PyTorch-style uniform init).
# Logical layout: wih (2, d_in, 3H), whh (2, H, 3H), biases (2, 3H); gate order r, z, n.
# ----------------------------------------------------------------------------
def init_params(key, *, pos_size, pos_embedding_dim, word_rnn_size, rnn_size, rnn_layers):
    params = {}
    key, k_emb = jax.random.split(key)
    emb = jax.random.normal(k_emb, (pos_size, pos_embedding_dim), dtype=jnp.float32)
    emb = emb.at[0].set(0.0)  # padding_idx=0
    params["pos_embedding"] = emb

    bound = 1.0 / float(rnn_size) ** 0.5
    layers = []
    for layer in range(rnn_layers):
        d_in = (2 * word_rnn_size + pos_embedding_dim) if layer == 0 else 2 * rnn_size
        key, k1, k2, k3, k4 = jax.random.split(key, 5)
        layers.append({
            "wih": jax.random.uniform(k1, (2, d_in, 3 * rnn_size), jnp.float32, -bound, bound),
            "whh": jax.random.uniform(k2, (2, rnn_size, 3 * rnn_size), jnp.float32, -bound, bound),
            "bih": jax.random.uniform(k3, (2, 3 * rnn_size), jnp.float32, -bound, bound),
            "bhh": jax.random.uniform(k4, (2, 3 * rnn_size), jnp.float32, -bound, bound),
        })
    params["gru_layers"] = layers
    return params


# ----------------------------------------------------------------------------
# Forward pass.
# ----------------------------------------------------------------------------
def sentence_with_position_forward(params, documents, poses, *, time_block=None):
    """documents: (B, T, 2*word_rnn_size) f32, poses: (B, T) int32.
    Returns (outputs, None) with outputs: (B, T, 2*rnn_size)."""
    pos_emb = jnp.take(params["pos_embedding"], poses, axis=0)        # (B, T, E)
    x = jnp.concatenate([documents, pos_emb], axis=-1).astype(jnp.float32)
    B, T, _ = x.shape
    H = params["gru_layers"][0]["whh"].shape[1]
    Hp = _round_up(H, 128)                    # 128-lane aligned gate chunks
    Bp = _round_up(max(B, 8), 8)              # fill sublanes / MXU rows
    tt = T if time_block is None else time_block
    assert T % tt == 0, (T, tt)

    x = jnp.transpose(x, (1, 0, 2))                                   # time-major (T, B, D)
    x = jnp.pad(x, ((0, 0), (0, Bp - B), (0, 0)))                     # (T, Bp, D)

    for li, layer in enumerate(params["gru_layers"]):
        wih_p, bi_p, whh_p, bhn_p = _pack_gru_layer(layer, H, Hp, first_layer=(li == 0))
        x = _run_bidir_gru_layer(x, wih_p, bi_p, whh_p, bhn_p, hp=Hp, time_block=tt)
        # x: (T, Bp, 2*Hp); valid columns [0:H] (fwd) and [Hp:Hp+H] (bwd); padding stays 0.
        # TODO(synk): GRU inter-layer dropout applies only in training mode; eval semantics.

    out = jnp.concatenate([x[:, :B, :H], x[:, :B, Hp:Hp + H]], axis=-1)  # (T, B, 2H)
    return jnp.transpose(out, (1, 0, 2)), None


# ----------------------------------------------------------------------------
# Pure-JAX reference (independent check of padding, gate fusion, bias folding,
# time-block reversal and hidden-state carry).
# ----------------------------------------------------------------------------
def _ref_gru_direction(x_tbd, wih, whh, bih, bhh):
    H = whh.shape[0]
    B = x_tbd.shape[1]

    def step(h, x_t):
        gi = x_t @ wih + bih
        gh = h @ whh + bhh
        r = jax.nn.sigmoid(gi[:, :H] + gh[:, :H])
        z = jax.nn.sigmoid(gi[:, H:2 * H] + gh[:, H:2 * H])
        n = jnp.tanh(gi[:, 2 * H:] + r * gh[:, 2 * H:])
        h_new = (1.0 - z) * n + z * h
        return h_new, h_new

    _, ys = jax.lax.scan(step, jnp.zeros((B, H), jnp.float32), x_tbd)
    return ys


def _ref_forward(params, documents, poses):
    pos_emb = jnp.take(params["pos_embedding"], poses, axis=0)
    x = jnp.concatenate([documents, pos_emb], axis=-1)
    x = jnp.transpose(x, (1, 0, 2))
    for layer in params["gru_layers"]:
        out_f = _ref_gru_direction(x, layer["wih"][0], layer["whh"][0],
                                   layer["bih"][0], layer["bhh"][0])
        out_b = _ref_gru_direction(x[::-1], layer["wih"][1], layer["whh"][1],
                                   layer["bih"][1], layer["bhh"][1])[::-1]
        x = jnp.concatenate([out_f, out_b], axis=-1)
    return jnp.transpose(x, (1, 0, 2))


if __name__ == "__main__":
    # Small shapes consistent with the module.
    batch_size = 2
    seq_len = 8
    word_rnn_size = 16          # documents feature dim = 2 * word_rnn_size = 32
    pos_size = 103
    pos_embedding_dim = 32      # scaled down from the default 300
    rnn_size = 32
    rnn_layers = 2

    key = jax.random.PRNGKey(0)
    key, k_doc, k_pos, k_par = jax.random.split(key, 4)

    documents = jax.random.normal(
        k_doc, (batch_size, seq_len, 2 * word_rnn_size), jnp.float32)
    poses = jax.random.randint(k_pos, (batch_size, seq_len), 0, pos_size, dtype=jnp.int32)

    params = init_params(
        k_par,
        pos_size=pos_size,
        pos_embedding_dim=pos_embedding_dim,
        word_rnn_size=word_rnn_size,
        rnn_size=rnn_size,
        rnn_layers=rnn_layers,
    )

    # time_block=4 exercises the time-tiled grid (hidden-state carry across blocks and
    # the reversed time-block index_map for the backward direction).
    fwd = jax.jit(functools.partial(sentence_with_position_forward, time_block=4))
    outputs, hidden = fwd(params, documents, poses)
    outputs = jax.block_until_ready(outputs)

    assert outputs.shape == (batch_size, seq_len, 2 * rnn_size), outputs.shape
    assert hidden is None

    ref = jax.block_until_ready(_ref_forward(params, documents, poses))
    assert jnp.allclose(outputs, ref, rtol=5e-4, atol=5e-4), "mismatch vs JAX reference"

    print("KERNEL_OK")
</pallas_src>

<mosaic_0001>
module attributes {stable_mosaic.version = 11 : i64} {
  func.func @_bidir_gru_kernel(%arg0: i32, %arg1: i32, %arg2: memref<4x8x64xf32, #tpu.memory_space<vmem>>, %arg3: memref<1x64x384xf32, #tpu.memory_space<vmem>>, %arg4: memref<1x1x384xf32, #tpu.memory_space<vmem>>, %arg5: memref<1x128x384xf32, #tpu.memory_space<vmem>>, %arg6: memref<1x1x128xf32, #tpu.memory_space<vmem>>, %arg7: memref<4x8x128xf32, #tpu.memory_space<vmem>>, %arg8: memref<32x384xf32, #tpu.memory_space<vmem>>, %arg9: memref<8x128xf32, #tpu.memory_space<vmem>>) attributes {dimension_semantics = [#tpu.dimension_semantics<parallel>, #tpu.dimension_semantics<arbitrary>], iteration_bounds = array<i64: 2, 2>, scalar_prefetch = 0 : i64, scratch_operands = 2 : i64, tpu.core_type = #tpu.core_type<tc>, window_params = [{transform_indices = @transform_0, window_bounds = array<i64: 4, 8, 64>}, {transform_indices = @transform_1, window_bounds = array<i64: 1, 64, 384>}, {transform_indices = @transform_2, window_bounds = array<i64: 1, 1, 384>}, {transform_indices = @transform_3, window_bounds = array<i64: 1, 128, 384>}, {transform_indices = @transform_4, window_bounds = array<i64: 1, 1, 128>}, {transform_indices = @transform_5, window_bounds = array<i64: 4, 8, 128>}]} {
    %c0_i32 = arith.constant 0 : i32
    %0 = arith.cmpi eq, %arg1, %c0_i32 : i32
    %1 = arith.extui %0 : i1 to i32
    %c0_i32_0 = arith.constant 0 : i32
    %2 = arith.cmpi ne, %1, %c0_i32_0 : i32
    scf.if %2 {
      %cst_20 = arith.constant 0.000000e+00 : f32
      %25 = vector.broadcast %cst_20 : f32 to vector<8x128xf32>
      %c0_21 = arith.constant 0 : index
      %c0_22 = arith.constant 0 : index
      %26 = vector.load %arg9[%c0_21, %c0_22] : memref<8x128xf32, #tpu.memory_space<vmem>>, vector<8x128xf32>
      tpu.vector_store %arg9[%c0_21, %c0_22], %25 {strides = array<i32>} : memref<8x128xf32, #tpu.memory_space<vmem>>, vector<8x128xf32>,
    } else {
    }
    %c0 = arith.constant 0 : index
    %c0_1 = arith.constant 0 : index
    %c0_2 = arith.constant 0 : index
    %3 = vector.load %arg2[%c0, %c0_1, %c0_2] : memref<4x8x64xf32, #tpu.memory_space<vmem>>, vector<4x8x64xf32>
    %4 = vector.shape_cast %3 : vector<4x8x64xf32> to vector<32x64xf32>
    %c0_3 = arith.constant 0 : index
    %c0_4 = arith.constant 0 : index
    %c0_5 = arith.constant 0 : index
    %5 = vector.load %arg3[%c0_3, %c0_4, %c0_5] : memref<1x64x384xf32, #tpu.memory_space<vmem>>, vector<1x64x384xf32>
    %6 = vector.shape_cast %5 : vector<1x64x384xf32> to vector<64x384xf32>
    %cst = arith.constant dense<0.000000e+00> : vector<32x384xf32>
    %7 = tpu.matmul %4, %6, %cst {dimension_numbers = #tpu.dot_dimension_numbers<[1], [0], [0], [1], [0, 0, 1, 1], [], []>} : vector<32x64xf32>, vector<64x384xf32>, vector<32x384xf32> -> vector<32x384xf32>
    %c0_6 = arith.constant 0 : index
    %c0_7 = arith.constant 0 : index
    %c0_8 = arith.constant 0 : index
    %8 = vector.load %arg4[%c0_6, %c0_7, %c0_8] : memref<1x1x384xf32, #tpu.memory_space<vmem>>, vector<1x1x384xf32>
    %9 = vector.shape_cast %8 : vector<1x1x384xf32> to vector<1x384xf32>
    %10 = vector.broadcast %9 : vector<1x384xf32> to vector<32x384xf32>
    %11 = arith.addf %7, %10 : vector<32x384xf32>
    %c0_9 = arith.constant 0 : index
    %c0_10 = arith.constant 0 : index
    %12 = vector.load %arg8[%c0_9, %c0_10] : memref<32x384xf32, #tpu.memory_space<vmem>>, vector<32x384xf32>
    tpu.vector_store %arg8[%c0_9, %c0_10], %11 {strides = array<i32>} : memref<32x384xf32, #tpu.memory_space<vmem>>, vector<32x384xf32>,
    %c0_11 = arith.constant 0 : index
    %c0_12 = arith.constant 0 : index
    %c0_13 = arith.constant 0 : index
    %13 = vector.load %arg5[%c0_11, %c0_12, %c0_13] : memref<1x128x384xf32, #tpu.memory_space<vmem>>, vector<1x128x384xf32>
    %14 = vector.shape_cast %13 : vector<1x128x384xf32> to vector<128x384xf32>
    %c0_14 = arith.constant 0 : index
    %c0_15 = arith.constant 0 : index
    %c0_16 = arith.constant 0 : index
    %15 = vector.load %arg6[%c0_14, %c0_15, %c0_16] : memref<1x1x128xf32, #tpu.memory_space<vmem>>, vector<1x1x128xf32>
    %16 = vector.shape_cast %15 : vector<1x1x128xf32> to vector<1x128xf32>
    %17 = vector.shape_cast %16 : vector<1x128xf32> to vector<1x128xf32>
    %18 = vector.broadcast %17 : vector<1x128xf32> to vector<8x128xf32>
    %c0_i32_17 = arith.constant 0 : i32
    %19 = arith.cmpi eq, %arg0, %c0_i32_17 : i32
    %20 = arith.extui %19 : i1 to i32
    %c0_i32_18 = arith.constant 0 : i32
    %21 = arith.cmpi ne, %20, %c0_i32_18 : i32
    scf.if %21 {
      %c0_i32_20 = arith.constant 0 : i32
      %c8_i32 = arith.constant 8 : i32
      %25 = arith.muli %c0_i32_20, %c8_i32 : i32
      %26 = tpu.assume_multiple %25, 8 : i32
      %27 = arith.index_cast %26 : i32 to index
      %c0_21 = arith.constant 0 : index
      %28 = vector.load %arg8[%27, %c0_21] : memref<32x384xf32, #tpu.memory_space<vmem>>, vector<8x384xf32>
      %c0_22 = arith.constant 0 : index
      %c0_23 = arith.constant 0 : index
      %29 = vector.load %arg9[%c0_22, %c0_23] : memref<8x128xf32, #tpu.memory_space<vmem>>, vector<8x128xf32>
      %cst_24 = arith.constant dense<0.000000e+00> : vector<8x384xf32>
      %30 = tpu.matmul %29, %14, %cst_24 {dimension_numbers = #tpu.dot_dimension_numbers<[1], [0], [0], [1], [0, 0, 1, 1], [], []>} : vector<8x128xf32>, vector<128x384xf32>, vector<8x384xf32> -> vector<8x384xf32>
      %31 = vector.extract_strided_slice %28 {offsets = [0, 0], sizes = [8, 128], strides = [1, 1]} : vector<8x384xf32> to vector<8x128xf32>
      %32 = vector.extract_strided_slice %30 {offsets = [0, 0], sizes = [8, 128], strides = [1, 1]} : vector<8x384xf32> to vector<8x128xf32>
      %33 = arith.addf %31, %32 : vector<8x128xf32>
      %34 = arith.negf %33 : vector<8x128xf32>
      %35 = math.exp %34 : vector<8x128xf32>
      %cst_25 = arith.constant 1.000000e+00 : f32
      %36 = vector.broadcast %cst_25 : f32 to vector<8x128xf32>
      %37 = arith.addf %36, %35 : vector<8x128xf32>
      %38 = arith.divf %36, %37 : vector<8x128xf32>
      %39 = vector.extract_strided_slice %28 {offsets = [0, 128], sizes = [8, 128], strides = [1, 1]} : vector<8x384xf32> to vector<8x128xf32>
      %40 = vector.extract_strided_slice %30 {offsets = [0, 128], sizes = [8, 128], strides = [1, 1]} : vector<8x384xf32> to vector<8x128xf32>
      %41 = arith.addf %39, %40 : vector<8x128xf32>
      %42 = arith.negf %41 : vector<8x128xf32>
      %43 = math.exp %42 : vector<8x128xf32>
      %cst_26 = arith.constant 1.000000e+00 : f32
      %44 = vector.broadcast %cst_26 : f32 to vector<8x128xf32>
      %45 = arith.addf %44, %43 : vector<8x128xf32>
      %46 = arith.divf %44, %45 : vector<8x128xf32>
      %47 = vector.extract_strided_slice %28 {offsets = [0, 256], sizes = [8, 128], strides = [1, 1]} : vector<8x384xf32> to vector<8x128xf32>
      %48 = vector.extract_strided_slice %30 {offsets = [0, 256], sizes = [8, 128], strides = [1, 1]} : vector<8x384xf32> to vector<8x128xf32>
      %49 = arith.addf %48, %18 : vector<8x128xf32>
      %50 = arith.mulf %38, %49 : vector<8x128xf32>
      %51 = arith.addf %47, %50 : vector<8x128xf32>
      %52 = math.tanh %51 : vector<8x128xf32>
      %cst_27 = arith.constant 1.000000e+00 : f32
      %53 = vector.broadcast %cst_27 : f32 to vector<8x128xf32>
      %54 = arith.subf %53, %46 : vector<8x128xf32>
      %55 = arith.mulf %54, %52 : vector<8x128xf32>
      %56 = arith.mulf %46, %29 : vector<8x128xf32>
      %57 = arith.addf %55, %56 : vector<8x128xf32>
      %c0_28 = arith.constant 0 : index
      %c0_29 = arith.constant 0 : index
      %58 = vector.load %arg9[%c0_28, %c0_29] : memref<8x128xf32, #tpu.memory_space<vmem>>, vector<8x128xf32>
      tpu.vector_store %arg9[%c0_28, %c0_29], %57 {strides = array<i32>} : memref<8x128xf32, #tpu.memory_space<vmem>>, vector<8x128xf32>,
      %59 = arith.index_cast %c0_i32_20 : i32 to index
      %c0_30 = arith.constant 0 : index
      %c0_31 = arith.constant 0 : index
      %60 = vector.load %arg7[%59, %c0_30, %c0_31] : memref<4x8x128xf32, #tpu.memory_space<vmem>>, vector<1x8x128xf32>
      %61 = vector.shape_cast %60 : vector<1x8x128xf32> to vector<8x128xf32>
      %62 = vector.shape_cast %57 : vector<8x128xf32> to vector<1x8x128xf32>
      tpu.vector_store %arg7[%59, %c0_30, %c0_31], %62 {strides = array<i32>} : memref<4x8x128xf32, #tpu.memory_space<vmem>>, vector<1x8x128xf32>,
      %c1_i32_32 = arith.constant 1 : i32
      %c8_i32_33 = arith.constant 8 : i32
      %63 = arith.muli %c1_i32_32, %c8_i32_33 : i32
      %64 = tpu.assume_multiple %63, 8 : i32
      %65 = arith.index_cast %64 : i32 to index
      %c0_34 = arith.constant 0 : index
      %66 = vector.load %arg8[%65, %c0_34] : memref<32x384xf32, #tpu.memory_space<vmem>>, vector<8x384xf32>
      %c0_35 = arith.constant 0 : index
      %c0_36 = arith.constant 0 : index
      %67 = vector.load %arg9[%c0_35, %c0_36] : memref<8x128xf32, #tpu.memory_space<vmem>>, vector<8x128xf32>
      %cst_37 = arith.constant dense<0.000000e+00> : vector<8x384xf32>
      %68 = tpu.matmul %67, %14, %cst_37 {dimension_numbers = #tpu.dot_dimension_numbers<[1], [0], [0], [1], [0, 0, 1, 1], [], []>} : vector<8x128xf32>, vector<128x384xf32>, vector<8x384xf32> -> vector<8x384xf32>
      %69 = vector.extract_strided_slice %66 {offsets = [0, 0], sizes = [8, 128], strides = [1, 1]} : vector<8x384xf32> to vector<8x128xf32>
      %70 = vector.extract_strided_slice %68 {offsets = [0, 0], sizes = [8, 128], strides = [1, 1]} : vector<8x384xf32> to vector<8x128xf32>
      %71 = arith.addf %69, %70 : vector<8x128xf32>
      %72 = arith.negf %71 : vector<8x128xf32>
      %73 = math.exp %72 : vector<8x128xf32>
      %cst_38 = arith.constant 1.000000e+00 : f32
      %74 = vector.broadcast %cst_38 : f32 to vector<8x128xf32>
      %75 = arith.addf %74, %73 : vector<8x128xf32>
      %76 = arith.divf %74, %75 : vector<8x128xf32>
      %77 = vector.extract_strided_slice %66 {offsets = [0, 128], sizes = [8, 128], strides = [1, 1]} : vector<8x384xf32> to vector<8x128xf32>
      %78 = vector.extract_strided_slice %68 {offsets = [0, 128], sizes = [8, 128], strides = [1, 1]} : vector<8x384xf32> to vector<8x128xf32>
      %79 = arith.addf %77, %78 : vector<8x128xf32>
      %80 = arith.negf %79 : vector<8x128xf32>
      %81 = math.exp %80 : vector<8x128xf32>
      %cst_39 = arith.constant 1.000000e+00 : f32
      %82 = vector.broadcast %cst_39 : f32 to vector<8x128xf32>
      %83 = arith.addf %82, %81 : vector<8x128xf32>
      %84 = arith.divf %82, %83 : vector<8x128xf32>
      %85 = vector.extract_strided_slice %66 {offsets = [0, 256], sizes = [8, 128], strides = [1, 1]} : vector<8x384xf32> to vector<8x128xf32>
      %86 = vector.extract_strided_slice %68 {offsets = [0, 256], sizes = [8, 128], strides = [1, 1]} : vector<8x384xf32> to vector<8x128xf32>
      %87 = arith.addf %86, %18 : vector<8x128xf32>
      %88 = arith.mulf %76, %87 : vector<8x128xf32>
      %89 = arith.addf %85, %88 : vector<8x128xf32>
      %90 = math.tanh %89 : vector<8x128xf32>
      %cst_40 = arith.constant 1.000000e+00 : f32
      %91 = vector.broadcast %cst_40 : f32 to vector<8x128xf32>
      %92 = arith.subf %91, %84 : vector<8x128xf32>
      %93 = arith.mulf %92, %90 : vector<8x128xf32>
      %94 = arith.mulf %84, %67 : vector<8x128xf32>
      %95 = arith.addf %93, %94 : vector<8x128xf32>
      %c0_41 = arith.constant 0 : index
      %c0_42 = arith.constant 0 : index
      %96 = vector.load %arg9[%c0_41, %c0_42] : memref<8x128xf32, #tpu.memory_space<vmem>>, vector<8x128xf32>
      tpu.vector_store %arg9[%c0_41, %c0_42], %95 {strides = array<i32>} : memref<8x128xf32, #tpu.memory_space<vmem>>, vector<8x128xf32>,
      %97 = arith.index_cast %c1_i32_32 : i32 to index
      %c0_43 = arith.constant 0 : index
      %c0_44 = arith.constant 0 : index
      %98 = vector.load %arg7[%97, %c0_43, %c0_44] : memref<4x8x128xf32, #tpu.memory_space<vmem>>, vector<1x8x128xf32>
      %99 = vector.shape_cast %98 : vector<1x8x128xf32> to vector<8x128xf32>
      %100 = vector.shape_cast %95 : vector<8x128xf32> to vector<1x8x128xf32>
      tpu.vector_store %arg7[%97, %c0_43, %c0_44], %100 {strides = array<i32>} : memref<4x8x128xf32, #tpu.memory_space<vmem>>, vector<1x8x128xf32>,
      %c2_i32 = arith.constant 2 : i32
      %c8_i32_45 = arith.constant 8 : i32
      %101 = arith.muli %c2_i32, %c8_i32_45 : i32
      %102 = tpu.assume_multiple %101, 8 : i32
      %103 = arith.index_cast %102 : i32 to index
      %c0_46 = arith.constant 0 : index
      %104 = vector.load %arg8[%103, %c0_46] : memref<32x384xf32, #tpu.memory_space<vmem>>, vector<8x384xf32>
      %c0_47 = arith.constant 0 : index
      %c0_48 = arith.constant 0 : index
      %105 = vector.load %arg9[%c0_47, %c0_48] : memref<8x128xf32, #tpu.memory_space<vmem>>, vector<8x128xf32>
      %cst_49 = arith.constant dense<0.000000e+00> : vector<8x384xf32>
      %106 = tpu.matmul %105, %14, %cst_49 {dimension_numbers = #tpu.dot_dimension_numbers<[1], [0], [0], [1], [0, 0, 1, 1], [], []>} : vector<8x128xf32>, vector<128x384xf32>, vector<8x384xf32> -> vector<8x384xf32>
      %107 = vector.extract_strided_slice %104 {offsets = [0, 0], sizes = [8, 128], strides = [1, 1]} : vector<8x384xf32> to vector<8x128xf32>
      %108 = vector.extract_strided_slice %106 {offsets = [0, 0], sizes = [8, 128], strides = [1, 1]} : vector<8x384xf32> to vector<8x128xf32>
      %109 = arith.addf %107, %108 : vector<8x128xf32>
      %110 = arith.negf %109 : vector<8x128xf32>
      %111 = math.exp %110 : vector<8x128xf32>
      %cst_50 = arith.constant 1.000000e+00 : f32
      %112 = vector.broadcast %cst_50 : f32 to vector<8x128xf32>
      %113 = arith.addf %112, %111 : vector<8x128xf32>
      %114 = arith.divf %112, %113 : vector<8x128xf32>
      %115 = vector.extract_strided_slice %104 {offsets = [0, 128], sizes = [8, 128], strides = [1, 1]} : vector<8x384xf32> to vector<8x128xf32>
      %116 = vector.extract_strided_slice %106 {offsets = [0, 128], sizes = [8, 128], strides = [1, 1]} : vector<8x384xf32> to vector<8x128xf32>
      %117 = arith.addf %115, %116 : vector<8x128xf32>
      %118 = arith.negf %117 : vector<8x128xf32>
      %119 = math.exp %118 : vector<8x128xf32>
      %cst_51 = arith.constant 1.000000e+00 : f32
      %120 = vector.broadcast %cst_51 : f32 to vector<8x128xf32>
      %121 = arith.addf %120, %119 : vector<8x128xf32>
      %122 = arith.divf %120, %121 : vector<8x128xf32>
      %123 = vector.extract_strided_slice %104 {offsets = [0, 256], sizes = [8, 128], strides = [1, 1]} : vector<8x384xf32> to vector<8x128xf32>
      %124 = vector.extract_strided_slice %106 {offsets = [0, 256], sizes = [8, 128], strides = [1, 1]} : vector<8x384xf32> to vector<8x128xf32>
      %125 = arith.addf %124, %18 : vector<8x128xf32>
      %126 = arith.mulf %114, %125 : vector<8x128xf32>
      %127 = arith.addf %123, %126 : vector<8x128xf32>
      %128 = math.tanh %127 : vector<8x128xf32>
      %cst_52 = arith.constant 1.000000e+00 : f32
      %129 = vector.broadcast %cst_52 : f32 to vector<8x128xf32>
      %130 = arith.subf %129, %122 : vector<8x128xf32>
      %131 = arith.mulf %130, %128 : vector<8x128xf32>
      %132 = arith.mulf %122, %105 : vector<8x128xf32>
      %133 = arith.addf %131, %132 : vector<8x128xf32>
      %c0_53 = arith.constant 0 : index
      %c0_54 = arith.constant 0 : index
      %134 = vector.load %arg9[%c0_53, %c0_54] : memref<8x128xf32, #tpu.memory_space<vmem>>, vector<8x128xf32>
      tpu.vector_store %arg9[%c0_53, %c0_54], %133 {strides = array<i32>} : memref<8x128xf32, #tpu.memory_space<vmem>>, vector<8x128xf32>,
      %135 = arith.index_cast %c2_i32 : i32 to index
      %c0_55 = arith.constant 0 : index
      %c0_56 = arith.constant 0 : index
      %136 = vector.load %arg7[%135, %c0_55, %c0_56] : memref<4x8x128xf32, #tpu.memory_space<vmem>>, vector<1x8x128xf32>
      %137 = vector.shape_cast %136 : vector<1x8x128xf32> to vector<8x128xf32>
      %138 = vector.shape_cast %133 : vector<8x128xf32> to vector<1x8x128xf32>
      tpu.vector_store %arg7[%135, %c0_55, %c0_56], %138 {strides = array<i32>} : memref<4x8x128xf32, #tpu.memory_space<vmem>>, vector<1x8x128xf32>,
      %c3_i32 = arith.constant 3 : i32
      %c8_i32_57 = arith.constant 8 : i32
      %139 = arith.muli %c3_i32, %c8_i32_57 : i32
      %140 = tpu.assume_multiple %139, 8 : i32
      %141 = arith.index_cast %140 : i32 to index
      %c0_58 = arith.constant 0 : index
      %142 = vector.load %arg8[%141, %c0_58] : memref<32x384xf32, #tpu.memory_space<vmem>>, vector<8x384xf32>
      %c0_59 = arith.constant 0 : index
      %c0_60 = arith.constant 0 : index
      %143 = vector.load %arg9[%c0_59, %c0_60] : memref<8x128xf32, #tpu.memory_space<vmem>>, vector<8x128xf32>
      %cst_61 = arith.constant dense<0.000000e+00> : vector<8x384xf32>
      %144 = tpu.matmul %143, %14, %cst_61 {dimension_numbers = #tpu.dot_dimension_numbers<[1], [0], [0], [1], [0, 0, 1, 1], [], []>} : vector<8x128xf32>, vector<128x384xf32>, vector<8x384xf32> -> vector<8x384xf32>
      %145 = vector.extract_strided_slice %142 {offsets = [0, 0], sizes = [8, 128], strides = [1, 1]} : vector<8x384xf32> to vector<8x128xf32>
      %146 = vector.extract_strided_slice %144 {offsets = [0, 0], sizes = [8, 128], strides = [1, 1]} : vector<8x384xf32> to vector<8x128xf32>
      %147 = arith.addf %145, %146 : vector<8x128xf32>
      %148 = arith.negf %147 : vector<8x128xf32>
      %149 = math.exp %148 : vector<8x128xf32>
      %cst_62 = arith.constant 1.000000e+00 : f32
      %150 = vector.broadcast %cst_62 : f32 to vector<8x128xf32>
      %151 = arith.addf %150, %149 : vector<8x128xf32>
      %152 = arith.divf %150, %151 : vector<8x128xf32>
      %153 = vector.extract_strided_slice %142 {offsets = [0, 128], sizes = [8, 128], strides = [1, 1]} : vector<8x384xf32> to vector<8x128xf32>
      %154 = vector.extract_strided_slice %144 {offsets = [0, 128], sizes = [8, 128], strides = [1, 1]} : vector<8x384xf32> to vector<8x128xf32>
      %155 = arith.addf %153, %154 : vector<8x128xf32>
      %156 = arith.negf %155 : vector<8x128xf32>
      %157 = math.exp %156 : vector<8x128xf32>
      %cst_63 = arith.constant 1.000000e+00 : f32
      %158 = vector.broadcast %cst_63 : f32 to vector<8x128xf32>
      %159 = arith.addf %158, %157 : vector<8x128xf32>
      %160 = arith.divf %158, %159 : vector<8x128xf32>
      %161 = vector.extract_strided_slice %142 {offsets = [0, 256], sizes = [8, 128], strides = [1, 1]} : vector<8x384xf32> to vector<8x128xf32>
      %162 = vector.extract_strided_slice %144 {offsets = [0, 256], sizes = [8, 128], strides = [1, 1]} : vector<8x384xf32> to vector<8x128xf32>
      %163 = arith.addf %162, %18 : vector<8x128xf32>
      %164 = arith.mulf %152, %163 : vector<8x128xf32>
      %165 = arith.addf %161, %164 : vector<8x128xf32>
      %166 = math.tanh %165 : vector<8x128xf32>
      %cst_64 = arith.constant 1.000000e+00 : f32
      %167 = vector.broadcast %cst_64 : f32 to vector<8x128xf32>
      %168 = arith.subf %167, %160 : vector<8x128xf32>
      %169 = arith.mulf %168, %166 : vector<8x128xf32>
      %170 = arith.mulf %160, %143 : vector<8x128xf32>
      %171 = arith.addf %169, %170 : vector<8x128xf32>
      %c0_65 = arith.constant 0 : index
      %c0_66 = arith.constant 0 : index
      %172 = vector.load %arg9[%c0_65, %c0_66] : memref<8x128xf32, #tpu.memory_space<vmem>>, vector<8x128xf32>
      tpu.vector_store %arg9[%c0_65, %c0_66], %171 {strides = array<i32>} : memref<8x128xf32, #tpu.memory_space<vmem>>, vector<8x128xf32>,
      %173 = arith.index_cast %c3_i32 : i32 to index
      %c0_67 = arith.constant 0 : index
      %c0_68 = arith.constant 0 : index
      %174 = vector.load %arg7[%173, %c0_67, %c0_68] : memref<4x8x128xf32, #tpu.memory_space<vmem>>, vector<1x8x128xf32>
      %175 = vector.shape_cast %174 : vector<1x8x128xf32> to vector<8x128xf32>
      %176 = vector.shape_cast %171 : vector<8x128xf32> to vector<1x8x128xf32>
      tpu.vector_store %arg7[%173, %c0_67, %c0_68], %176 {strides = array<i32>} : memref<4x8x128xf32, #tpu.memory_space<vmem>>, vector<1x8x128xf32>,
      %c4_i32 = arith.constant 4 : i32
    } else {
    }
    %c1_i32 = arith.constant 1 : i32
    %22 = arith.cmpi eq, %arg0, %c1_i32 : i32
    %23 = arith.extui %22 : i1 to i32
    %c0_i32_19 = arith.constant 0 : i32
    %24 = arith.cmpi ne, %23, %c0_i32_19 : i32
    scf.if %24 {
      %c0_i32_20 = arith.constant 0 : i32
      %c3_i32 = arith.constant 3 : i32
      %25 = arith.subi %c3_i32, %c0_i32_20 : i32
      %c8_i32 = arith.constant 8 : i32
      %26 = arith.muli %25, %c8_i32 : i32
      %27 = tpu.assume_multiple %26, 8 : i32
      %28 = arith.index_cast %27 : i32 to index
      %c0_21 = arith.constant 0 : index
      %29 = vector.load %arg8[%28, %c0_21] : memref<32x384xf32, #tpu.memory_space<vmem>>, vector<8x384xf32>
      %c0_22 = arith.constant 0 : index
      %c0_23 = arith.constant 0 : index
      %30 = vector.load %arg9[%c0_22, %c0_23] : memref<8x128xf32, #tpu.memory_space<vmem>>, vector<8x128xf32>
      %cst_24 = arith.constant dense<0.000000e+00> : vector<8x384xf32>
      %31 = tpu.matmul %30, %14, %cst_24 {dimension_numbers = #tpu.dot_dimension_numbers<[1], [0], [0], [1], [0, 0, 1, 1], [], []>} : vector<8x128xf32>, vector<128x384xf32>, vector<8x384xf32> -> vector<8x384xf32>
      %32 = vector.extract_strided_slice %29 {offsets = [0, 0], sizes = [8, 128], strides = [1, 1]} : vector<8x384xf32> to vector<8x128xf32>
      %33 = vector.extract_strided_slice %31 {offsets = [0, 0], sizes = [8, 128], strides = [1, 1]} : vector<8x384xf32> to vector<8x128xf32>
      %34 = arith.addf %32, %33 : vector<8x128xf32>
      %35 = arith.negf %34 : vector<8x128xf32>
      %36 = math.exp %35 : vector<8x128xf32>
      %cst_25 = arith.constant 1.000000e+00 : f32
      %37 = vector.broadcast %cst_25 : f32 to vector<8x128xf32>
      %38 = arith.addf %37, %36 : vector<8x128xf32>
      %39 = arith.divf %37, %38 : vector<8x128xf32>
      %40 = vector.extract_strided_slice %29 {offsets = [0, 128], sizes = [8, 128], strides = [1, 1]} : vector<8x384xf32> to vector<8x128xf32>
      %41 = vector.extract_strided_slice %31 {offsets = [0, 128], sizes = [8, 128], strides = [1, 1]} : vector<8x384xf32> to vector<8x128xf32>
      %42 = arith.addf %40, %41 : vector<8x128xf32>
      %43 = arith.negf %42 : vector<8x128xf32>
      %44 = math.exp %43 : vector<8x128xf32>
      %cst_26 = arith.constant 1.000000e+00 : f32
      %45 = vector.broadcast %cst_26 : f32 to vector<8x128xf32>
      %46 = arith.addf %45, %44 : vector<8x128xf32>
      %47 = arith.divf %45, %46 : vector<8x128xf32>
      %48 = vector.extract_strided_slice %29 {offsets = [0, 256], sizes = [8, 128], strides = [1, 1]} : vector<8x384xf32> to vector<8x128xf32>
      %49 = vector.extract_strided_slice %31 {offsets = [0, 256], sizes = [8, 128], strides = [1, 1]} : vector<8x384xf32> to vector<8x128xf32>
      %50 = arith.addf %49, %18 : vector<8x128xf32>
      %51 = arith.mulf %39, %50 : vector<8x128xf32>
      %52 = arith.addf %48, %51 : vector<8x128xf32>
      %53 = math.tanh %52 : vector<8x128xf32>
      %cst_27 = arith.constant 1.000000e+00 : f32
      %54 = vector.broadcast %cst_27 : f32 to vector<8x128xf32>
      %55 = arith.subf %54, %47 : vector<8x128xf32>
      %56 = arith.mulf %55, %53 : vector<8x128xf32>
      %57 = arith.mulf %47, %30 : vector<8x128xf32>
      %58 = arith.addf %56, %57 : vector<8x128xf32>
      %c0_28 = arith.constant 0 : index
      %c0_29 = arith.constant 0 : index
      %59 = vector.load %arg9[%c0_28, %c0_29] : memref<8x128xf32, #tpu.memory_space<vmem>>, vector<8x128xf32>
      tpu.vector_store %arg9[%c0_28, %c0_29], %58 {strides = array<i32>} : memref<8x128xf32, #tpu.memory_space<vmem>>, vector<8x128xf32>,
      %60 = arith.index_cast %25 : i32 to index
      %c0_30 = arith.constant 0 : index
      %c0_31 = arith.constant 0 : index
      %61 = vector.load %arg7[%60, %c0_30, %c0_31] : memref<4x8x128xf32, #tpu.memory_space<vmem>>, vector<1x8x128xf32>
      %62 = vector.shape_cast %61 : vector<1x8x128xf32> to vector<8x128xf32>
      %63 = vector.shape_cast %58 : vector<8x128xf32> to vector<1x8x128xf32>
      tpu.vector_store %arg7[%60, %c0_30, %c0_31], %63 {strides = array<i32>} : memref<4x8x128xf32, #tpu.memory_space<vmem>>, vector<1x8x128xf32>,
      %c1_i32_32 = arith.constant 1 : i32
      %c3_i32_33 = arith.constant 3 : i32
      %64 = arith.subi %c3_i32_33, %c1_i32_32 : i32
      %c8_i32_34 = arith.constant 8 : i32
      %65 = arith.muli %64, %c8_i32_34 : i32
      %66 = tpu.assume_multiple %65, 8 : i32
      %67 = arith.index_cast %66 : i32 to index
      %c0_35 = arith.constant 0 : index
      %68 = vector.load %arg8[%67, %c0_35] : memref<32x384xf32, #tpu.memory_space<vmem>>, vector<8x384xf32>
      %c0_36 = arith.constant 0 : index
      %c0_37 = arith.constant 0 : index
      %69 = vector.load %arg9[%c0_36, %c0_37] : memref<8x128xf32, #tpu.memory_space<vmem>>, vector<8x128xf32>
      %cst_38 = arith.constant dense<0.000000e+00> : vector<8x384xf32>
      %70 = tpu.matmul %69, %14, %cst_38 {dimension_numbers = #tpu.dot_dimension_numbers<[1], [0], [0], [1], [0, 0, 1, 1], [], []>} : vector<8x128xf32>, vector<128x384xf32>, vector<8x384xf32> -> vector<8x384xf32>
      %71 = vector.extract_strided_slice %68 {offsets = [0, 0], sizes = [8, 128], strides = [1, 1]} : vector<8x384xf32> to vector<8x128xf32>
      %72 = vector.extract_strided_slice %70 {offsets = [0, 0], sizes = [8, 128], strides = [1, 1]} : vector<8x384xf32> to vector<8x128xf32>
      %73 = arith.addf %71, %72 : vector<8x128xf32>
      %74 = arith.negf %73 : vector<8x128xf32>
      %75 = math.exp %74 : vector<8x128xf32>
      %cst_39 = arith.constant 1.000000e+00 : f32
      %76 = vector.broadcast %cst_39 : f32 to vector<8x128xf32>
      %77 = arith.addf %76, %75 : vector<8x128xf32>
      %78 = arith.divf %76, %77 : vector<8x128xf32>
      %79 = vector.extract_strided_slice %68 {offsets = [0, 128], sizes = [8, 128], strides = [1, 1]} : vector<8x384xf32> to vector<8x128xf32>
      %80 = vector.extract_strided_slice %70 {offsets = [0, 128], sizes = [8, 128], strides = [1, 1]} : vector<8x384xf32> to vector<8x128xf32>
      %81 = arith.addf %79, %80 : vector<8x128xf32>
      %82 = arith.negf %81 : vector<8x128xf32>
      %83 = math.exp %82 : vector<8x128xf32>
      %cst_40 = arith.constant 1.000000e+00 : f32
      %84 = vector.broadcast %cst_40 : f32 to vector<8x128xf32>
      %85 = arith.addf %84, %83 : vector<8x128xf32>
      %86 = arith.divf %84, %85 : vector<8x128xf32>
      %87 = vector.extract_strided_slice %68 {offsets = [0, 256], sizes = [8, 128], strides = [1, 1]} : vector<8x384xf32> to vector<8x128xf32>
      %88 = vector.extract_strided_slice %70 {offsets = [0, 256], sizes = [8, 128], strides = [1, 1]} : vector<8x384xf32> to vector<8x128xf32>
      %89 = arith.addf %88, %18 : vector<8x128xf32>
      %90 = arith.mulf %78, %89 : vector<8x128xf32>
      %91 = arith.addf %87, %90 : vector<8x128xf32>
      %92 = math.tanh %91 : vector<8x128xf32>
      %cst_41 = arith.constant 1.000000e+00 : f32
      %93 = vector.broadcast %cst_41 : f32 to vector<8x128xf32>
      %94 = arith.subf %93, %86 : vector<8x128xf32>
      %95 = arith.mulf %94, %92 : vector<8x128xf32>
      %96 = arith.mulf %86, %69 : vector<8x128xf32>
      %97 = arith.addf %95, %96 : vector<8x128xf32>
      %c0_42 = arith.constant 0 : index
      %c0_43 = arith.constant 0 : index
      %98 = vector.load %arg9[%c0_42, %c0_43] : memref<8x128xf32, #tpu.memory_space<vmem>>, vector<8x128xf32>
      tpu.vector_store %arg9[%c0_42, %c0_43], %97 {strides = array<i32>} : memref<8x128xf32, #tpu.memory_space<vmem>>, vector<8x128xf32>,
      %99 = arith.index_cast %64 : i32 to index
      %c0_44 = arith.constant 0 : index
      %c0_45 = arith.constant 0 : index
      %100 = vector.load %arg7[%99, %c0_44, %c0_45] : memref<4x8x128xf32, #tpu.memory_space<vmem>>, vector<1x8x128xf32>
      %101 = vector.shape_cast %100 : vector<1x8x128xf32> to vector<8x128xf32>
      %102 = vector.shape_cast %97 : vector<8x128xf32> to vector<1x8x128xf32>
      tpu.vector_store %arg7[%99, %c0_44, %c0_45], %102 {strides = array<i32>} : memref<4x8x128xf32, #tpu.memory_space<vmem>>, vector<1x8x128xf32>,
      %c2_i32 = arith.constant 2 : i32
      %c3_i32_46 = arith.constant 3 : i32
      %103 = arith.subi %c3_i32_46, %c2_i32 : i32
      %c8_i32_47 = arith.constant 8 : i32
      %104 = arith.muli %103, %c8_i32_47 : i32
      %105 = tpu.assume_multiple %104, 8 : i32
      %106 = arith.index_cast %105 : i32 to index
      %c0_48 = arith.constant 0 : index
      %107 = vector.load %arg8[%106, %c0_48] : memref<32x384xf32, #tpu.memory_space<vmem>>, vector<8x384xf32>
      %c0_49 = arith.constant 0 : index
      %c0_50 = arith.constant 0 : index
      %108 = vector.load %arg9[%c0_49, %c0_50] : memref<8x128xf32, #tpu.memory_space<vmem>>, vector<8x128xf32>
      %cst_51 = arith.constant dense<0.000000e+00> : vector<8x384xf32>
      %109 = tpu.matmul %108, %14, %cst_51 {dimension_numbers = #tpu.dot_dimension_numbers<[1], [0], [0], [1], [0, 0, 1, 1], [], []>} : vector<8x128xf32>, vector<128x384xf32>, vector<8x384xf32> -> vector<8x384xf32>
      %110 = vector.extract_strided_slice %107 {offsets = [0, 0], sizes = [8, 128], strides = [1, 1]} : vector<8x384xf32> to vector<8x128xf32>
      %111 = vector.extract_strided_slice %109 {offsets = [0, 0], sizes = [8, 128], strides = [1, 1]} : vector<8x384xf32> to vector<8x128xf32>
      %112 = arith.addf %110, %111 : vector<8x128xf32>
      %113 = arith.negf %112 : vector<8x128xf32>
      %114 = math.exp %113 : vector<8x128xf32>
      %cst_52 = arith.constant 1.000000e+00 : f32
      %115 = vector.broadcast %cst_52 : f32 to vector<8x128xf32>
      %116 = arith.addf %115, %114 : vector<8x128xf32>
      %117 = arith.divf %115, %116 : vector<8x128xf32>
      %118 = vector.extract_strided_slice %107 {offsets = [0, 128], sizes = [8, 128], strides = [1, 1]} : vector<8x384xf32> to vector<8x128xf32>
      %119 = vector.extract_strided_slice %109 {offsets = [0, 128], sizes = [8, 128], strides = [1, 1]} : vector<8x384xf32> to vector<8x128xf32>
      %120 = arith.addf %118, %119 : vector<8x128xf32>
      %121 = arith.negf %120 : vector<8x128xf32>
      %122 = math.exp %121 : vector<8x128xf32>
      %cst_53 = arith.constant 1.000000e+00 : f32
      %123 = vector.broadcast %cst_53 : f32 to vector<8x128xf32>
      %124 = arith.addf %123, %122 : vector<8x128xf32>
      %125 = arith.divf %123, %124 : vector<8x128xf32>
      %126 = vector.extract_strided_slice %107 {offsets = [0, 256], sizes = [8, 128], strides = [1, 1]} : vector<8x384xf32> to vector<8x128xf32>
      %127 = vector.extract_strided_slice %109 {offsets = [0, 256], sizes = [8, 128], strides = [1, 1]} : vector<8x384xf32> to vector<8x128xf32>
      %128 = arith.addf %127, %18 : vector<8x128xf32>
      %129 = arith.mulf %117, %128 : vector<8x128xf32>
      %130 = arith.addf %126, %129 : vector<8x128xf32>
      %131 = math.tanh %130 : vector<8x128xf32>
      %cst_54 = arith.constant 1.000000e+00 : f32
      %132 = vector.broadcast %cst_54 : f32 to vector<8x128xf32>
      %133 = arith.subf %132, %125 : vector<8x128xf32>
      %134 = arith.mulf %133, %131 : vector<8x128xf32>
      %135 = arith.mulf %125, %108 : vector<8x128xf32>
      %136 = arith.addf %134, %135 : vector<8x128xf32>
      %c0_55 = arith.constant 0 : index
      %c0_56 = arith.constant 0 : index
      %137 = vector.load %arg9[%c0_55, %c0_56] : memref<8x128xf32, #tpu.memory_space<vmem>>, vector<8x128xf32>
      tpu.vector_store %arg9[%c0_55, %c0_56], %136 {strides = array<i32>} : memref<8x128xf32, #tpu.memory_space<vmem>>, vector<8x128xf32>,
      %138 = arith.index_cast %103 : i32 to index
      %c0_57 = arith.constant 0 : index
      %c0_58 = arith.constant 0 : index
      %139 = vector.load %arg7[%138, %c0_57, %c0_58] : memref<4x8x128xf32, #tpu.memory_space<vmem>>, vector<1x8x128xf32>
      %140 = vector.shape_cast %139 : vector<1x8x128xf32> to vector<8x128xf32>
      %141 = vector.shape_cast %136 : vector<8x128xf32> to vector<1x8x128xf32>
      tpu.vector_store %arg7[%138, %c0_57, %c0_58], %141 {strides = array<i32>} : memref<4x8x128xf32, #tpu.memory_space<vmem>>, vector<1x8x128xf32>,
      %c3_i32_59 = arith.constant 3 : i32
      %c3_i32_60 = arith.constant 3 : i32
      %142 = arith.subi %c3_i32_60, %c3_i32_59 : i32
      %c8_i32_61 = arith.constant 8 : i32
      %143 = arith.muli %142, %c8_i32_61 : i32
      %144 = tpu.assume_multiple %143, 8 : i32
      %145 = arith.index_cast %144 : i32 to index
      %c0_62 = arith.constant 0 : index
      %146 = vector.load %arg8[%145, %c0_62] : memref<32x384xf32, #tpu.memory_space<vmem>>, vector<8x384xf32>
      %c0_63 = arith.constant 0 : index
      %c0_64 = arith.constant 0 : index
      %147 = vector.load %arg9[%c0_63, %c0_64] : memref<8x128xf32, #tpu.memory_space<vmem>>, vector<8x128xf32>
      %cst_65 = arith.constant dense<0.000000e+00> : vector<8x384xf32>
      %148 = tpu.matmul %147, %14, %cst_65 {dimension_numbers = #tpu.dot_dimension_numbers<[1], [0], [0], [1], [0, 0, 1, 1], [], []>} : vector<8x128xf32>, vector<128x384xf32>, vector<8x384xf32> -> vector<8x384xf32>
      %149 = vector.extract_strided_slice %146 {offsets = [0, 0], sizes = [8, 128], strides = [1, 1]} : vector<8x384xf32> to vector<8x128xf32>
      %150 = vector.extract_strided_slice %148 {offsets = [0, 0], sizes = [8, 128], strides = [1, 1]} : vector<8x384xf32> to vector<8x128xf32>
      %151 = arith.addf %149, %150 : vector<8x128xf32>
      %152 = arith.negf %151 : vector<8x128xf32>
      %153 = math.exp %152 : vector<8x128xf32>
      %cst_66 = arith.constant 1.000000e+00 : f32
      %154 = vector.broadcast %cst_66 : f32 to vector<8x128xf32>
      %155 = arith.addf %154, %153 : vector<8x128xf32>
      %156 = arith.divf %154, %155 : vector<8x128xf32>
      %157 = vector.extract_strided_slice %146 {offsets = [0, 128], sizes = [8, 128], strides = [1, 1]} : vector<8x384xf32> to vector<8x128xf32>
      %158 = vector.extract_strided_slice %148 {offsets = [0, 128], sizes = [8, 128], strides = [1, 1]} : vector<8x384xf32> to vector<8x128xf32>
      %159 = arith.addf %157, %158 : vector<8x128xf32>
      %160 = arith.negf %159 : vector<8x128xf32>
      %161 = math.exp %160 : vector<8x128xf32>
      %cst_67 = arith.constant 1.000000e+00 : f32
      %162 = vector.broadcast %cst_67 : f32 to vector<8x128xf32>
      %163 = arith.addf %162, %161 : vector<8x128xf32>
      %164 = arith.divf %162, %163 : vector<8x128xf32>
      %165 = vector.extract_strided_slice %146 {offsets = [0, 256], sizes = [8, 128], strides = [1, 1]} : vector<8x384xf32> to vector<8x128xf32>
      %166 = vector.extract_strided_slice %148 {offsets = [0, 256], sizes = [8, 128], strides = [1, 1]} : vector<8x384xf32> to vector<8x128xf32>
      %167 = arith.addf %166, %18 : vector<8x128xf32>
      %168 = arith.mulf %156, %167 : vector<8x128xf32>
      %169 = arith.addf %165, %168 : vector<8x128xf32>
      %170 = math.tanh %169 : vector<8x128xf32>
      %cst_68 = arith.constant 1.000000e+00 : f32
      %171 = vector.broadcast %cst_68 : f32 to vector<8x128xf32>
      %172 = arith.subf %171, %164 : vector<8x128xf32>
      %173 = arith.mulf %172, %170 : vector<8x128xf32>
      %174 = arith.mulf %164, %147 : vector<8x128xf32>
      %175 = arith.addf %173, %174 : vector<8x128xf32>
      %c0_69 = arith.constant 0 : index
      %c0_70 = arith.constant 0 : index
      %176 = vector.load %arg9[%c0_69, %c0_70] : memref<8x128xf32, #tpu.memory_space<vmem>>, vector<8x128xf32>
      tpu.vector_store %arg9[%c0_69, %c0_70], %175 {strides = array<i32>} : memref<8x128xf32, #tpu.memory_space<vmem>>, vector<8x128xf32>,
      %177 = arith.index_cast %142 : i32 to index
      %c0_71 = arith.constant 0 : index
      %c0_72 = arith.constant 0 : index
      %178 = vector.load %arg7[%177, %c0_71, %c0_72] : memref<4x8x128xf32, #tpu.memory_space<vmem>>, vector<1x8x128xf32>
      %179 = vector.shape_cast %178 : vector<1x8x128xf32> to vector<8x128xf32>
      %180 = vector.shape_cast %175 : vector<8x128xf32> to vector<1x8x128xf32>
      tpu.vector_store %arg7[%177, %c0_71, %c0_72], %180 {strides = array<i32>} : memref<4x8x128xf32, #tpu.memory_space<vmem>>, vector<1x8x128xf32>,
      %c4_i32 = arith.constant 4 : i32
    } else {
    }
    return
  }
  func.func @transform_0(%arg0: i32, %arg1: i32) -> (i32, i32, i32) {
    %c2_i32 = arith.constant 2 : i32
    %0 = arith.muli %c2_i32, %arg1 : i32
    %c1_i32 = arith.constant 1 : i32
    %1 = arith.subi %c1_i32, %0 : i32
    %2 = arith.muli %arg0, %1 : i32
    %3 = arith.addi %arg1, %2 : i32
    %c0_i32 = arith.constant 0 : i32
    %c0_i32_0 = arith.constant 0 : i32
    %c0_i32_1 = arith.constant 0 : i32
    return %3, %c0_i32, %c0_i32_0 : i32, i32, i32
  }
  func.func @transform_1(%arg0: i32, %arg1: i32) -> (i32, i32, i32) {
    %c0_i32 = arith.constant 0 : i32
    %c0_i32_0 = arith.constant 0 : i32
    %c0_i32_1 = arith.constant 0 : i32
    return %arg0, %c0_i32, %c0_i32_0 : i32, i32, i32
  }
  func.func @transform_2(%arg0: i32, %arg1: i32) -> (i32, i32, i32) {
    %c0_i32 = arith.constant 0 : i32
    %c0_i32_0 = arith.constant 0 : i32
    %c0_i32_1 = arith.constant 0 : i32
    return %arg0, %c0_i32, %c0_i32_0 : i32, i32, i32
  }
  func.func @transform_3(%arg0: i32, %arg1: i32) -> (i32, i32, i32) {
    %c0_i32 = arith.constant 0 : i32
    %c0_i32_0 = arith.constant 0 : i32
    %c0_i32_1 = arith.constant 0 : i32
    return %arg0, %c0_i32, %c0_i32_0 : i32, i32, i32
  }
  func.func @transform_4(%arg0: i32, %arg1: i32) -> (i32, i32, i32) {
    %c0_i32 = arith.constant 0 : i32
    %c0_i32_0 = arith.constant 0 : i32
    %c0_i32_1 = arith.constant 0 : i32
    return %arg0, %c0_i32, %c0_i32_0 : i32, i32, i32
  }
  func.func @transform_5(%arg0: i32, %arg1: i32) -> (i32, i32, i32) {
    %c2_i32 = arith.constant 2 : i32
    %0 = arith.muli %c2_i32, %arg1 : i32
    %c1_i32 = arith.constant 1 : i32
    %1 = arith.subi %c1_i32, %0 : i32
    %2 = arith.muli %arg0, %1 : i32
    %3 = arith.addi %arg1, %2 : i32
    %c0_i32 = arith.constant 0 : i32
    %c0_i32_0 = arith.constant 0 : i32
    return %3, %c0_i32, %arg0 : i32, i32, i32
  }
}

module attributes {stable_mosaic.version = 11 : i64} {
  func.func @_bidir_gru_kernel(%arg0: i32, %arg1: i32, %arg2: memref<4x8x256xf32, #tpu.memory_space<vmem>>, %arg3: memref<1x256x384xf32, #tpu.memory_space<vmem>>, %arg4: memref<1x1x384xf32, #tpu.memory_space<vmem>>, %arg5: memref<1x128x384xf32, #tpu.memory_space<vmem>>, %arg6: memref<1x1x128xf32, #tpu.memory_space<vmem>>, %arg7: memref<4x8x128xf32, #tpu.memory_space<vmem>>, %arg8: memref<32x384xf32, #tpu.memory_space<vmem>>, %arg9: memref<8x128xf32, #tpu.memory_space<vmem>>) attributes {dimension_semantics = [#tpu.dimension_semantics<parallel>, #tpu.dimension_semantics<arbitrary>], iteration_bounds = array<i64: 2, 2>, scalar_prefetch = 0 : i64, scratch_operands = 2 : i64, tpu.core_type = #tpu.core_type<tc>, window_params = [{transform_indices = @transform_0, window_bounds = array<i64: 4, 8, 256>}, {transform_indices = @transform_1, window_bounds = array<i64: 1, 256, 384>}, {transform_indices = @transform_2, window_bounds = array<i64: 1, 1, 384>}, {transform_indices = @transform_3, window_bounds = array<i64: 1, 128, 384>}, {transform_indices = @transform_4, window_bounds = array<i64: 1, 1, 128>}, {transform_indices = @transform_5, window_bounds = array<i64: 4, 8, 128>}]} {
    %c0_i32 = arith.constant 0 : i32
    %0 = arith.cmpi eq, %arg1, %c0_i32 : i32
    %1 = arith.extui %0 : i1 to i32
    %c0_i32_0 = arith.constant 0 : i32
    %2 = arith.cmpi ne, %1, %c0_i32_0 : i32
    scf.if %2 {
      %cst_20 = arith.constant 0.000000e+00 : f32
      %25 = vector.broadcast %cst_20 : f32 to vector<8x128xf32>
      %c0_21 = arith.constant 0 : index
      %c0_22 = arith.constant 0 : index
      %26 = vector.load %arg9[%c0_21, %c0_22] : memref<8x128xf32, #tpu.memory_space<vmem>>, vector<8x128xf32>
      tpu.vector_store %arg9[%c0_21, %c0_22], %25 {strides = array<i32>} : memref<8x128xf32, #tpu.memory_space<vmem>>, vector<8x128xf32>,
    } else {
    }
    %c0 = arith.constant 0 : index
    %c0_1 = arith.constant 0 : index
    %c0_2 = arith.constant 0 : index
    %3 = vector.load %arg2[%c0, %c0_1, %c0_2] : memref<4x8x256xf32, #tpu.memory_space<vmem>>, vector<4x8x256xf32>
    %4 = vector.shape_cast %3 : vector<4x8x256xf32> to vector<32x256xf32>
    %c0_3 = arith.constant 0 : index
    %c0_4 = arith.constant 0 : index
    %c0_5 = arith.constant 0 : index
    %5 = vector.load %arg3[%c0_3, %c0_4, %c0_5] : memref<1x256x384xf32, #tpu.memory_space<vmem>>, vector<1x256x384xf32>
    %6 = vector.shape_cast %5 : vector<1x256x384xf32> to vector<256x384xf32>
    %cst = arith.constant dense<0.000000e+00> : vector<32x384xf32>
    %7 = tpu.matmul %4, %6, %cst {dimension_numbers = #tpu.dot_dimension_numbers<[1], [0], [0], [1], [0, 0, 1, 1], [], []>} : vector<32x256xf32>, vector<256x384xf32>, vector<32x384xf32> -> vector<32x384xf32>
    %c0_6 = arith.constant 0 : index
    %c0_7 = arith.constant 0 : index
    %c0_8 = arith.constant 0 : index
    %8 = vector.load %arg4[%c0_6, %c0_7, %c0_8] : memref<1x1x384xf32, #tpu.memory_space<vmem>>, vector<1x1x384xf32>
    %9 = vector.shape_cast %8 : vector<1x1x384xf32> to vector<1x384xf32>
    %10 = vector.broadcast %9 : vector<1x384xf32> to vector<32x384xf32>
    %11 = arith.addf %7, %10 : vector<32x384xf32>
    %c0_9 = arith.constant 0 : index
    %c0_10 = arith.constant 0 : index
    %12 = vector.load %arg8[%c0_9, %c0_10] : memref<32x384xf32, #tpu.memory_space<vmem>>, vector<32x384xf32>
    tpu.vector_store %arg8[%c0_9, %c0_10], %11 {strides = array<i32>} : memref<32x384xf32, #tpu.memory_space<vmem>>, vector<32x384xf32>,
    %c0_11 = arith.constant 0 : index
    %c0_12 = arith.constant 0 : index
    %c0_13 = arith.constant 0 : index
    %13 = vector.load %arg5[%c0_11, %c0_12, %c0_13] : memref<1x128x384xf32, #tpu.memory_space<vmem>>, vector<1x128x384xf32>
    %14 = vector.shape_cast %13 : vector<1x128x384xf32> to vector<128x384xf32>
    %c0_14 = arith.constant 0 : index
    %c0_15 = arith.constant 0 : index
    %c0_16 = arith.constant 0 : index
    %15 = vector.load %arg6[%c0_14, %c0_15, %c0_16] : memref<1x1x128xf32, #tpu.memory_space<vmem>>, vector<1x1x128xf32>
    %16 = vector.shape_cast %15 : vector<1x1x128xf32> to vector<1x128xf32>
    %17 = vector.shape_cast %16 : vector<1x128xf32> to vector<1x128xf32>
    %18 = vector.broadcast %17 : vector<1x128xf32> to vector<8x128xf32>
    %c0_i32_17 = arith.constant 0 : i32
    %19 = arith.cmpi eq, %arg0, %c0_i32_17 : i32
    %20 = arith.extui %19 : i1 to i32
    %c0_i32_18 = arith.constant 0 : i32
    %21 = arith.cmpi ne, %20, %c0_i32_18 : i32
    scf.if %21 {
      %c0_i32_20 = arith.constant 0 : i32
      %c8_i32 = arith.constant 8 : i32
      %25 = arith.muli %c0_i32_20, %c8_i32 : i32
      %26 = tpu.assume_multiple %25, 8 : i32
      %27 = arith.index_cast %26 : i32 to index
      %c0_21 = arith.constant 0 : index
      %28 = vector.load %arg8[%27, %c0_21] : memref<32x384xf32, #tpu.memory_space<vmem>>, vector<8x384xf32>
      %c0_22 = arith.constant 0 : index
      %c0_23 = arith.constant 0 : index
      %29 = vector.load %arg9[%c0_22, %c0_23] : memref<8x128xf32, #tpu.memory_space<vmem>>, vector<8x128xf32>
      %cst_24 = arith.constant dense<0.000000e+00> : vector<8x384xf32>
      %30 = tpu.matmul %29, %14, %cst_24 {dimension_numbers = #tpu.dot_dimension_numbers<[1], [0], [0], [1], [0, 0, 1, 1], [], []>} : vector<8x128xf32>, vector<128x384xf32>, vector<8x384xf32> -> vector<8x384xf32>
      %31 = vector.extract_strided_slice %28 {offsets = [0, 0], sizes = [8, 128], strides = [1, 1]} : vector<8x384xf32> to vector<8x128xf32>
      %32 = vector.extract_strided_slice %30 {offsets = [0, 0], sizes = [8, 128], strides = [1, 1]} : vector<8x384xf32> to vector<8x128xf32>
      %33 = arith.addf %31, %32 : vector<8x128xf32>
      %34 = arith.negf %33 : vector<8x128xf32>
      %35 = math.exp %34 : vector<8x128xf32>
      %cst_25 = arith.constant 1.000000e+00 : f32
      %36 = vector.broadcast %cst_25 : f32 to vector<8x128xf32>
      %37 = arith.addf %36, %35 : vector<8x128xf32>
      %38 = arith.divf %36, %37 : vector<8x128xf32>
      %39 = vector.extract_strided_slice %28 {offsets = [0, 128], sizes = [8, 128], strides = [1, 1]} : vector<8x384xf32> to vector<8x128xf32>
      %40 = vector.extract_strided_slice %30 {offsets = [0, 128], sizes = [8, 128], strides = [1, 1]} : vector<8x384xf32> to vector<8x128xf32>
      %41 = arith.addf %39, %40 : vector<8x128xf32>
      %42 = arith.negf %41 : vector<8x128xf32>
      %43 = math.exp %42 : vector<8x128xf32>
      %cst_26 = arith.constant 1.000000e+00 : f32
      %44 = vector.broadcast %cst_26 : f32 to vector<8x128xf32>
      %45 = arith.addf %44, %43 : vector<8x128xf32>
      %46 = arith.divf %44, %45 : vector<8x128xf32>
      %47 = vector.extract_strided_slice %28 {offsets = [0, 256], sizes = [8, 128], strides = [1, 1]} : vector<8x384xf32> to vector<8x128xf32>
      %48 = vector.extract_strided_slice %30 {offsets = [0, 256], sizes = [8, 128], strides = [1, 1]} : vector<8x384xf32> to vector<8x128xf32>
      %49 = arith.addf %48, %18 : vector<8x128xf32>
      %50 = arith.mulf %38, %49 : vector<8x128xf32>
      %51 = arith.addf %47, %50 : vector<8x128xf32>
      %52 = math.tanh %51 : vector<8x128xf32>
      %cst_27 = arith.constant 1.000000e+00 : f32
      %53 = vector.broadcast %cst_27 : f32 to vector<8x128xf32>
      %54 = arith.subf %53, %46 : vector<8x128xf32>
      %55 = arith.mulf %54, %52 : vector<8x128xf32>
      %56 = arith.mulf %46, %29 : vector<8x128xf32>
      %57 = arith.addf %55, %56 : vector<8x128xf32>
      %c0_28 = arith.constant 0 : index
      %c0_29 = arith.constant 0 : index
      %58 = vector.load %arg9[%c0_28, %c0_29] : memref<8x128xf32, #tpu.memory_space<vmem>>, vector<8x128xf32>
      tpu.vector_store %arg9[%c0_28, %c0_29], %57 {strides = array<i32>} : memref<8x128xf32, #tpu.memory_space<vmem>>, vector<8x128xf32>,
      %59 = arith.index_cast %c0_i32_20 : i32 to index
      %c0_30 = arith.constant 0 : index
      %c0_31 = arith.constant 0 : index
      %60 = vector.load %arg7[%59, %c0_30, %c0_31] : memref<4x8x128xf32, #tpu.memory_space<vmem>>, vector<1x8x128xf32>
      %61 = vector.shape_cast %60 : vector<1x8x128xf32> to vector<8x128xf32>
      %62 = vector.shape_cast %57 : vector<8x128xf32> to vector<1x8x128xf32>
      tpu.vector_store %arg7[%59, %c0_30, %c0_31], %62 {strides = array<i32>} : memref<4x8x128xf32, #tpu.memory_space<vmem>>, vector<1x8x128xf32>,
      %c1_i32_32 = arith.constant 1 : i32
      %c8_i32_33 = arith.constant 8 : i32
      %63 = arith.muli %c1_i32_32, %c8_i32_33 : i32
      %64 = tpu.assume_multiple %63, 8 : i32
      %65 = arith.index_cast %64 : i32 to index
      %c0_34 = arith.constant 0 : index
      %66 = vector.load %arg8[%65, %c0_34] : memref<32x384xf32, #tpu.memory_space<vmem>>, vector<8x384xf32>
      %c0_35 = arith.constant 0 : index
      %c0_36 = arith.constant 0 : index
      %67 = vector.load %arg9[%c0_35, %c0_36] : memref<8x128xf32, #tpu.memory_space<vmem>>, vector<8x128xf32>
      %cst_37 = arith.constant dense<0.000000e+00> : vector<8x384xf32>
      %68 = tpu.matmul %67, %14, %cst_37 {dimension_numbers = #tpu.dot_dimension_numbers<[1], [0], [0], [1], [0, 0, 1, 1], [], []>} : vector<8x128xf32>, vector<128x384xf32>, vector<8x384xf32> -> vector<8x384xf32>
      %69 = vector.extract_strided_slice %66 {offsets = [0, 0], sizes = [8, 128], strides = [1, 1]} : vector<8x384xf32> to vector<8x128xf32>
      %70 = vector.extract_strided_slice %68 {offsets = [0, 0], sizes = [8, 128], strides = [1, 1]} : vector<8x384xf32> to vector<8x128xf32>
      %71 = arith.addf %69, %70 : vector<8x128xf32>
      %72 = arith.negf %71 : vector<8x128xf32>
      %73 = math.exp %72 : vector<8x128xf32>
      %cst_38 = arith.constant 1.000000e+00 : f32
      %74 = vector.broadcast %cst_38 : f32 to vector<8x128xf32>
      %75 = arith.addf %74, %73 : vector<8x128xf32>
      %76 = arith.divf %74, %75 : vector<8x128xf32>
      %77 = vector.extract_strided_slice %66 {offsets = [0, 128], sizes = [8, 128], strides = [1, 1]} : vector<8x384xf32> to vector<8x128xf32>
      %78 = vector.extract_strided_slice %68 {offsets = [0, 128], sizes = [8, 128], strides = [1, 1]} : vector<8x384xf32> to vector<8x128xf32>
      %79 = arith.addf %77, %78 : vector<8x128xf32>
      %80 = arith.negf %79 : vector<8x128xf32>
      %81 = math.exp %80 : vector<8x128xf32>
      %cst_39 = arith.constant 1.000000e+00 : f32
      %82 = vector.broadcast %cst_39 : f32 to vector<8x128xf32>
      %83 = arith.addf %82, %81 : vector<8x128xf32>
      %84 = arith.divf %82, %83 : vector<8x128xf32>
      %85 = vector.extract_strided_slice %66 {offsets = [0, 256], sizes = [8, 128], strides = [1, 1]} : vector<8x384xf32> to vector<8x128xf32>
      %86 = vector.extract_strided_slice %68 {offsets = [0, 256], sizes = [8, 128], strides = [1, 1]} : vector<8x384xf32> to vector<8x128xf32>
      %87 = arith.addf %86, %18 : vector<8x128xf32>
      %88 = arith.mulf %76, %87 : vector<8x128xf32>
      %89 = arith.addf %85, %88 : vector<8x128xf32>
      %90 = math.tanh %89 : vector<8x128xf32>
      %cst_40 = arith.constant 1.000000e+00 : f32
      %91 = vector.broadcast %cst_40 : f32 to vector<8x128xf32>
      %92 = arith.subf %91, %84 : vector<8x128xf32>
      %93 = arith.mulf %92, %90 : vector<8x128xf32>
      %94 = arith.mulf %84, %67 : vector<8x128xf32>
      %95 = arith.addf %93, %94 : vector<8x128xf32>
      %c0_41 = arith.constant 0 : index
      %c0_42 = arith.constant 0 : index
      %96 = vector.load %arg9[%c0_41, %c0_42] : memref<8x128xf32, #tpu.memory_space<vmem>>, vector<8x128xf32>
      tpu.vector_store %arg9[%c0_41, %c0_42], %95 {strides = array<i32>} : memref<8x128xf32, #tpu.memory_space<vmem>>, vector<8x128xf32>,
      %97 = arith.index_cast %c1_i32_32 : i32 to index
      %c0_43 = arith.constant 0 : index
      %c0_44 = arith.constant 0 : index
      %98 = vector.load %arg7[%97, %c0_43, %c0_44] : memref<4x8x128xf32, #tpu.memory_space<vmem>>, vector<1x8x128xf32>
      %99 = vector.shape_cast %98 : vector<1x8x128xf32> to vector<8x128xf32>
      %100 = vector.shape_cast %95 : vector<8x128xf32> to vector<1x8x128xf32>
      tpu.vector_store %arg7[%97, %c0_43, %c0_44], %100 {strides = array<i32>} : memref<4x8x128xf32, #tpu.memory_space<vmem>>, vector<1x8x128xf32>,
      %c2_i32 = arith.constant 2 : i32
      %c8_i32_45 = arith.constant 8 : i32
      %101 = arith.muli %c2_i32, %c8_i32_45 : i32
      %102 = tpu.assume_multiple %101, 8 : i32
      %103 = arith.index_cast %102 : i32 to index
      %c0_46 = arith.constant 0 : index
      %104 = vector.load %arg8[%103, %c0_46] : memref<32x384xf32, #tpu.memory_space<vmem>>, vector<8x384xf32>
      %c0_47 = arith.constant 0 : index
      %c0_48 = arith.constant 0 : index
      %105 = vector.load %arg9[%c0_47, %c0_48] : memref<8x128xf32, #tpu.memory_space<vmem>>, vector<8x128xf32>
      %cst_49 = arith.constant dense<0.000000e+00> : vector<8x384xf32>
      %106 = tpu.matmul %105, %14, %cst_49 {dimension_numbers = #tpu.dot_dimension_numbers<[1], [0], [0], [1], [0, 0, 1, 1], [], []>} : vector<8x128xf32>, vector<128x384xf32>, vector<8x384xf32> -> vector<8x384xf32>
      %107 = vector.extract_strided_slice %104 {offsets = [0, 0], sizes = [8, 128], strides = [1, 1]} : vector<8x384xf32> to vector<8x128xf32>
      %108 = vector.extract_strided_slice %106 {offsets = [0, 0], sizes = [8, 128], strides = [1, 1]} : vector<8x384xf32> to vector<8x128xf32>
      %109 = arith.addf %107, %108 : vector<8x128xf32>
      %110 = arith.negf %109 : vector<8x128xf32>
      %111 = math.exp %110 : vector<8x128xf32>
      %cst_50 = arith.constant 1.000000e+00 : f32
      %112 = vector.broadcast %cst_50 : f32 to vector<8x128xf32>
      %113 = arith.addf %112, %111 : vector<8x128xf32>
      %114 = arith.divf %112, %113 : vector<8x128xf32>
      %115 = vector.extract_strided_slice %104 {offsets = [0, 128], sizes = [8, 128], strides = [1, 1]} : vector<8x384xf32> to vector<8x128xf32>
      %116 = vector.extract_strided_slice %106 {offsets = [0, 128], sizes = [8, 128], strides = [1, 1]} : vector<8x384xf32> to vector<8x128xf32>
      %117 = arith.addf %115, %116 : vector<8x128xf32>
      %118 = arith.negf %117 : vector<8x128xf32>
      %119 = math.exp %118 : vector<8x128xf32>
      %cst_51 = arith.constant 1.000000e+00 : f32
      %120 = vector.broadcast %cst_51 : f32 to vector<8x128xf32>
      %121 = arith.addf %120, %119 : vector<8x128xf32>
      %122 = arith.divf %120, %121 : vector<8x128xf32>
      %123 = vector.extract_strided_slice %104 {offsets = [0, 256], sizes = [8, 128], strides = [1, 1]} : vector<8x384xf32> to vector<8x128xf32>
      %124 = vector.extract_strided_slice %106 {offsets = [0, 256], sizes = [8, 128], strides = [1, 1]} : vector<8x384xf32> to vector<8x128xf32>
      %125 = arith.addf %124, %18 : vector<8x128xf32>
      %126 = arith.mulf %114, %125 : vector<8x128xf32>
      %127 = arith.addf %123, %126 : vector<8x128xf32>
      %128 = math.tanh %127 : vector<8x128xf32>
      %cst_52 = arith.constant 1.000000e+00 : f32
      %129 = vector.broadcast %cst_52 : f32 to vector<8x128xf32>
      %130 = arith.subf %129, %122 : vector<8x128xf32>
      %131 = arith.mulf %130, %128 : vector<8x128xf32>
      %132 = arith.mulf %122, %105 : vector<8x128xf32>
      %133 = arith.addf %131, %132 : vector<8x128xf32>
      %c0_53 = arith.constant 0 : index
      %c0_54 = arith.constant 0 : index
      %134 = vector.load %arg9[%c0_53, %c0_54] : memref<8x128xf32, #tpu.memory_space<vmem>>, vector<8x128xf32>
      tpu.vector_store %arg9[%c0_53, %c0_54], %133 {strides = array<i32>} : memref<8x128xf32, #tpu.memory_space<vmem>>, vector<8x128xf32>,
      %135 = arith.index_cast %c2_i32 : i32 to index
      %c0_55 = arith.constant 0 : index
      %c0_56 = arith.constant 0 : index
      %136 = vector.load %arg7[%135, %c0_55, %c0_56] : memref<4x8x128xf32, #tpu.memory_space<vmem>>, vector<1x8x128xf32>
      %137 = vector.shape_cast %136 : vector<1x8x128xf32> to vector<8x128xf32>
      %138 = vector.shape_cast %133 : vector<8x128xf32> to vector<1x8x128xf32>
      tpu.vector_store %arg7[%135, %c0_55, %c0_56], %138 {strides = array<i32>} : memref<4x8x128xf32, #tpu.memory_space<vmem>>, vector<1x8x128xf32>,
      %c3_i32 = arith.constant 3 : i32
      %c8_i32_57 = arith.constant 8 : i32
      %139 = arith.muli %c3_i32, %c8_i32_57 : i32
      %140 = tpu.assume_multiple %139, 8 : i32
      %141 = arith.index_cast %140 : i32 to index
      %c0_58 = arith.constant 0 : index
      %142 = vector.load %arg8[%141, %c0_58] : memref<32x384xf32, #tpu.memory_space<vmem>>, vector<8x384xf32>
      %c0_59 = arith.constant 0 : index
      %c0_60 = arith.constant 0 : index
      %143 = vector.load %arg9[%c0_59, %c0_60] : memref<8x128xf32, #tpu.memory_space<vmem>>, vector<8x128xf32>
      %cst_61 = arith.constant dense<0.000000e+00> : vector<8x384xf32>
      %144 = tpu.matmul %143, %14, %cst_61 {dimension_numbers = #tpu.dot_dimension_numbers<[1], [0], [0], [1], [0, 0, 1, 1], [], []>} : vector<8x128xf32>, vector<128x384xf32>, vector<8x384xf32> -> vector<8x384xf32>
      %145 = vector.extract_strided_slice %142 {offsets = [0, 0], sizes = [8, 128], strides = [1, 1]} : vector<8x384xf32> to vector<8x128xf32>
      %146 = vector.extract_strided_slice %144 {offsets = [0, 0], sizes = [8, 128], strides = [1, 1]} : vector<8x384xf32> to vector<8x128xf32>
      %147 = arith.addf %145, %146 : vector<8x128xf32>
      %148 = arith.negf %147 : vector<8x128xf32>
      %149 = math.exp %148 : vector<8x128xf32>
      %cst_62 = arith.constant 1.000000e+00 : f32
      %150 = vector.broadcast %cst_62 : f32 to vector<8x128xf32>
      %151 = arith.addf %150, %149 : vector<8x128xf32>
      %152 = arith.divf %150, %151 : vector<8x128xf32>
      %153 = vector.extract_strided_slice %142 {offsets = [0, 128], sizes = [8, 128], strides = [1, 1]} : vector<8x384xf32> to vector<8x128xf32>
      %154 = vector.extract_strided_slice %144 {offsets = [0, 128], sizes = [8, 128], strides = [1, 1]} : vector<8x384xf32> to vector<8x128xf32>
      %155 = arith.addf %153, %154 : vector<8x128xf32>
      %156 = arith.negf %155 : vector<8x128xf32>
      %157 = math.exp %156 : vector<8x128xf32>
      %cst_63 = arith.constant 1.000000e+00 : f32
      %158 = vector.broadcast %cst_63 : f32 to vector<8x128xf32>
      %159 = arith.addf %158, %157 : vector<8x128xf32>
      %160 = arith.divf %158, %159 : vector<8x128xf32>
      %161 = vector.extract_strided_slice %142 {offsets = [0, 256], sizes = [8, 128], strides = [1, 1]} : vector<8x384xf32> to vector<8x128xf32>
      %162 = vector.extract_strided_slice %144 {offsets = [0, 256], sizes = [8, 128], strides = [1, 1]} : vector<8x384xf32> to vector<8x128xf32>
      %163 = arith.addf %162, %18 : vector<8x128xf32>
      %164 = arith.mulf %152, %163 : vector<8x128xf32>
      %165 = arith.addf %161, %164 : vector<8x128xf32>
      %166 = math.tanh %165 : vector<8x128xf32>
      %cst_64 = arith.constant 1.000000e+00 : f32
      %167 = vector.broadcast %cst_64 : f32 to vector<8x128xf32>
      %168 = arith.subf %167, %160 : vector<8x128xf32>
      %169 = arith.mulf %168, %166 : vector<8x128xf32>
      %170 = arith.mulf %160, %143 : vector<8x128xf32>
      %171 = arith.addf %169, %170 : vector<8x128xf32>
      %c0_65 = arith.constant 0 : index
      %c0_66 = arith.constant 0 : index
      %172 = vector.load %arg9[%c0_65, %c0_66] : memref<8x128xf32, #tpu.memory_space<vmem>>, vector<8x128xf32>
      tpu.vector_store %arg9[%c0_65, %c0_66], %171 {strides = array<i32>} : memref<8x128xf32, #tpu.memory_space<vmem>>, vector<8x128xf32>,
      %173 = arith.index_cast %c3_i32 : i32 to index
      %c0_67 = arith.constant 0 : index
      %c0_68 = arith.constant 0 : index
      %174 = vector.load %arg7[%173, %c0_67, %c0_68] : memref<4x8x128xf32, #tpu.memory_space<vmem>>, vector<1x8x128xf32>
      %175 = vector.shape_cast %174 : vector<1x8x128xf32> to vector<8x128xf32>
      %176 = vector.shape_cast %171 : vector<8x128xf32> to vector<1x8x128xf32>
      tpu.vector_store %arg7[%173, %c0_67, %c0_68], %176 {strides = array<i32>} : memref<4x8x128xf32, #tpu.memory_space<vmem>>, vector<1x8x128xf32>,
      %c4_i32 = arith.constant 4 : i32
    } else {
    }
    %c1_i32 = arith.constant 1 : i32
    %22 = arith.cmpi eq, %arg0, %c1_i32 : i32
    %23 = arith.extui %22 : i1 to i32
    %c0_i32_19 = arith.constant 0 : i32
    %24 = arith.cmpi ne, %23, %c0_i32_19 : i32
    scf.if %24 {
      %c0_i32_20 = arith.constant 0 : i32
      %c3_i32 = arith.constant 3 : i32
      %25 = arith.subi %c3_i32, %c0_i32_20 : i32
      %c8_i32 = arith.constant 8 : i32
      %26 = arith.muli %25, %c8_i32 : i32
      %27 = tpu.assume_multiple %26, 8 : i32
      %28 = arith.index_cast %27 : i32 to index
      %c0_21 = arith.constant 0 : index
      %29 = vector.load %arg8[%28, %c0_21] : memref<32x384xf32, #tpu.memory_space<vmem>>, vector<8x384xf32>
      %c0_22 = arith.constant 0 : index
      %c0_23 = arith.constant 0 : index
      %30 = vector.load %arg9[%c0_22, %c0_23] : memref<8x128xf32, #tpu.memory_space<vmem>>, vector<8x128xf32>
      %cst_24 = arith.constant dense<0.000000e+00> : vector<8x384xf32>
      %31 = tpu.matmul %30, %14, %cst_24 {dimension_numbers = #tpu.dot_dimension_numbers<[1], [0], [0], [1], [0, 0, 1, 1], [], []>} : vector<8x128xf32>, vector<128x384xf32>, vector<8x384xf32> -> vector<8x384xf32>
      %32 = vector.extract_strided_slice %29 {offsets = [0, 0], sizes = [8, 128], strides = [1, 1]} : vector<8x384xf32> to vector<8x128xf32>
      %33 = vector.extract_strided_slice %31 {offsets = [0, 0], sizes = [8, 128], strides = [1, 1]} : vector<8x384xf32> to vector<8x128xf32>
      %34 = arith.addf %32, %33 : vector<8x128xf32>
      %35 = arith.negf %34 : vector<8x128xf32>
      %36 = math.exp %35 : vector<8x128xf32>
      %cst_25 = arith.constant 1.000000e+00 : f32
      %37 = vector.broadcast %cst_25 : f32 to vector<8x128xf32>
      %38 = arith.addf %37, %36 : vector<8x128xf32>
      %39 = arith.divf %37, %38 : vector<8x128xf32>
      %40 = vector.extract_strided_slice %29 {offsets = [0, 128], sizes = [8, 128], strides = [1, 1]} : vector<8x384xf32> to vector<8x128xf32>
      %41 = vector.extract_strided_slice %31 {offsets = [0, 128], sizes = [8, 128], strides = [1, 1]} : vector<8x384xf32> to vector<8x128xf32>
      %42 = arith.addf %40, %41 : vector<8x128xf32>
      %43 = arith.negf %42 : vector<8x128xf32>
      %44 = math.exp %43 : vector<8x128xf32>
      %cst_26 = arith.constant 1.000000e+00 : f32
      %45 = vector.broadcast %cst_26 : f32 to vector<8x128xf32>
      %46 = arith.addf %45, %44 : vector<8x128xf32>
      %47 = arith.divf %45, %46 : vector<8x128xf32>
      %48 = vector.extract_strided_slice %29 {offsets = [0, 256], sizes = [8, 128], strides = [1, 1]} : vector<8x384xf32> to vector<8x128xf32>
      %49 = vector.extract_strided_slice %31 {offsets = [0, 256], sizes = [8, 128], strides = [1, 1]} : vector<8x384xf32> to vector<8x128xf32>
      %50 = arith.addf %49, %18 : vector<8x128xf32>
      %51 = arith.mulf %39, %50 : vector<8x128xf32>
      %52 = arith.addf %48, %51 : vector<8x128xf32>
      %53 = math.tanh %52 : vector<8x128xf32>
      %cst_27 = arith.constant 1.000000e+00 : f32
      %54 = vector.broadcast %cst_27 : f32 to vector<8x128xf32>
      %55 = arith.subf %54, %47 : vector<8x128xf32>
      %56 = arith.mulf %55, %53 : vector<8x128xf32>
      %57 = arith.mulf %47, %30 : vector<8x128xf32>
      %58 = arith.addf %56, %57 : vector<8x128xf32>
      %c0_28 = arith.constant 0 : index
      %c0_29 = arith.constant 0 : index
      %59 = vector.load %arg9[%c0_28, %c0_29] : memref<8x128xf32, #tpu.memory_space<vmem>>, vector<8x128xf32>
      tpu.vector_store %arg9[%c0_28, %c0_29], %58 {strides = array<i32>} : memref<8x128xf32, #tpu.memory_space<vmem>>, vector<8x128xf32>,
      %60 = arith.index_cast %25 : i32 to index
      %c0_30 = arith.constant 0 : index
      %c0_31 = arith.constant 0 : index
      %61 = vector.load %arg7[%60, %c0_30, %c0_31] : memref<4x8x128xf32, #tpu.memory_space<vmem>>, vector<1x8x128xf32>
      %62 = vector.shape_cast %61 : vector<1x8x128xf32> to vector<8x128xf32>
      %63 = vector.shape_cast %58 : vector<8x128xf32> to vector<1x8x128xf32>
      tpu.vector_store %arg7[%60, %c0_30, %c0_31], %63 {strides = array<i32>} : memref<4x8x128xf32, #tpu.memory_space<vmem>>, vector<1x8x128xf32>,
      %c1_i32_32 = arith.constant 1 : i32
      %c3_i32_33 = arith.constant 3 : i32
      %64 = arith.subi %c3_i32_33, %c1_i32_32 : i32
      %c8_i32_34 = arith.constant 8 : i32
      %65 = arith.muli %64, %c8_i32_34 : i32
      %66 = tpu.assume_multiple %65, 8 : i32
      %67 = arith.index_cast %66 : i32 to index
      %c0_35 = arith.constant 0 : index
      %68 = vector.load %arg8[%67, %c0_35] : memref<32x384xf32, #tpu.memory_space<vmem>>, vector<8x384xf32>
      %c0_36 = arith.constant 0 : index
      %c0_37 = arith.constant 0 : index
      %69 = vector.load %arg9[%c0_36, %c0_37] : memref<8x128xf32, #tpu.memory_space<vmem>>, vector<8x128xf32>
      %cst_38 = arith.constant dense<0.000000e+00> : vector<8x384xf32>
      %70 = tpu.matmul %69, %14, %cst_38 {dimension_numbers = #tpu.dot_dimension_numbers<[1], [0], [0], [1], [0, 0, 1, 1], [], []>} : vector<8x128xf32>, vector<128x384xf32>, vector<8x384xf32> -> vector<8x384xf32>
      %71 = vector.extract_strided_slice %68 {offsets = [0, 0], sizes = [8, 128], strides = [1, 1]} : vector<8x384xf32> to vector<8x128xf32>
      %72 = vector.extract_strided_slice %70 {offsets = [0, 0], sizes = [8, 128], strides = [1, 1]} : vector<8x384xf32> to vector<8x128xf32>
      %73 = arith.addf %71, %72 : vector<8x128xf32>
      %74 = arith.negf %73 : vector<8x128xf32>
      %75 = math.exp %74 : vector<8x128xf32>
      %cst_39 = arith.constant 1.000000e+00 : f32
      %76 = vector.broadcast %cst_39 : f32 to vector<8x128xf32>
      %77 = arith.addf %76, %75 : vector<8x128xf32>
      %78 = arith.divf %76, %77 : vector<8x128xf32>
      %79 = vector.extract_strided_slice %68 {offsets = [0, 128], sizes = [8, 128], strides = [1, 1]} : vector<8x384xf32> to vector<8x128xf32>
      %80 = vector.extract_strided_slice %70 {offsets = [0, 128], sizes = [8, 128], strides = [1, 1]} : vector<8x384xf32> to vector<8x128xf32>
      %81 = arith.addf %79, %80 : vector<8x128xf32>
      %82 = arith.negf %81 : vector<8x128xf32>
      %83 = math.exp %82 : vector<8x128xf32>
      %cst_40 = arith.constant 1.000000e+00 : f32
      %84 = vector.broadcast %cst_40 : f32 to vector<8x128xf32>
      %85 = arith.addf %84, %83 : vector<8x128xf32>
      %86 = arith.divf %84, %85 : vector<8x128xf32>
      %87 = vector.extract_strided_slice %68 {offsets = [0, 256], sizes = [8, 128], strides = [1, 1]} : vector<8x384xf32> to vector<8x128xf32>
      %88 = vector.extract_strided_slice %70 {offsets = [0, 256], sizes = [8, 128], strides = [1, 1]} : vector<8x384xf32> to vector<8x128xf32>
      %89 = arith.addf %88, %18 : vector<8x128xf32>
      %90 = arith.mulf %78, %89 : vector<8x128xf32>
      %91 = arith.addf %87, %90 : vector<8x128xf32>
      %92 = math.tanh %91 : vector<8x128xf32>
      %cst_41 = arith.constant 1.000000e+00 : f32
      %93 = vector.broadcast %cst_41 : f32 to vector<8x128xf32>
      %94 = arith.subf %93, %86 : vector<8x128xf32>
      %95 = arith.mulf %94, %92 : vector<8x128xf32>
      %96 = arith.mulf %86, %69 : vector<8x128xf32>
      %97 = arith.addf %95, %96 : vector<8x128xf32>
      %c0_42 = arith.constant 0 : index
      %c0_43 = arith.constant 0 : index
      %98 = vector.load %arg9[%c0_42, %c0_43] : memref<8x128xf32, #tpu.memory_space<vmem>>, vector<8x128xf32>
      tpu.vector_store %arg9[%c0_42, %c0_43], %97 {strides = array<i32>} : memref<8x128xf32, #tpu.memory_space<vmem>>, vector<8x128xf32>,
      %99 = arith.index_cast %64 : i32 to index
      %c0_44 = arith.constant 0 : index
      %c0_45 = arith.constant 0 : index
      %100 = vector.load %arg7[%99, %c0_44, %c0_45] : memref<4x8x128xf32, #tpu.memory_space<vmem>>, vector<1x8x128xf32>
      %101 = vector.shape_cast %100 : vector<1x8x128xf32> to vector<8x128xf32>
      %102 = vector.shape_cast %97 : vector<8x128xf32> to vector<1x8x128xf32>
      tpu.vector_store %arg7[%99, %c0_44, %c0_45], %102 {strides = array<i32>} : memref<4x8x128xf32, #tpu.memory_space<vmem>>, vector<1x8x128xf32>,
      %c2_i32 = arith.constant 2 : i32
      %c3_i32_46 = arith.constant 3 : i32
      %103 = arith.subi %c3_i32_46, %c2_i32 : i32
      %c8_i32_47 = arith.constant 8 : i32
      %104 = arith.muli %103, %c8_i32_47 : i32
      %105 = tpu.assume_multiple %104, 8 : i32
      %106 = arith.index_cast %105 : i32 to index
      %c0_48 = arith.constant 0 : index
      %107 = vector.load %arg8[%106, %c0_48] : memref<32x384xf32, #tpu.memory_space<vmem>>, vector<8x384xf32>
      %c0_49 = arith.constant 0 : index
      %c0_50 = arith.constant 0 : index
      %108 = vector.load %arg9[%c0_49, %c0_50] : memref<8x128xf32, #tpu.memory_space<vmem>>, vector<8x128xf32>
      %cst_51 = arith.constant dense<0.000000e+00> : vector<8x384xf32>
      %109 = tpu.matmul %108, %14, %cst_51 {dimension_numbers = #tpu.dot_dimension_numbers<[1], [0], [0], [1], [0, 0, 1, 1], [], []>} : vector<8x128xf32>, vector<128x384xf32>, vector<8x384xf32> -> vector<8x384xf32>
      %110 = vector.extract_strided_slice %107 {offsets = [0, 0], sizes = [8, 128], strides = [1, 1]} : vector<8x384xf32> to vector<8x128xf32>
      %111 = vector.extract_strided_slice %109 {offsets = [0, 0], sizes = [8, 128], strides = [1, 1]} : vector<8x384xf32> to vector<8x128xf32>
      %112 = arith.addf %110, %111 : vector<8x128xf32>
      %113 = arith.negf %112 : vector<8x128xf32>
      %114 = math.exp %113 : vector<8x128xf32>
      %cst_52 = arith.constant 1.000000e+00 : f32
      %115 = vector.broadcast %cst_52 : f32 to vector<8x128xf32>
      %116 = arith.addf %115, %114 : vector<8x128xf32>
      %117 = arith.divf %115, %116 : vector<8x128xf32>
      %118 = vector.extract_strided_slice %107 {offsets = [0, 128], sizes = [8, 128], strides = [1, 1]} : vector<8x384xf32> to vector<8x128xf32>
      %119 = vector.extract_strided_slice %109 {offsets = [0, 128], sizes = [8, 128], strides = [1, 1]} : vector<8x384xf32> to vector<8x128xf32>
      %120 = arith.addf %118, %119 : vector<8x128xf32>
      %121 = arith.negf %120 : vector<8x128xf32>
      %122 = math.exp %121 : vector<8x128xf32>
      %cst_53 = arith.constant 1.000000e+00 : f32
      %123 = vector.broadcast %cst_53 : f32 to vector<8x128xf32>
      %124 = arith.addf %123, %122 : vector<8x128xf32>
      %125 = arith.divf %123, %124 : vector<8x128xf32>
      %126 = vector.extract_strided_slice %107 {offsets = [0, 256], sizes = [8, 128], strides = [1, 1]} : vector<8x384xf32> to vector<8x128xf32>
      %127 = vector.extract_strided_slice %109 {offsets = [0, 256], sizes = [8, 128], strides = [1, 1]} : vector<8x384xf32> to vector<8x128xf32>
      %128 = arith.addf %127, %18 : vector<8x128xf32>
      %129 = arith.mulf %117, %128 : vector<8x128xf32>
      %130 = arith.addf %126, %129 : vector<8x128xf32>
      %131 = math.tanh %130 : vector<8x128xf32>
      %cst_54 = arith.constant 1.000000e+00 : f32
      %132 = vector.broadcast %cst_54 : f32 to vector<8x128xf32>
      %133 = arith.subf %132, %125 : vector<8x128xf32>
      %134 = arith.mulf %133, %131 : vector<8x128xf32>
      %135 = arith.mulf %125, %108 : vector<8x128xf32>
      %136 = arith.addf %134, %135 : vector<8x128xf32>
      %c0_55 = arith.constant 0 : index
      %c0_56 = arith.constant 0 : index
      %137 = vector.load %arg9[%c0_55, %c0_56] : memref<8x128xf32, #tpu.memory_space<vmem>>, vector<8x128xf32>
      tpu.vector_store %arg9[%c0_55, %c0_56], %136 {strides = array<i32>} : memref<8x128xf32, #tpu.memory_space<vmem>>, vector<8x128xf32>,
      %138 = arith.index_cast %103 : i32 to index
      %c0_57 = arith.constant 0 : index
      %c0_58 = arith.constant 0 : index
      %139 = vector.load %arg7[%138, %c0_57, %c0_58] : memref<4x8x128xf32, #tpu.memory_space<vmem>>, vector<1x8x128xf32>
      %140 = vector.shape_cast %139 : vector<1x8x128xf32> to vector<8x128xf32>
      %141 = vector.shape_cast %136 : vector<8x128xf32> to vector<1x8x128xf32>
      tpu.vector_store %arg7[%138, %c0_57, %c0_58], %141 {strides = array<i32>} : memref<4x8x128xf32, #tpu.memory_space<vmem>>, vector<1x8x128xf32>,
      %c3_i32_59 = arith.constant 3 : i32
      %c3_i32_60 = arith.constant 3 : i32
      %142 = arith.subi %c3_i32_60, %c3_i32_59 : i32
      %c8_i32_61 = arith.constant 8 : i32
      %143 = arith.muli %142, %c8_i32_61 : i32
      %144 = tpu.assume_multiple %143, 8 : i32
      %145 = arith.index_cast %144 : i32 to index
      %c0_62 = arith.constant 0 : index
      %146 = vector.load %arg8[%145, %c0_62] : memref<32x384xf32, #tpu.memory_space<vmem>>, vector<8x384xf32>
      %c0_63 = arith.constant 0 : index
      %c0_64 = arith.constant 0 : index
      %147 = vector.load %arg9[%c0_63, %c0_64] : memref<8x128xf32, #tpu.memory_space<vmem>>, vector<8x128xf32>
      %cst_65 = arith.constant dense<0.000000e+00> : vector<8x384xf32>
      %148 = tpu.matmul %147, %14, %cst_65 {dimension_numbers = #tpu.dot_dimension_numbers<[1], [0], [0], [1], [0, 0, 1, 1], [], []>} : vector<8x128xf32>, vector<128x384xf32>, vector<8x384xf32> -> vector<8x384xf32>
      %149 = vector.extract_strided_slice %146 {offsets = [0, 0], sizes = [8, 128], strides = [1, 1]} : vector<8x384xf32> to vector<8x128xf32>
      %150 = vector.extract_strided_slice %148 {offsets = [0, 0], sizes = [8, 128], strides = [1, 1]} : vector<8x384xf32> to vector<8x128xf32>
      %151 = arith.addf %149, %150 : vector<8x128xf32>
      %152 = arith.negf %151 : vector<8x128xf32>
      %153 = math.exp %152 : vector<8x128xf32>
      %cst_66 = arith.constant 1.000000e+00 : f32
      %154 = vector.broadcast %cst_66 : f32 to vector<8x128xf32>
      %155 = arith.addf %154, %153 : vector<8x128xf32>
      %156 = arith.divf %154, %155 : vector<8x128xf32>
      %157 = vector.extract_strided_slice %146 {offsets = [0, 128], sizes = [8, 128], strides = [1, 1]} : vector<8x384xf32> to vector<8x128xf32>
      %158 = vector.extract_strided_slice %148 {offsets = [0, 128], sizes = [8, 128], strides = [1, 1]} : vector<8x384xf32> to vector<8x128xf32>
      %159 = arith.addf %157, %158 : vector<8x128xf32>
      %160 = arith.negf %159 : vector<8x128xf32>
      %161 = math.exp %160 : vector<8x128xf32>
      %cst_67 = arith.constant 1.000000e+00 : f32
      %162 = vector.broadcast %cst_67 : f32 to vector<8x128xf32>
      %163 = arith.addf %162, %161 : vector<8x128xf32>
      %164 = arith.divf %162, %163 : vector<8x128xf32>
      %165 = vector.extract_strided_slice %146 {offsets = [0, 256], sizes = [8, 128], strides = [1, 1]} : vector<8x384xf32> to vector<8x128xf32>
      %166 = vector.extract_strided_slice %148 {offsets = [0, 256], sizes = [8, 128], strides = [1, 1]} : vector<8x384xf32> to vector<8x128xf32>
      %167 = arith.addf %166, %18 : vector<8x128xf32>
      %168 = arith.mulf %156, %167 : vector<8x128xf32>
      %169 = arith.addf %165, %168 : vector<8x128xf32>
      %170 = math.tanh %169 : vector<8x128xf32>
      %cst_68 = arith.constant 1.000000e+00 : f32
      %171 = vector.broadcast %cst_68 : f32 to vector<8x128xf32>
      %172 = arith.subf %171, %164 : vector<8x128xf32>
      %173 = arith.mulf %172, %170 : vector<8x128xf32>
      %174 = arith.mulf %164, %147 : vector<8x128xf32>
      %175 = arith.addf %173, %174 : vector<8x128xf32>
      %c0_69 = arith.constant 0 : index
      %c0_70 = arith.constant 0 : index
      %176 = vector.load %arg9[%c0_69, %c0_70] : memref<8x128xf32, #tpu.memory_space<vmem>>, vector<8x128xf32>
      tpu.vector_store %arg9[%c0_69, %c0_70], %175 {strides = array<i32>} : memref<8x128xf32, #tpu.memory_space<vmem>>, vector<8x128xf32>,
      %177 = arith.index_cast %142 : i32 to index
      %c0_71 = arith.constant 0 : index
      %c0_72 = arith.constant 0 : index
      %178 = vector.load %arg7[%177, %c0_71, %c0_72] : memref<4x8x128xf32, #tpu.memory_space<vmem>>, vector<1x8x128xf32>
      %179 = vector.shape_cast %178 : vector<1x8x128xf32> to vector<8x128xf32>
      %180 = vector.shape_cast %175 : vector<8x128xf32> to vector<1x8x128xf32>
      tpu.vector_store %arg7[%177, %c0_71, %c0_72], %180 {strides = array<i32>} : memref<4x8x128xf32, #tpu.memory_space<vmem>>, vector<1x8x128xf32>,
      %c4_i32 = arith.constant 4 : i32
    } else {
    }
    return
  }
  func.func @transform_0(%arg0: i32, %arg1: i32) -> (i32, i32, i32) {
    %c2_i32 = arith.constant 2 : i32
    %0 = arith.muli %c2_i32, %arg1 : i32
    %c1_i32 = arith.constant 1 : i32
    %1 = arith.subi %c1_i32, %0 : i32
    %2 = arith.muli %arg0, %1 : i32
    %3 = arith.addi %arg1, %2 : i32
    %c0_i32 = arith.constant 0 : i32
    %c0_i32_0 = arith.constant 0 : i32
    %c0_i32_1 = arith.constant 0 : i32
    return %3, %c0_i32, %c0_i32_0 : i32, i32, i32
  }
  func.func @transform_1(%arg0: i32, %arg1: i32) -> (i32, i32, i32) {
    %c0_i32 = arith.constant 0 : i32
    %c0_i32_0 = arith.constant 0 : i32
    %c0_i32_1 = arith.constant 0 : i32
    return %arg0, %c0_i32, %c0_i32_0 : i32, i32, i32
  }
  func.func @transform_2(%arg0: i32, %arg1: i32) -> (i32, i32, i32) {
    %c0_i32 = arith.constant 0 : i32
    %c0_i32_0 = arith.constant 0 : i32
    %c0_i32_1 = arith.constant 0 : i32
    return %arg0, %c0_i32, %c0_i32_0 : i32, i32, i32
  }
  func.func @transform_3(%arg0: i32, %arg1: i32) -> (i32, i32, i32) {
    %c0_i32 = arith.constant 0 : i32
    %c0_i32_0 = arith.constant 0 : i32
    %c0_i32_1 = arith.constant 0 : i32
    return %arg0, %c0_i32, %c0_i32_0 : i32, i32, i32
  }
  func.func @transform_4(%arg0: i32, %arg1: i32) -> (i32, i32, i32) {
    %c0_i32 = arith.constant 0 : i32
    %c0_i32_0 = arith.constant 0 : i32
    %c0_i32_1 = arith.constant 0 : i32
    return %arg0, %c0_i32, %c0_i32_0 : i32, i32, i32
  }
  func.func @transform_5(%arg0: i32, %arg1: i32) -> (i32, i32, i32) {
    %c2_i32 = arith.constant 2 : i32
    %0 = arith.muli %c2_i32, %arg1 : i32
    %c1_i32 = arith.constant 1 : i32
    %1 = arith.subi %c1_i32, %0 : i32
    %2 = arith.muli %arg0, %1 : i32
    %3 = arith.addi %arg1, %2 : i32
    %c0_i32 = arith.constant 0 : i32
    %c0_i32_0 = arith.constant 0 : i32
    return %3, %c0_i32, %arg0 : i32, i32, i32
  }
}

</mosaic_0001>

<bundles_post_ra>
// kernel: sentence_with_position_forward.2
= control target key start
LH: loop header
LB: loop body
LE: loop exit
PB: predicated region body
PF: predicated region fallthrough
CT: control target
= control target key end

     0   :  { %s3445_s18 = smov 0   ;;  %s3447_s19 = smov 0   ;;  %s4293_s0 = inlined_call_operand.vmem [shape: f32[8,8,64], index: 0, kind: input, shape index: {}]   ;;  %s4294_s1 = inlined_call_operand.vmem [shape: f32[2,64,384], index: 1, kind: input, shape index: {}]   ;;  %s4295_s2 = inlined_call_operand.vmem [shape: f32[2,1,384], index: 2, kind: input, shape index: {}]   ;;  %s4296_s3 = inlined_call_operand.vmem [shape: f32[2,128,384], index: 3, kind: input, shape index: {}]   ;;  %s4297_s4 = inlined_call_operand.vmem [shape: f32[2,1,128], index: 4, kind: input, shape index: {}]   ;;  %s4298_s5 = inlined_call_operand.vmem [shape: f32[8,8,256], index: 5, kind: output, shape index: {}]  }
   0x1   :  { %s3449_s20 = smov 0   ;;  %s3451_s21 = smov 0  }
   0x2   :  { %s3453_s22 = smov 0   ;;  %s3455_s23 = smov 0  }
   0x3   :  { %s3457_s24 = smov 0  }
   0x4 LB: > { %4334 = sst [smem:[#allocation5_spill]] %s3397_s22  ;;  %s24_s25 = sadd.s32 1, %s3397_s22  ;;  %s3405_s24 = sphi %s3457_s24, %s15_s24   ;;  %s3401_s23 = sphi %s3455_s23, %s4412_s23   ;;  %s3397_s22 = sphi %s3453_s22, %s4411_s22   ;;  %s3393_s21 = sphi %s3451_s21, %s4410_s21   ;;  %s3389_s20 = sphi %s3449_s20, %s4409_s20   ;;  %s3385_s19 = sphi %s3447_s19, %s4414_s19   ;;  %s3381_s18 = sphi %s3445_s18, %s4413_s18  }
   0x5   : > { %4335 = sst [smem:[#allocation6_spill]] %s3401_s23  ;;  %p25_p0 = scmp.ge.s32.totalorder %s24_s25, 2 }
   0x6   : > { %s27_s26 = sadd.s32 1, %s3401_s23  ;;  %s2217_s27 = sadd.s32 4294967295, %s3405_s24  }
   0x7   : > { %s2221_s28 = sshll.u32 %s3397_s22, 1  ;;  %s4416_s25 = smov (%p25_p0, %s24_s25), 0 }
   0x8   : > { %4336 = sst [smem:[#allocation7_spill]] %s4416_s25  ;;  %s4418_s26 = smov (!%p25_p0, %s27_s26), %s3401_s23 }
   0x9   : > { %s170_s29 = ssub.s32 1, %s2221_s28  ;;  %s2222_s30 = sshll.u32 %s4416_s25, 1 }
   0xa   : > { %p29_p1 = scmp.ge.s32.totalorder %s4418_s26, 2  ;;  %s171_s6 = smul.u32 %s3401_s23, %s170_s29 }
   0xb   : > { %s174_s7 = ssub.s32 1, %s2222_s30  ;;  %p192_p2 = scmp.ne.s32.totalorder %s3385_s19, %s3381_s18 }
   0xc   : > { %s4420_s26 = smov (%p29_p1, %s4418_s26), 0  ;;  %s172_s8 = sadd.s32 %s3397_s22, %s171_s6 }
   0xd   : > { %4337 = sst [smem:[#allocation8_spill]] %s4420_s26  ;;  %p193_p3 = scmp.eq.s32.totalorder %s2217_s27, 3 }
   0xe   : > { %s175_s9 = smul.u32 %s174_s7, %s4420_s26  ;;  %s178_s10 = ssub.s32 %s3401_s23, %s4420_s26 }
   0xf   : > { %p3497_p4 = por %p193_p3, %p192_p2  ;;  %p2225_p5 = scmp.ge.s32.totalorder %s3405_s24, 1 }
  0x10   : > { %s176_s12 = sadd.s32 %s175_s9, %s4416_s25  ;;  %p263_p6 = scmp.lt.s32.totalorder %s3405_s24, 5 }
  0x11   : > { %s177_s13 = ssub.s32 %s172_s8, %s176_s12  ;;  %s182_s14 = sadd.s32 1, %s3385_s19 }
  0x12   : > { %s179_s15 = sor.u32 %s178_s10, %s177_s13  ;;  %p264_p7 = pnand %p2225_p5, %p263_p6 }
  0x13   : > { %p180_p8 = scmp.eq.s32.totalorder %s179_s15, 0 }
  0x14   : > { %267 = sbr.rel (%p264_p7) target bundleno = 2431 (0x97f), region = 40 }
  0x15   : > { %s3506_s16 = scalar_select %p180_p8, %s3385_s19, %s182_s14  }
  0x17   : > { %4339 = sst [smem:[#allocation9_spill]] %s3506_s16 }
  0x1b   : > { %s308_s17 = sand.u32 1, %s3381_s18   ;;  %s2227_s27 = sshll.u32 %s3389_s20, 1 }
  0x1c   : > { %s2226_s28 = sshll.u32 %s308_s17, 5  ;;  %s312_s29 = ssub.s32 1, %s2227_s27 }
  0x1d   : > { %s313_s30 = smul.u32 %s3393_s21, %s312_s29  ;;  %p325_p9 = scmp.lt.s32.totalorder %s3393_s21, 1 }
  0x1e   : > { %s3546_s12 = scalar_lea.vmem [#allocation4], %s2226_s28  ;;  %p2232_p11 = scmp.ne.s32.totalorder %s3389_s20, 0 }
  0x1f   : > { %s3513_s6 = sadd.s32 %s3389_s20, %s313_s30  ;;  %v3407_v0 = vmov (!%p2232_p11), 0.0  }
  0x20   : > { %s2228_s7 = sshll.u32 %s3513_s6, 2  ;;  %351 = vst [vmem:[#allocation3] sm:$0xff] (!%p2232_p11), %v3407_v0 }
  0x21   : > { %p316_p10 = scmp.lt.s32.totalorder %s2228_s7, 7 }
  0x22   : > { %s3517_s8 = scalar_select %p325_p9, %s3393_s21, 1 }
  0x23   : > { %s4422_s7 = smov (!%p316_p10, %s2228_s7), 7  ;;  %350 = sbr.rel (%p2232_p11) target bundleno = 42 (0x2a), region = 44 }
  0x24   : > { %s3204_s9 = smul.u32 192, %s3517_s8  ;;  %s2229_s13 = sshll.u32 %s4422_s7, 3 }
  0x25   : > { %s3205_s14 = smul.u32 3, %s3517_s8  ;;  %s3528_s27 = scalar_lea.vmem %s4293_s0, %s2229_s13 }
  0x26   : > { %s3533_s26 = scalar_lea.vmem %s4294_s1, %s3204_s9  ;;  %s3206_s16 = smul.u32 384, %s3517_s8 }
  0x27   : > { %s3538_s22 = scalar_lea.vmem %s4295_s2, %s3205_s14 }
  0x28   : > { %s3544_s7 = scalar_lea.vmem %s4296_s3, %s3206_s16 }
  0x2a PF: > { %v357_v1 = vld [vmem:[%s3533_s26 + $0x8] sm:$0xff]  ;;  %v360_v2 = vld [vmem:[%s3533_s26 + $0x20] sm:$0xff]  ;;  %v359_v5 = vld [vmem:[%s3533_s26 + $0x18] sm:$0xff]  ;;  %v3408_v8 = vmov 0.0   ;;  %vm397_vm0 = vcmask 523264   ;;  %s4369_s25 = scalar_lea.vmem %s4297_s4, %s3517_s8  ;;  %p2242_p12 = scmp.ne.s32.totalorder %s3393_s21, 0 }
  0x2b   : > { %v356_v3 = vld [vmem:[%s3533_s26] sm:$0xff]  ;;  %v2724_v4 = vpack.c.bf16 %v360_v2, %v357_v1  ;;  %v363_v6 = vld [vmem:[%s3533_s26 + $0x38] sm:$0xff]  ;;  %v366_v7 = vld [vmem:[%s3533_s26 + $0x50] sm:$0xff]  ;;  %474 = vmatprep.mubr.f32.mxu0 %v3408_v8  ;;  %vm3411_vm1 = vmmov (!%p2242_p12), 0  }
  0x2c   : > { %v2726_v9 = vpack.c.bf16 %v359_v5, %v356_v3  ;;  %v2728_v10 = vpack.c.bf16 %v366_v7, %v363_v6  ;;  %v362_v11 = vld [vmem:[%s3533_s26 + $0x30] sm:$0xff]  ;;  %v365_v12 = vld [vmem:[%s3533_s26 + $0x48] sm:$0xff]  ;;  %v372_v16 = vld [vmem:[%s3533_s26 + $0x80] sm:$0xff] }
  0x2d   : > { %v358_v13 = vld [vmem:[%s3533_s26 + $0x10] sm:$0xff]  ;;  %2725 = vmatprep.subr.bf16.mxu0 %v2724_v4  ;;  %v361_v14 = vld [vmem:[%s3533_s26 + $0x28] sm:$0xff]  ;;  %v2730_v17 = vpack.c.bf16 %v365_v12, %v362_v11  ;;  %v364_v19 = vld [vmem:[%s3533_s26 + $0x40] sm:$0xff] }
  0x2e   : > { %v369_v15 = vld [vmem:[%s3533_s26 + $0x68] sm:$0xff]  ;;  %2727 = vmatpush1.bf16.msra.mxu0 %v2726_v9  ;;  %v2740_v18 = vpack.c.bf16 %v361_v14, %v358_v13  ;;  %v368_v21 = vld [vmem:[%s3533_s26 + $0x60] sm:$0xff]  ;;  %v371_v22 = vld [vmem:[%s3533_s26 + $0x78] sm:$0xff] }
  0x2f   : > { %2729 = vmatprep.subr.bf16.mxu0 %v2728_v10  ;;  %v2732_v20 = vpack.c.bf16 %v372_v16, %v369_v15  ;;  %v367_v23 = vld [vmem:[%s3533_s26 + $0x58] sm:$0xff]  ;;  %v378_v26 = vld [vmem:[%s3533_s26 + $0xb0] sm:$0xff]  ;;  %v373_v28 = vld [vmem:[%s3533_s26 + $0x88] sm:$0xff]  ;;  %v2734_v29 = vpack.c.bf16 %v371_v22, %v368_v21 }
  0x30   : > { %2741 = vmatprep.subr.bf16.mxu1 %v2740_v18  ;;  %v2744_v24 = vpack.c.bf16 %v367_v23, %v364_v19  ;;  %v375_v25 = vld [vmem:[%s3533_s26 + $0x98] sm:$0xff]  ;;  %v370_v27 = vld [vmem:[%s3533_s26 + $0x70] sm:$0xff]  ;;  %v352_v32 = vld [vmem:[%s3528_s27] sm:$0xff] }
  0x31   : > { %2743 = vmatpush3.bf16.msra.mxu1 %v2740_v18  ;;  %v374_v30 = vld [vmem:[%s3533_s26 + $0x90] sm:$0xff]  ;;  %v2748_v31 = vpack.c.bf16 %v373_v28, %v370_v27  ;;  %v2736_v33 = vpack.c.bf16 %v378_v26, %v375_v25  ;;  %v377_v34 = vld [vmem:[%s3533_s26 + $0xa8] sm:$0xff]  ;;  %v376_v35 = vld [vmem:[%s3533_s26 + $0xa0] sm:$0xff]  ;;  %2438 = vmatprep.mubr.msk.f32.mxu1 %vm397_vm0, %v352_v32  ;;  %v382_v27 = vlaneseq }
  0x32   : > { %2731 = vmatpush1.bf16.msra.mxu0 %v2730_v17  ;;  %2745 = vmatprep.subr.bf16.mxu1 %v2744_v24  ;;  %v379_v36 = vld [vmem:[%s3533_s26 + $0xb8] sm:$0xff]  ;;  %v2738_v37 = vpack.c.bf16 %v377_v34, %v374_v30  ;;  %v353_v39 = vld [vmem:[%s3528_s27 + $0x8] sm:$0xff]  ;;  %v354_v40 = vld [vmem:[%s3528_s27 + $0x10] sm:$0xff] }
  0x33   : > { %2733 = vmatprep.subr.bf16.mxu0 %v2732_v20  ;;  %v2752_v38 = vpack.c.bf16 %v379_v36, %v376_v35  ;;  %v355_v41 = vld [vmem:[%s3528_s27 + $0x18] sm:$0xff]  ;;  %v3586_v42 = vld [vmem:[%s3544_s7] sm:$0xff]  ;;  %v3589_v43 = vld [vmem:[%s3544_s7 + $0x8] sm:$0xff]  ;;  %v383_v28 = vshrl.u32 %v382_v27, 7 }
  0x34   : > { %v3592_v44 = vld [vmem:[%s3544_s7 + $0x10] sm:$0xff]  ;;  %v3595_v45 = vld [vmem:[%s3544_s7 + $0x18] sm:$0xff]  ;;  %v3598_v46 = vld [vmem:[%s3544_s7 + $0x20] sm:$0xff] }
  0x35   : > { %2747 = vmatpush3.bf16.msra.mxu1 %v2744_v24  ;;  %v3601_v47 = vld [vmem:[%s3544_s7 + $0x28] sm:$0xff]  ;;  %v3604_v48 = vld [vmem:[%s3544_s7 + $0x30] sm:$0xff]  ;;  %v3607_v49 = vld [vmem:[%s3544_s7 + $0x38] sm:$0xff] }
  0x36   : > { %2735 = vmatpush1.bf16.msra.mxu0 %v2734_v29  ;;  %2749 = vmatprep.subr.bf16.mxu1 %v2748_v31  ;;  %v3610_v50 = vld [vmem:[%s3544_s7 + $0x40] sm:$0xff]  ;;  %v3613_v51 = vld [vmem:[%s3544_s7 + $0x48] sm:$0xff]  ;;  %v3616_v52 = vld [vmem:[%s3544_s7 + $0x50] sm:$0xff]  ;;  %v384_v29 = vsub.s32 0, %v383_v28 }
  0x37   : > { %2737 = vmatprep.subr.bf16.mxu0 %v2736_v33  ;;  %v3619_v53 = vld [vmem:[%s3544_s7 + $0x58] sm:$0xff]  ;;  %v3622_v54 = vld [vmem:[%s3544_s7 + $0x60] sm:$0xff]  ;;  %v3625_v55 = vld [vmem:[%s3544_s7 + $0x68] sm:$0xff] }
  0x38   : > { %v3628_v56 = vld [vmem:[%s3544_s7 + $0x70] sm:$0xff]  ;;  %v3631_v57 = vld [vmem:[%s3544_s7 + $0x78] sm:$0xff]  ;;  %v3634_v58 = vld [vmem:[%s3544_s7 + $0x80] sm:$0xff] }
  0x39   : > { %2751 = vmatpush3.bf16.msra.mxu1 %v2748_v31  ;;  %v3637_v59 = vld [vmem:[%s3544_s7 + $0x88] sm:$0xff]  ;;  %v3640_v60 = vld [vmem:[%s3544_s7 + $0x90] sm:$0xff]  ;;  %v3643_v61 = vld [vmem:[%s3544_s7 + $0x98] sm:$0xff]  ;;  %v388_v31 = vsub.s32 1, %v383_v28 }
  0x3a   : > { %2739 = vmatpush1.bf16.msra.mxu0 %v2738_v37  ;;  %2753 = vmatprep.subr.bf16.mxu1 %v2752_v38  ;;  %4340 = vst [vmem:[#allocation10_spill] sm:$0xff] %v3637_v59  ;;  %4341 = vst [vmem:[#allocation11_spill] sm:$0xff] %v3640_v60  ;;  %v3646_v62 = vld [vmem:[%s3544_s7 + $0xa0] sm:$0xff]  ;;  %v3649_v63 = vld [vmem:[%s3544_s7 + $0xa8] sm:$0xff] }
  0x3b   : > { %4342 = vst [vmem:[#allocation12_spill] sm:$0xff] %v3646_v62  ;;  %4343 = vst [vmem:[#allocation13_spill] sm:$0xff] %v3649_v63  ;;  %v3652_v0 = vld [vmem:[%s3544_s7 + $0xb0] sm:$0xff]  ;;  %v3655_v1 = vld [vmem:[%s3544_s7 + $0xb8] sm:$0xff] }
  0x3c   : > { %4344 = vst [vmem:[#allocation14_spill] sm:$0xff] %v3655_v1  ;;  %v3658_v2 = vld [vmem:[%s3544_s7 + $0xc0] sm:$0xff]  ;;  %v3661_v3 = vld [vmem:[%s3544_s7 + $0xc8] sm:$0xff]  ;;  %v3664_v4 = vld [vmem:[%s3544_s7 + $0xd0] sm:$0xff] }
  0x3d   : > { %2233 = vmatmul.mubr.msk.f32.vlgmr.msra.gmra.mrb[0].mxu0 %vm397_vm0, %v352_v32  ;;  %2755 = vmatpush3.bf16.msra.mxu1 %v2752_v38  ;;  %4345 = vst [vmem:[#allocation15_spill] sm:$0xff] %v3658_v2  ;;  %4346 = vst [vmem:[#allocation16_spill] sm:$0xff] %v3661_v3  ;;  %v3667_v5 = vld [vmem:[%s3544_s7 + $0xd8] sm:$0xff]  ;;  %v3670_v6 = vld [vmem:[%s3544_s7 + $0xe0] sm:$0xff]  ;;  %v392_v32 = vsub.s32 2, %v383_v28 }
  0x3e   : > { %480 = vmatprep.mubr.f32.mxu0 %v3408_v8  ;;  %4347 = vst [vmem:[#allocation17_spill] sm:$0xff] %v3664_v4  ;;  %4348 = vst [vmem:[#allocation18_spill] sm:$0xff] %v3667_v5  ;;  %v3673_v7 = vld [vmem:[%s3544_s7 + $0xe8] sm:$0xff]  ;;  %v3679_v9 = vld [vmem:[%s3544_s7 + $0xf8] sm:$0xff] }
  0x3f   : > { %4349 = vst [vmem:[#allocation19_spill] sm:$0xff] %v3670_v6  ;;  %4350 = vst [vmem:[#allocation20_spill] sm:$0xff] %v3673_v7  ;;  %v3682_v10 = vld [vmem:[%s3544_s7 + $0x100] sm:$0xff]  ;;  %v3685_v11 = vld [vmem:[%s3544_s7 + $0x108] sm:$0xff] }
  0x40   : > { %2439 = vmatmul.mubr.msk.f32.vlgmr.msra.gmra.mrb[0].mxu1 %vm397_vm0, %v353_v39  ;;  %4352 = vst [vmem:[#allocation22_spill] sm:$0xff] %v3679_v9  ;;  %4353 = vst [vmem:[#allocation23_spill] sm:$0xff] %v3682_v10  ;;  %v3688_v12 = vld [vmem:[%s3544_s7 + $0x110] sm:$0xff]  ;;  %v3691_v13 = vld [vmem:[%s3544_s7 + $0x118] sm:$0xff] }
  0x41   : > { %2234 = vmatmul.mubr.msk.f32.gmra.mrb[2].mxu0 %vm397_vm0, %v353_v39  ;;  %2441 = vmatprep.mubr.msk.f32.mxu1 %vm397_vm0, %v354_v40  ;;  %4354 = vst [vmem:[#allocation24_spill] sm:$0xff] %v3685_v11  ;;  %4355 = vst [vmem:[#allocation25_spill] sm:$0xff] %v3688_v12  ;;  %v3694_v14 = vld [vmem:[%s3544_s7 + $0x120] sm:$0xff]  ;;  %v3697_v15 = vld [vmem:[%s3544_s7 + $0x128] sm:$0xff] }
  0x42   : > { %486 = vmatprep.mubr.f32.mxu0 %v3408_v8  ;;  %4356 = vst [vmem:[#allocation26_spill] sm:$0xff] %v3691_v13  ;;  %4357 = vst [vmem:[#allocation27_spill] sm:$0xff] %v3694_v14  ;;  %v3700_v16 = vld [vmem:[%s3544_s7 + $0x130] sm:$0xff]  ;;  %v3703_v17 = vld [vmem:[%s3544_s7 + $0x138] sm:$0xff] }
  0x43   : > { %4358 = vst [vmem:[#allocation28_spill] sm:$0xff] %v3697_v15  ;;  %4359 = vst [vmem:[#allocation29_spill] sm:$0xff] %v3700_v16  ;;  %v3706_v18 = vld [vmem:[%s3544_s7 + $0x140] sm:$0xff]  ;;  %v3709_v19 = vld [vmem:[%s3544_s7 + $0x148] sm:$0xff] }
  0x44   : > { %2442 = vmatmul.mubr.msk.f32.gmra.mrb[2].mxu1 %vm397_vm0, %v355_v41  ;;  %4360 = vst [vmem:[#allocation30_spill] sm:$0xff] %v3703_v17  ;;  %4361 = vst [vmem:[#allocation31_spill] sm:$0xff] %v3706_v18  ;;  %v3712_v20 = vld [vmem:[%s3544_s7 + $0x150] sm:$0xff]  ;;  %v3715_v21 = vld [vmem:[%s3544_s7 + $0x158] sm:$0xff] }
  0x45   : > { %2235 = vmatmul.mubr.msk.f32.gmra.mrb[4].mxu0 %vm397_vm0, %v354_v40  ;;  %4362 = vst [vmem:[#allocation32_spill] sm:$0xff] %v3709_v19  ;;  %4363 = vst [vmem:[#allocation33_spill] sm:$0xff] %v3712_v20  ;;  %v3718_v22 = vld [vmem:[%s3544_s7 + $0x160] sm:$0xff]  ;;  %v3721_v23 = vld [vmem:[%s3544_s7 + $0x168] sm:$0xff] }
  0x46   : > { %492 = vmatprep.mubr.f32.mxu0 %v3408_v8  ;;  %v3676_v8 = vld [vmem:[%s3544_s7 + $0xf0] sm:$0xff]  ;;  %4364 = vst [vmem:[#allocation34_spill] sm:$0xff] %v3715_v21  ;;  %4365 = vst [vmem:[#allocation35_spill] sm:$0xff] %v3718_v22  ;;  %v3727_v25 = vld [vmem:[%s3544_s7 + $0x178] sm:$0xff] }
  0x47   : > { %4351 = vst [vmem:[#allocation21_spill] sm:$0xff] %v3676_v8  ;;  %4366 = vst [vmem:[#allocation36_spill] sm:$0xff] %v3721_v23  ;;  %v3724_v24 = vld [vmem:[%s3544_s7 + $0x170] sm:$0xff]  ;;  %v3734_v26 = vld [vmem:[%s4369_s25] ss:$0 sm:$0xff] }
  0x48   : > { %4367 = vst [vmem:[#allocation37_spill] sm:$0xff] %v3724_v24  ;;  %4368 = vst [vmem:[#allocation38_spill] sm:$0xff] %v3727_v25  ;;  %v380_v30 = vld [vmem:[%s3538_s22] sm:$0x7] }
  0x49   : > { %2236 = vmatmul.mubr.msk.f32.gmra.mrb[6].mxu0 %vm397_vm0, %v355_v41  ;;  %4370 = vst [vmem:[#allocation39_spill] sm:$0xff] %v3734_v26  ;;  %v385_v33 = vrot.slane %v380_v30, %v384_v29  ;;  %v389_v34 = vrot.slane %v380_v30, %v388_v31  ;;  %v393_v36 = vrot.slane %v380_v30, %v392_v32 }
 0x110   : > { %v476_v35 = vpop.f32.mrb[0].mxu0 }
 0x111   : > { %v477_v37 = vadd.f32 %v476_v35, %v385_v33  ;;  %v478_v38 = vpop.f32.mrb[1].mxu0 }
 0x112   : > { %v479_v39 = vadd.f32 %v478_v38, %v389_v34 }
 0x113   : > { %584 = vst [vmem:[#allocation2] sm:$0xff] %v477_v37  ;;  %v2440_v40 = vpop.f32.mrb[0].mxu1 }
 0x114   : > { %585 = vst [vmem:[#allocation2 + $0x8] sm:$0xff] %v479_v39  ;;  %v482_v41 = vpop.f32.mrb[2].mxu0  ;;  %v571_v25 = vadd.f32 %v2440_v40, %v393_v36  ;;  %v565_v22 = vpop.f32.mrb[1].mxu1 }
 0x115   : > { %v483_v26 = vadd.f32 %v482_v41, %v385_v33  ;;  %v484_v23 = vpop.f32.mrb[3].mxu0  ;;  %v566_v27 = vadd.f32 %v565_v22, %v393_v36  ;;  %v4329_v41 = vmov (!%p2242_p12), 0.0|0.0  }
 0x116   : > { %v485_v20 = vadd.f32 %v484_v23, %v389_v34  ;;  %589 = vst [vmem:[#allocation2 + $0x28] sm:$0xff] %v571_v25  ;;  %v3744_v25 = vpack.c.bf16 (!%p2242_p12), %v3595_v45, %v3586_v42  ;;  %2788 = vmatprep.subr.bf16.mxu1 (!%p2242_p12), %v4329_v41 }
 0x117   : > { %587 = vst [vmem:[#allocation2 + $0x18] sm:$0xff] %v483_v26  ;;  %586 = vst [vmem:[#allocation2 + $0x10] sm:$0xff] %v566_v27  ;;  %v2443_v28 = vpop.f32.mrb[2].mxu1  ;;  %v3748_v26 = vpack.c.bf16 (!%p2242_p12), %v3616_v52, %v3607_v49  ;;  %v3769_v27 = vpack.c.bf16 (!%p2242_p12), %v3619_v53, %v3610_v50 }
 0x118   : > { %588 = vst [vmem:[#allocation2 + $0x20] sm:$0xff] %v485_v20  ;;  %v488_v29 = vpop.f32.mrb[4].mxu0  ;;  %v581_v30 = vadd.f32 %v2443_v28, %v393_v36  ;;  %v575_v31 = vpop.f32.mrb[3].mxu1  ;;  %v3740_v20 = vpack.c.bf16 (!%p2242_p12), %v3598_v46, %v3589_v43  ;;  %v4305_v28 = vmov (!%p2242_p12), 0.0  }
 0x119   : > { %v489_v32 = vadd.f32 %v488_v29, %v385_v33  ;;  %v490_v35 = vpop.f32.mrb[5].mxu0  ;;  %v576_v37 = vadd.f32 %v575_v31, %v393_v36  ;;  %v3763_v36 = vpack.c.bf16 (!%p2242_p12), %v3634_v58, %v3625_v55  ;;  %726 = vmatprep.mubr.f32.mxu0 (!%p2242_p12), %v4305_v28  ;;  %2476 = vmatprep.mubr.msk.f32.mxu1 (!%p2242_p12), %vm3411_vm1, %v4305_v28 }
 0x11a   : > { %v491_v38 = vadd.f32 %v490_v35, %v389_v34  ;;  %595 = vst [vmem:[#allocation2 + $0x58] sm:$0xff] %v581_v30  ;;  %654 = sbr.rel (%p2242_p12) target bundleno = 1351 (0x547), region = 48  ;;  %2757 = vmatprep.subr.bf16.mxu0 (!%p2242_p12), %v3740_v20  ;;  %v3778_v29 = vpack.c.bf16 (!%p2242_p12), %v3631_v57, %v3622_v54  ;;  %v3783_v30 = vpack.c.bf16 (!%p2242_p12), %v3652_v0, %v3643_v61 }
 0x11b   : > { %590 = vst [vmem:[#allocation2 + $0x30] sm:$0xff] %v489_v32  ;;  %592 = vst [vmem:[#allocation2 + $0x40] sm:$0xff] %v576_v37  ;;  %2759 = vmatpush1.bf16.msra.mxu0 (!%p2242_p12), %v3744_v25  ;;  %v3788_v31 = vpack.c.bf16 (!%p2242_p12), %v3637_v59, %v3628_v56  ;;  %v3794_v32 = vpack.c.bf16 (!%p2242_p12), %v3649_v63, %v3640_v60  ;;  %v3799_v35 = vpack.c.bf16 (!%p2242_p12), %v3670_v6, %v3661_v3  ;;  %v4376_v3 = vld [vmem:[#allocation39_spill] sm:$0xff] (!%p2242_p12) }
 0x11c   : > { %591 = vst [vmem:[#allocation2 + $0x38] sm:$0xff] %v491_v38  ;;  %v494_v39 = vpop.f32.mrb[6].mxu0  ;;  %2761 = vmatprep.subr.bf16.mxu0 (!%p2242_p12), %v3748_v26  ;;  %v3804_v37 = vpack.c.bf16 (!%p2242_p12), %v3655_v1, %v3646_v62  ;;  %v3810_v38 = vpack.c.bf16 (!%p2242_p12), %v3667_v5, %v3658_v2  ;;  %v3836_v28 = vpack.c.bf16 (!%p2242_p12), %v3691_v13, %v3682_v10  ;;  %v4371_v10 = vld [vmem:[#allocation33_spill] sm:$0xff] (!%p2242_p12) }
 0x11d   : > { %v495_v40 = vadd.f32 %v494_v39, %v385_v33  ;;  %v496_v22 = vpop.f32.mrb[7].mxu0  ;;  %v3754_v33 = vpack.c.bf16 (!%p2242_p12), %v3613_v51, %v3604_v48  ;;  %v3815_v39 = vpack.c.bf16 (!%p2242_p12), %v3688_v12, %v3679_v9  ;;  %v3852_v13 = vpack.c.bf16 (!%p2242_p12), %v3709_v19, %v3700_v16  ;;  %v3868_v19 = vld [vmem:[#allocation3] sm:$0xff] (!%p2242_p12)  ;;  %v659_v16 = vld [vmem:[#allocation2 + $0x8] sm:$0xff] (!%p2242_p12) }
 0x11e   : > { %v497_v23 = vadd.f32 %v496_v22, %v389_v34  ;;  %v3758_v34 = vpack.c.bf16 (!%p2242_p12), %v3601_v47, %v3592_v44  ;;  %v3826_v22 = vpack.c.bf16 (!%p2242_p12), %v3685_v11, %v3676_v8  ;;  %v3842_v11 = vpack.c.bf16 (!%p2242_p12), %v3703_v17, %v3694_v14  ;;  %v660_v60 = vld [vmem:[#allocation2 + $0x10] sm:$0xff] (!%p2242_p12) }
 0x11f   : > { %593 = vst [vmem:[#allocation2 + $0x48] sm:$0xff] %v495_v40  ;;  %2763 = vmatpush1.bf16.msra.mxu0 (!%p2242_p12), %v3754_v33  ;;  %v3820_v40 = vpack.c.bf16 (!%p2242_p12), %v3673_v7, %v3664_v4 }
 0x120   : > { %594 = vst [vmem:[#allocation2 + $0x50] sm:$0xff] %v497_v23  ;;  %2790 = vmatpush3.bf16.msra.mxu1 (!%p2242_p12), %v3758_v34  ;;  %2765 = vmatprep.subr.bf16.mxu0 (!%p2242_p12), %v3763_v36  ;;  %v3831_v23 = vpack.c.bf16 (!%p2242_p12), %v3706_v18, %v3697_v15  ;;  %v3847_v18 = vpack.c.bf16 (!%p2242_p12), %v3724_v24, %v3715_v21  ;;  %v4372_v15 = vld [vmem:[#allocation36_spill] sm:$0xff] (!%p2242_p12)  ;;  %v4373_v24 = vld [vmem:[#allocation35_spill] sm:$0xff] (!%p2242_p12)  ;;  %v4374_v21 = vld [vmem:[#allocation38_spill] sm:$0xff] (!%p2242_p12) }
 0x121   : > { %2791 = vmatprep.subr.bf16.mxu1 %v4329_v41  ;;  %v3858_v17 = vpack.c.bf16 %v4372_v15, %v4371_v10  ;;  %v3864_v14 = vpack.c.bf16 %v4374_v21, %v4373_v24  ;;  %v4375_v10 = vmov 0.0   ;;  %v658_v15 = vld [vmem:[#allocation2] sm:$0xff] }
 0x123   : > { %2767 = vmatpush1.bf16.msra.mxu0 %v3778_v29 }
 0x124   : > { %2793 = vmatpush3.bf16.msra.mxu1 %v3769_v27  ;;  %2769 = vmatprep.subr.bf16.mxu0 %v3783_v30 }
 0x125   : > { %2794 = vmatprep.subr.bf16.mxu1 %v4329_v41 }
 0x127   : > { %2771 = vmatpush1.bf16.msra.mxu0 %v3794_v32 }
 0x128   : > { %2796 = vmatpush3.bf16.msra.mxu1 %v3788_v31  ;;  %2773 = vmatprep.subr.bf16.mxu0 %v3799_v35 }
 0x129   : > { %2797 = vmatprep.subr.bf16.mxu1 %v4329_v41 }
 0x12b   : > { %2775 = vmatpush1.bf16.msra.mxu0 %v3810_v38 }
 0x12c   : > { %2799 = vmatpush3.bf16.msra.mxu1 %v3804_v37  ;;  %2777 = vmatprep.subr.bf16.mxu0 %v3815_v39 }
 0x12d   : > { %2800 = vmatprep.subr.bf16.mxu1 %v4329_v41 }
 0x12f   : > { %2779 = vmatpush1.bf16.msra.mxu0 %v3826_v22 }
 0x130   : > { %2802 = vmatpush3.bf16.msra.mxu1 %v3820_v40  ;;  %2781 = vmatprep.subr.bf16.mxu0 %v3831_v23 }
 0x131   : > { %2803 = vmatprep.subr.bf16.mxu1 %v4329_v41 }
 0x133   : > { %2783 = vmatpush1.bf16.msra.mxu0 %v3842_v11 }
 0x134   : > { %2805 = vmatpush3.bf16.msra.mxu1 %v3836_v28  ;;  %2785 = vmatprep.subr.bf16.mxu0 %v3847_v18 }
 0x135   : > { %2806 = vmatprep.subr.bf16.mxu1 %v4329_v41 }
 0x137   : > { %2787 = vmatpush1.bf16.msra.mxu0 %v3858_v17 }
 0x138   : > { %2808 = vmatpush3.bf16.msra.mxu1 %v3852_v13  ;;  %2813 = vmatprep.subr.bf16.mxu0 %v3740_v20 }
 0x139   : > { %2809 = vmatprep.subr.bf16.mxu1 %v4329_v41 }
 0x13a   : > { %727 = vmatmul.mubr.f32.vlgmr.msra.gmra.mrb[0].mxu0 %v3868_v19 }
 0x13b   : > { %2815 = vmatpush1.bf16.msra.mxu0 %v3744_v25  ;;  %898 = vmatprep.mubr.f32.mxu0 %v4375_v10 }
 0x13c   : > { %2811 = vmatpush3.bf16.msra.mxu1 %v3864_v14  ;;  %2817 = vmatprep.subr.bf16.mxu0 %v3748_v26 }
 0x13d   : > { %2844 = vmatprep.subr.bf16.mxu1 %v4329_v41 }
 0x13f   : > { %2477 = vmatmul.mubr.f32.vlgmr.msra.gmra.mrb[0].mxu1 %v3868_v19  ;;  %2819 = vmatpush1.bf16.msra.mxu0 %v3754_v33 }
 0x140   : > { %2846 = vmatpush3.bf16.msra.mxu1 %v3758_v34  ;;  %2511 = vmatprep.mubr.msk.f32.mxu1 %vm3411_vm1, %v4375_v10 }
 0x141   : > { %2847 = vmatprep.subr.bf16.mxu1 %v4329_v41  ;;  %2821 = vmatprep.subr.bf16.mxu0 %v3763_v36 }
 0x143   : > { %2823 = vmatpush1.bf16.msra.mxu0 %v3778_v29 }
 0x144   : > { %2849 = vmatpush3.bf16.msra.mxu1 %v3769_v27  ;;  %2825 = vmatprep.subr.bf16.mxu0 %v3783_v30 }
 0x145   : > { %2850 = vmatprep.subr.bf16.mxu1 %v4329_v41 }
 0x147   : > { %2827 = vmatpush1.bf16.msra.mxu0 %v3794_v32 }
 0x148   : > { %2852 = vmatpush3.bf16.msra.mxu1 %v3788_v31  ;;  %2829 = vmatprep.subr.bf16.mxu0 %v3799_v35 }
 0x149   : > { %2853 = vmatprep.subr.bf16.mxu1 %v4329_v41 }
 0x14b   : > { %2831 = vmatpush1.bf16.msra.mxu0 %v3810_v38 }
 0x14c   : > { %2855 = vmatpush3.bf16.msra.mxu1 %v3804_v37  ;;  %2833 = vmatprep.subr.bf16.mxu0 %v3815_v39 }
 0x14d   : > { %2856 = vmatprep.subr.bf16.mxu1 %v4329_v41 }
 0x14f   : > { %2835 = vmatpush1.bf16.msra.mxu0 %v3826_v22 }
 0x150   : > { %2858 = vmatpush3.bf16.msra.mxu1 %v3820_v40  ;;  %2837 = vmatprep.subr.bf16.mxu0 %v3831_v23 }
 0x151   : > { %2859 = vmatprep.subr.bf16.mxu1 %v4329_v41 }
 0x153   : > { %2839 = vmatpush1.bf16.msra.mxu0 %v3842_v11 }
 0x154   : > { %2861 = vmatpush3.bf16.msra.mxu1 %v3836_v28  ;;  %2841 = vmatprep.subr.bf16.mxu0 %v3847_v18 }
 0x155   : > { %2862 = vmatprep.subr.bf16.mxu1 %v4329_v41 }
 0x157   : > { %2843 = vmatpush1.bf16.msra.mxu0 %v3858_v17 }
 0x158   : > { %2864 = vmatpush3.bf16.msra.mxu1 %v3852_v13  ;;  %2869 = vmatprep.subr.bf16.mxu0 %v3740_v20 }
 0x159   : > { %2865 = vmatprep.subr.bf16.mxu1 %v4329_v41 }
 0x15c   : > { %2867 = vmatpush3.bf16.msra.mxu1 %v3864_v14 }
 0x15d   : > { %2900 = vmatprep.subr.bf16.mxu1 %v4329_v41 }
 0x20d   : > { %v728_v21 = vpop.f32.mrb[0].mxu0 }
 0x20e   : > { %v803_v24 = vadd.f32 %v728_v21, %v658_v15  ;;  %v730_v8 = vpop.f32.mrb[1].mxu0 }
 0x20f   : > { %v810_v9 = vadd.f32 %v730_v8, %v659_v16 }
 0x210   : > { %v2243_v4 = vmul.f32 -1.442695, %v803_v24 }
 0x211   : > { %v2244_v5 = vmul.f32 -1.442695, %v810_v9 }
 0x212   : > { %v799_v7 = vpop.f32.mrb[0].mxu1  ;;  %3271 = vpow2.f32 %v2243_v4 }
 0x213   : > { %v2478_v12 = vpop.f32.mrb[1].mxu1  ;;  %3273 = vpow2.f32 %v2244_v5  ;;  %v817_v41 = vadd.f32 %v4376_v3, %v799_v7 }
 0x21c   : > { %v3272_v2 = vpop.eup %3271 }
 0x21d   : > { %v807_v1 = vadd.f32 1.0, %v3272_v2  ;;  %v3274_v62 = vpop.eup %3273 }
 0x21e   : > { %v814_v6 = vadd.f32 1.0, %v3274_v62  ;;  %v830_v62 = vld [vmem:[#allocation2 + $0x18] sm:$0xff] }
 0x21f   : > { %3275 = vrcp.f32 %v807_v1 }
 0x220   : > { %3277 = vrcp.f32 %v814_v6  ;;  %v831_v6 = vld [vmem:[#allocation2 + $0x20] sm:$0xff] }
 0x229   : > { %v3276_v63 = vpop.eup %3275 }
 0x22a   : > { %v818_v15 = vmul.f32 %v3276_v63, %v817_v41  ;;  %v3278_v24 = vpop.eup %3277 }
 0x22b   : > { %v821_v12 = vsub.f32 1.0, %v3278_v24  ;;  %v823_v4 = vmul.f32 %v3278_v24, %v3868_v19 }
 0x22c   : > { %v819_v21 = vadd.f32 %v818_v15, %v660_v60  ;;  %v4377_v60 = vmov 0.0|0.0  }
 0x22e   : > { %3279 = vtanh.f32 %v819_v21 }
 0x238   : > { %v3280_v8 = vpop.eup %3279 }
 0x239   : > { %v822_v5 = vmul.f32 %v3280_v8, %v821_v12 }
 0x23b   : > { %v3912_v9 = vadd.f32 %v823_v4, %v822_v5  ;;  %v832_v5 = vld [vmem:[#allocation2 + $0x28] sm:$0xff] }
 0x23d   : > { %826 = vst [vmem:[%s3546_s12] sm:$0xff] %v3912_v9  ;;  %899 = vmatmul.mubr.f32.vlgmr.msra.gmra.mrb[2].mxu0 %v3912_v9  ;;  %2512 = vmatmul.mubr.f32.vlgmr.msra.gmra.mrb[2].mxu1 %v3912_v9 }
 0x23e   : > { %2871 = vmatpush1.bf16.msra.mxu0 %v3744_v25  ;;  %2902 = vmatpush3.bf16.msra.mxu1 %v3758_v34 }
 0x23f   : > { %2873 = vmatprep.subr.bf16.mxu0 %v3748_v26  ;;  %2903 = vmatprep.subr.bf16.mxu1 %v4377_v60 }
 0x240   : > { %1071 = vmatprep.mubr.f32.mxu0 %v4375_v10  ;;  %2546 = vmatprep.mubr.msk.f32.mxu1 %vm3411_vm1, %v4375_v10 }
 0x242   : > { %2875 = vmatpush1.bf16.msra.mxu0 %v3754_v33  ;;  %2905 = vmatpush3.bf16.msra.mxu1 %v3769_v27 }
 0x243   : > { %2877 = vmatprep.subr.bf16.mxu0 %v3763_v36  ;;  %2906 = vmatprep.subr.bf16.mxu1 %v4377_v60 }
 0x246   : > { %2879 = vmatpush1.bf16.msra.mxu0 %v3778_v29  ;;  %2908 = vmatpush3.bf16.msra.mxu1 %v3788_v31 }
 0x247   : > { %2881 = vmatprep.subr.bf16.mxu0 %v3783_v30  ;;  %2909 = vmatprep.subr.bf16.mxu1 %v4377_v60 }
 0x24a   : > { %2883 = vmatpush1.bf16.msra.mxu0 %v3794_v32  ;;  %2911 = vmatpush3.bf16.msra.mxu1 %v3804_v37 }
 0x24b   : > { %2885 = vmatprep.subr.bf16.mxu0 %v3799_v35  ;;  %2912 = vmatprep.subr.bf16.mxu1 %v4377_v60 }
 0x24e   : > { %2887 = vmatpush1.bf16.msra.mxu0 %v3810_v38  ;;  %2914 = vmatpush3.bf16.msra.mxu1 %v3820_v40 }
 0x24f   : > { %2889 = vmatprep.subr.bf16.mxu0 %v3815_v39  ;;  %2915 = vmatprep.subr.bf16.mxu1 %v4377_v60 }
 0x252   : > { %2891 = vmatpush1.bf16.msra.mxu0 %v3826_v22  ;;  %2917 = vmatpush3.bf16.msra.mxu1 %v3836_v28 }
 0x253   : > { %2893 = vmatprep.subr.bf16.mxu0 %v3831_v23  ;;  %2918 = vmatprep.subr.bf16.mxu1 %v4377_v60 }
 0x256   : > { %2895 = vmatpush1.bf16.msra.mxu0 %v3842_v11  ;;  %2920 = vmatpush3.bf16.msra.mxu1 %v3852_v13 }
 0x257   : > { %2897 = vmatprep.subr.bf16.mxu0 %v3847_v18  ;;  %2921 = vmatprep.subr.bf16.mxu1 %v4377_v60 }
 0x25a   : > { %2899 = vmatpush1.bf16.msra.mxu0 %v3858_v17  ;;  %2923 = vmatpush3.bf16.msra.mxu1 %v3864_v14 }
 0x25b   : > { %2925 = vmatprep.subr.bf16.mxu0 %v3740_v20  ;;  %2956 = vmatprep.subr.bf16.mxu1 %v4377_v60 }
 0x310   : > { %v900_v63 = vpop.f32.mrb[2].mxu0  ;;  %v971_v1 = vpop.f32.mrb[2].mxu1 }
 0x311   : > { %v975_v2 = vadd.f32 %v900_v63, %v830_v62  ;;  %v902_v7 = vpop.f32.mrb[3].mxu0  ;;  %v2513_v16 = vpop.f32.mrb[3].mxu1  ;;  %v989_v8 = vadd.f32 %v4376_v3, %v971_v1 }
 0x312   : > { %v982_v41 = vadd.f32 %v902_v7, %v831_v6 }
 0x313   : > { %v2245_v19 = vmul.f32 -1.442695, %v975_v2 }
 0x314   : > { %v2246_v15 = vmul.f32 -1.442695, %v982_v41 }
 0x315   : > { %3281 = vpow2.f32 %v2245_v19 }
 0x316   : > { %3283 = vpow2.f32 %v2246_v15  ;;  %v1177_v15 = vld [vmem:[#allocation2 + $0x50] sm:$0xff] }
 0x31f   : > { %v3282_v21 = vpop.eup %3281 }
 0x320   : > { %v979_v24 = vadd.f32 1.0, %v3282_v21  ;;  %v3284_v12 = vpop.eup %3283 }
 0x321   : > { %v986_v20 = vadd.f32 1.0, %v3284_v12 }
 0x322   : > { %3285 = vrcp.f32 %v979_v24 }
 0x323   : > { %3287 = vrcp.f32 %v986_v20 }
 0x32c   : > { %v3286_v4 = vpop.eup %3285 }
 0x32d   : > { %v990_v59 = vmul.f32 %v3286_v4, %v989_v8  ;;  %v3288_v63 = vpop.eup %3287 }
 0x32e   : > { %v993_v2 = vsub.f32 1.0, %v3288_v63  ;;  %v995_v16 = vmul.f32 %v3288_v63, %v3912_v9  ;;  %v1176_v9 = vld [vmem:[#allocation2 + $0x48] sm:$0xff] }
 0x32f   : > { %v991_v62 = vadd.f32 %v990_v59, %v832_v5  ;;  %v1003_v59 = vld [vmem:[#allocation2 + $0x30] sm:$0xff] }
 0x331   : > { %3289 = vtanh.f32 %v991_v62 }
 0x33b   : > { %v3290_v6 = vpop.eup %3289 }
 0x33c   : > { %v994_v7 = vmul.f32 %v3290_v6, %v993_v2 }
 0x33e   : > { %v3955_v19 = vadd.f32 %v995_v16, %v994_v7  ;;  %v1178_v7 = vld [vmem:[#allocation2 + $0x58] sm:$0xff] }
 0x340   : > { %2247 = vst [vmem:[%s3546_s12 + $0x8] sm:$0xff] %v3955_v19  ;;  %1072 = vmatmul.mubr.f32.vlgmr.msra.gmra.mrb[4].mxu0 %v3955_v19  ;;  %2547 = vmatmul.mubr.f32.vlgmr.msra.gmra.mrb[4].mxu1 %v3955_v19 }
 0x341   : > { %2927 = vmatpush1.bf16.msra.mxu0 %v3744_v25  ;;  %2958 = vmatpush3.bf16.msra.mxu1 %v3758_v34  ;;  %v1004_v34 = vld [vmem:[#allocation2 + $0x38] sm:$0xff] }
 0x342   : > { %2929 = vmatprep.subr.bf16.mxu0 %v3748_v26  ;;  %2959 = vmatprep.subr.bf16.mxu1 %v4377_v60 }
 0x343   : > { %1244 = vmatprep.mubr.f32.mxu0 %v4375_v10  ;;  %2581 = vmatprep.mubr.msk.f32.mxu1 %vm3411_vm1, %v4375_v10 }
 0x345   : > { %2931 = vmatpush1.bf16.msra.mxu0 %v3754_v33  ;;  %2961 = vmatpush3.bf16.msra.mxu1 %v3769_v27 }
 0x346   : > { %2933 = vmatprep.subr.bf16.mxu0 %v3763_v36  ;;  %2962 = vmatprep.subr.bf16.mxu1 %v4377_v60 }
 0x349   : > { %2935 = vmatpush1.bf16.msra.mxu0 %v3778_v29  ;;  %2964 = vmatpush3.bf16.msra.mxu1 %v3788_v31 }
 0x34a   : > { %2937 = vmatprep.subr.bf16.mxu0 %v3783_v30  ;;  %2965 = vmatprep.subr.bf16.mxu1 %v4377_v60 }
 0x34d   : > { %2939 = vmatpush1.bf16.msra.mxu0 %v3794_v32  ;;  %2967 = vmatpush3.bf16.msra.mxu1 %v3804_v37  ;;  %v1005_v32 = vld [vmem:[#allocation2 + $0x40] sm:$0xff] }
 0x34e   : > { %2941 = vmatprep.subr.bf16.mxu0 %v3799_v35  ;;  %2968 = vmatprep.subr.bf16.mxu1 %v4377_v60 }
 0x351   : > { %2943 = vmatpush1.bf16.msra.mxu0 %v3810_v38  ;;  %2970 = vmatpush3.bf16.msra.mxu1 %v3820_v40 }
 0x352   : > { %2945 = vmatprep.subr.bf16.mxu0 %v3815_v39  ;;  %2971 = vmatprep.subr.bf16.mxu1 %v4377_v60 }
 0x355   : > { %2947 = vmatpush1.bf16.msra.mxu0 %v3826_v22  ;;  %2973 = vmatpush3.bf16.msra.mxu1 %v3836_v28 }
 0x356   : > { %2949 = vmatprep.subr.bf16.mxu0 %v3831_v23  ;;  %2974 = vmatprep.subr.bf16.mxu1 %v4377_v60 }
 0x359   : > { %2951 = vmatpush1.bf16.msra.mxu0 %v3842_v11  ;;  %2976 = vmatpush3.bf16.msra.mxu1 %v3852_v13 }
 0x35a   : > { %2953 = vmatprep.subr.bf16.mxu0 %v3847_v18  ;;  %2977 = vmatprep.subr.bf16.mxu1 %v4377_v60 }
 0x35d   : > { %2955 = vmatpush1.bf16.msra.mxu0 %v3858_v17  ;;  %2979 = vmatpush3.bf16.msra.mxu1 %v3864_v14 }
 0x413   : > { %v1073_v25 = vpop.f32.mrb[4].mxu0  ;;  %v1144_v26 = vpop.f32.mrb[4].mxu1 }
 0x414   : > { %v1148_v33 = vadd.f32 %v1073_v25, %v1003_v59  ;;  %v1075_v36 = vpop.f32.mrb[5].mxu0  ;;  %v2548_v27 = vpop.f32.mrb[5].mxu1  ;;  %v1162_v14 = vadd.f32 %v4376_v3, %v1144_v26 }
 0x415   : > { %v1155_v29 = vadd.f32 %v1075_v36, %v1004_v34 }
 0x416   : > { %v2248_v28 = vmul.f32 -1.442695, %v1148_v33 }
 0x417   : > { %v2249_v11 = vmul.f32 -1.442695, %v1155_v29 }
 0x418   : > { %3291 = vpow2.f32 %v2248_v28 }
 0x419   : > { %3293 = vpow2.f32 %v2249_v11 }
 0x422   : > { %v3292_v13 = vpop.eup %3291 }
 0x423   : > { %v1152_v18 = vadd.f32 1.0, %v3292_v13  ;;  %v3294_v30 = vpop.eup %3293 }
 0x424   : > { %v1159_v17 = vadd.f32 1.0, %v3294_v30 }
 0x425   : > { %3295 = vrcp.f32 %v1152_v18 }
 0x426   : > { %3297 = vrcp.f32 %v1159_v17 }
 0x42f   : > { %v3296_v31 = vpop.eup %3295 }
 0x430   : > { %v1163_v35 = vmul.f32 %v3296_v31, %v1162_v14  ;;  %v3298_v38 = vpop.eup %3297 }
 0x431   : > { %v1166_v39 = vsub.f32 1.0, %v3298_v38  ;;  %v1168_v23 = vmul.f32 %v3298_v38, %v3955_v19 }
 0x432   : > { %v1164_v37 = vadd.f32 %v1163_v35, %v1005_v32 }
 0x434   : > { %3299 = vtanh.f32 %v1164_v37 }
 0x43e   : > { %v3300_v40 = vpop.eup %3299 }
 0x43f   : > { %v1167_v22 = vmul.f32 %v3300_v40, %v1166_v39 }
 0x441   : > { %v1169_v10 = vadd.f32 %v1168_v23, %v1167_v22 }
 0x443   : > { %2250 = vst [vmem:[%s3546_s12 + $0x10] sm:$0xff] %v1169_v10  ;;  %1245 = vmatmul.mubr.f32.vlgmr.msra.gmra.mrb[6].mxu0 %v1169_v10  ;;  %2582 = vmatmul.mubr.f32.vlgmr.msra.gmra.mrb[6].mxu1 %v1169_v10 }
 0x516   : > { %v1246_v60 = vpop.f32.mrb[6].mxu0  ;;  %v1317_v1 = vpop.f32.mrb[6].mxu1 }
 0x517   : > { %v1321_v41 = vadd.f32 %v1246_v60, %v1176_v9  ;;  %v1248_v21 = vpop.f32.mrb[7].mxu0  ;;  %v2583_v24 = vpop.f32.mrb[7].mxu1  ;;  %v1335_v2 = vadd.f32 %v4376_v3, %v1317_v1 }
 0x518   : > { %v1328_v20 = vadd.f32 %v1248_v21, %v1177_v15 }
 0x519   : > { %v2251_v12 = vmul.f32 -1.442695, %v1321_v41 }
 0x51a   : > { %v2252_v8 = vmul.f32 -1.442695, %v1328_v20 }
 0x51b   : > { %3301 = vpow2.f32 %v2251_v12 }
 0x51c   : > { %3303 = vpow2.f32 %v2252_v8 }
 0x525   : > { %v3302_v4 = vpop.eup %3301 }
 0x526   : > { %v1325_v5 = vadd.f32 1.0, %v3302_v4  ;;  %v3304_v62 = vpop.eup %3303 }
 0x527   : > { %v1332_v63 = vadd.f32 1.0, %v3304_v62 }
 0x528   : > { %3305 = vrcp.f32 %v1325_v5 }
 0x529   : > { %3307 = vrcp.f32 %v1332_v63 }
 0x532   : > { %v3306_v6 = vpop.eup %3305 }
 0x533   : > { %v1336_v16 = vmul.f32 %v3306_v6, %v1335_v2  ;;  %v3308_v59 = vpop.eup %3307 }
 0x534   : > { %v1339_v25 = vsub.f32 1.0, %v3308_v59  ;;  %v1341_v34 = vmul.f32 %v3308_v59, %v1169_v10 }
 0x535   : > { %v1337_v19 = vadd.f32 %v1336_v16, %v1178_v7 }
 0x537   : > { %3309 = vtanh.f32 %v1337_v19 }
 0x541   : > { %v3310_v26 = vpop.eup %3309 }
 0x542   : > { %v1340_v33 = vmul.f32 %v3310_v26, %v1339_v25 }
 0x544   : > { %v1342_v36 = vadd.f32 %v1341_v34, %v1340_v33 }
 0x546   : > { %1343 = vst [vmem:[#allocation3] sm:$0xff] %v1342_v36  ;;  %2253 = vst [vmem:[%s3546_s12 + $0x18] sm:$0xff] %v1342_v36 }
 0x547 PF: > { %p2254_p13 = scmp.ne.s32.totalorder %s3393_s21, 1 }
 0x548   : > { %v4002_v3 = vpack.c.bf16 (!%p2254_p13), %v3598_v46, %v3589_v43  ;;  %v4006_v27 = vpack.c.bf16 (!%p2254_p13), %v3595_v45, %v3586_v42  ;;  %v4010_v28 = vpack.c.bf16 (!%p2254_p13), %v3616_v52, %v3607_v49  ;;  %v4016_v29 = vpack.c.bf16 (!%p2254_p13), %v3613_v51, %v3604_v48  ;;  %v4378_v49 = vld [vmem:[#allocation10_spill] sm:$0xff] (!%p2254_p13)  ;;  %v4379_v51 = vld [vmem:[#allocation11_spill] sm:$0xff] (!%p2254_p13)  ;;  %v4380_v52 = vld [vmem:[#allocation13_spill] sm:$0xff] (!%p2254_p13) }
 0x549   : > { %1349 = sbr.rel (%p2254_p13) target bundleno = 2423 (0x977), region = 52  ;;  %v4020_v43 = vpack.c.bf16 (!%p2254_p13), %v3601_v47, %v3592_v44  ;;  %v4025_v42 = vpack.c.bf16 (!%p2254_p13), %v3634_v58, %v3625_v55  ;;  %v3412_v45 = vmov (!%p2254_p13), 0.0|0.0   ;;  %v4031_v46 = vpack.c.bf16 (!%p2254_p13), %v3619_v53, %v3610_v50  ;;  %v4382_v55 = vld [vmem:[#allocation19_spill] sm:$0xff] (!%p2254_p13)  ;;  %v4383_v58 = vld [vmem:[#allocation12_spill] sm:$0xff] (!%p2254_p13)  ;;  %v4386_v11 = vld [vmem:[#allocation18_spill] sm:$0xff] (!%p2254_p13) }
 0x54a   : > { %2981 = vmatprep.subr.bf16.mxu0 (!%p2254_p13), %v4002_v3  ;;  %3012 = vmatprep.subr.bf16.mxu1 (!%p2254_p13), %v3412_v45  ;;  %v3413_v48 = vmov (!%p2254_p13), 0.0   ;;  %vm3414_vm2 = vmmov (!%p2254_p13), 0   ;;  %v4040_v44 = vpack.c.bf16 (!%p2254_p13), %v3631_v57, %v3622_v54  ;;  %v4045_v47 = vpack.c.bf16 (!%p2254_p13), %v3652_v0, %v3643_v61  ;;  %v4381_v54 = vld [vmem:[#allocation16_spill] sm:$0xff] (!%p2254_p13)  ;;  %v4384_v61 = vld [vmem:[#allocation14_spill] sm:$0xff] (!%p2254_p13)  ;;  %v4385_v0 = vld [vmem:[#allocation15_spill] sm:$0xff] (!%p2254_p13) }
 0x54b   : > { %2983 = vmatpush1.bf16.msra.mxu0 (!%p2254_p13), %v4006_v27  ;;  %3014 = vmatpush3.bf16.msra.mxu1 (!%p2254_p13), %v4020_v43  ;;  %v4050_v50 = vpack.c.bf16 (!%p2254_p13), %v4378_v49, %v3628_v56  ;;  %v4056_v53 = vpack.c.bf16 (!%p2254_p13), %v4380_v52, %v4379_v51  ;;  %v4061_v57 = vpack.c.bf16 (!%p2254_p13), %v4382_v55, %v4381_v54  ;;  %v4387_v18 = vld [vmem:[#allocation22_spill] sm:$0xff] (!%p2254_p13)  ;;  %v4388_v30 = vld [vmem:[#allocation25_spill] sm:$0xff] (!%p2254_p13)  ;;  %v4390_v31 = vld [vmem:[#allocation20_spill] sm:$0xff] (!%p2254_p13) }
 0x54c   : > { %2985 = vmatprep.subr.bf16.mxu0 (!%p2254_p13), %v4010_v28  ;;  %1421 = vmatprep.mubr.f32.mxu0 (!%p2254_p13), %v3413_v48  ;;  %v4066_v56 = vpack.c.bf16 (!%p2254_p13), %v4384_v61, %v4383_v58  ;;  %v4072_v13 = vpack.c.bf16 (!%p2254_p13), %v4386_v11, %v4385_v0  ;;  %v4077_v17 = vpack.c.bf16 (!%p2254_p13), %v4388_v30, %v4387_v18  ;;  %v4389_v14 = vld [vmem:[#allocation17_spill] sm:$0xff] (!%p2254_p13)  ;;  %v4392_v37 = vld [vmem:[#allocation24_spill] sm:$0xff] (!%p2254_p13)  ;;  %v4394_v40 = vld [vmem:[#allocation31_spill] sm:$0xff] (!%p2254_p13) }
 0x54d   : > { %3015 = vmatprep.subr.bf16.mxu1 (!%p2254_p13), %v3412_v45  ;;  %2616 = vmatprep.mubr.msk.f32.mxu1 (!%p2254_p13), %vm3414_vm2, %v3413_v48  ;;  %v4082_v32 = vpack.c.bf16 (!%p2254_p13), %v4390_v31, %v4389_v14  ;;  %v4391_v35 = vld [vmem:[#allocation21_spill] sm:$0xff] (!%p2254_p13)  ;;  %v4393_v39 = vld [vmem:[#allocation28_spill] sm:$0xff] (!%p2254_p13)  ;;  %v4395_v23 = vld [vmem:[#allocation23_spill] sm:$0xff] (!%p2254_p13) }
 0x54e   : > { %v4088_v38 = vpack.c.bf16 (!%p2254_p13), %v4392_v37, %v4391_v35  ;;  %v4093_v22 = vpack.c.bf16 (!%p2254_p13), %v4394_v40, %v4393_v39  ;;  %v4396_v10 = vld [vmem:[#allocation26_spill] sm:$0xff] (!%p2254_p13)  ;;  %v4397_v60 = vld [vmem:[#allocation27_spill] sm:$0xff] (!%p2254_p13)  ;;  %v4400_v21 = vld [vmem:[#allocation37_spill] sm:$0xff] (!%p2254_p13) }
 0x54f   : > { %2987 = vmatpush1.bf16.msra.mxu0 (!%p2254_p13), %v4016_v29  ;;  %3017 = vmatpush3.bf16.msra.mxu1 (!%p2254_p13), %v4031_v46  ;;  %v4098_v9 = vpack.c.bf16 (!%p2254_p13), %v4396_v10, %v4395_v23  ;;  %v4398_v1 = vld [vmem:[#allocation30_spill] sm:$0xff] (!%p2254_p13)  ;;  %v4401_v12 = vld [vmem:[#allocation29_spill] sm:$0xff] (!%p2254_p13)  ;;  %v4402_v20 = vld [vmem:[#allocation32_spill] sm:$0xff] (!%p2254_p13) }
 0x550   : > { %2989 = vmatprep.subr.bf16.mxu0 %v4025_v42  ;;  %3018 = vmatprep.subr.bf16.mxu1 %v3412_v45  ;;  %v4104_v41 = vpack.c.bf16 %v4398_v1, %v4397_v60  ;;  %v4399_v15 = vld [vmem:[#allocation34_spill] sm:$0xff]  ;;  %v4114_v8 = vpack.c.bf16 %v4402_v20, %v4401_v12  ;;  %v4403_v4 = vld [vmem:[#allocation33_spill] sm:$0xff]  ;;  %v4404_v5 = vld [vmem:[#allocation36_spill] sm:$0xff] }
 0x551   : > { %v4109_v24 = vpack.c.bf16 %v4400_v21, %v4399_v15  ;;  %v4120_v62 = vpack.c.bf16 %v4404_v5, %v4403_v4  ;;  %v4405_v63 = vld [vmem:[#allocation35_spill] sm:$0xff]  ;;  %v4406_v2 = vld [vmem:[#allocation38_spill] sm:$0xff]  ;;  %v4130_v7 = vld [vmem:[#allocation3] sm:$0xff] }
 0x552   : > { %v4126_v6 = vpack.c.bf16 %v4406_v2, %v4405_v63  ;;  %v1353_v16 = vld [vmem:[#allocation2 + $0x48] sm:$0xff]  ;;  %v1354_v25 = vld [vmem:[#allocation2 + $0x50] sm:$0xff]  ;;  %v1355_v18 = vld [vmem:[#allocation2 + $0x58] sm:$0xff] }
 0x553   : > { %2991 = vmatpush1.bf16.msra.mxu0 %v4040_v44  ;;  %3020 = vmatpush3.bf16.msra.mxu1 %v4050_v50  ;;  %v4407_v61 = vld [vmem:[#allocation39_spill] sm:$0xff]  ;;  %v1527_v21 = vld [vmem:[#allocation2 + $0x38] sm:$0xff] }
 0x554   : > { %2993 = vmatprep.subr.bf16.mxu0 %v4045_v47  ;;  %3021 = vmatprep.subr.bf16.mxu1 %v3412_v45  ;;  %v1526_v10 = vld [vmem:[#allocation2 + $0x30] sm:$0xff] }
 0x557   : > { %2995 = vmatpush1.bf16.msra.mxu0 %v4056_v53  ;;  %3023 = vmatpush3.bf16.msra.mxu1 %v4066_v56 }
 0x558   : > { %2997 = vmatprep.subr.bf16.mxu0 %v4061_v57  ;;  %3024 = vmatprep.subr.bf16.mxu1 %v3412_v45 }
 0x55b   : > { %2999 = vmatpush1.bf16.msra.mxu0 %v4072_v13  ;;  %3026 = vmatpush3.bf16.msra.mxu1 %v4082_v32 }
 0x55c   : > { %3001 = vmatprep.subr.bf16.mxu0 %v4077_v17  ;;  %3027 = vmatprep.subr.bf16.mxu1 %v3412_v45 }
 0x55f   : > { %3003 = vmatpush1.bf16.msra.mxu0 %v4088_v38  ;;  %3029 = vmatpush3.bf16.msra.mxu1 %v4098_v9 }
 0x560   : > { %3005 = vmatprep.subr.bf16.mxu0 %v4093_v22  ;;  %3030 = vmatprep.subr.bf16.mxu1 %v3412_v45 }
 0x563   : > { %3007 = vmatpush1.bf16.msra.mxu0 %v4104_v41  ;;  %3032 = vmatpush3.bf16.msra.mxu1 %v4114_v8 }
 0x564   : > { %3009 = vmatprep.subr.bf16.mxu0 %v4109_v24  ;;  %3033 = vmatprep.subr.bf16.mxu1 %v3412_v45 }
 0x567   : > { %3011 = vmatpush1.bf16.msra.mxu0 %v4120_v62  ;;  %3035 = vmatpush3.bf16.msra.mxu1 %v4126_v6 }
 0x568   : > { %3037 = vmatprep.subr.bf16.mxu0 %v4002_v3  ;;  %3068 = vmatprep.subr.bf16.mxu1 %v3412_v45 }
 0x56a   : > { %1422 = vmatmul.mubr.f32.vlgmr.msra.gmra.mrb[0].mxu0 %v4130_v7  ;;  %2617 = vmatmul.mubr.f32.vlgmr.msra.gmra.mrb[0].mxu1 %v4130_v7 }
 0x56b   : > { %3039 = vmatpush1.bf16.msra.mxu0 %v4006_v27  ;;  %1594 = vmatprep.mubr.f32.mxu0 %v3413_v48 }
 0x56c   : > { %3041 = vmatprep.subr.bf16.mxu0 %v4010_v28  ;;  %3070 = vmatpush3.bf16.msra.mxu1 %v4020_v43 }
 0x56d   : > { %2651 = vmatprep.mubr.msk.f32.mxu1 %vm3414_vm2, %v3413_v48  ;;  %3071 = vmatprep.subr.bf16.mxu1 %v3412_v45 }
 0x56f   : > { %3043 = vmatpush1.bf16.msra.mxu0 %v4016_v29 }
 0x570   : > { %3045 = vmatprep.subr.bf16.mxu0 %v4025_v42  ;;  %3073 = vmatpush3.bf16.msra.mxu1 %v4031_v46 }
 0x571   : > { %3074 = vmatprep.subr.bf16.mxu1 %v3412_v45 }
 0x573   : > { %3047 = vmatpush1.bf16.msra.mxu0 %v4040_v44 }
 0x574   : > { %3049 = vmatprep.subr.bf16.mxu0 %v4045_v47  ;;  %3076 = vmatpush3.bf16.msra.mxu1 %v4050_v50 }
 0x575   : > { %3077 = vmatprep.subr.bf16.mxu1 %v3412_v45 }
 0x577   : > { %3051 = vmatpush1.bf16.msra.mxu0 %v4056_v53 }
 0x578   : > { %3053 = vmatprep.subr.bf16.mxu0 %v4061_v57  ;;  %3079 = vmatpush3.bf16.msra.mxu1 %v4066_v56 }
 0x579   : > { %3080 = vmatprep.subr.bf16.mxu1 %v3412_v45 }
 0x57b   : > { %3055 = vmatpush1.bf16.msra.mxu0 %v4072_v13 }
 0x57c   : > { %3057 = vmatprep.subr.bf16.mxu0 %v4077_v17  ;;  %3082 = vmatpush3.bf16.msra.mxu1 %v4082_v32 }
 0x57d   : > { %3083 = vmatprep.subr.bf16.mxu1 %v3412_v45 }
 0x57f   : > { %3059 = vmatpush1.bf16.msra.mxu0 %v4088_v38 }
 0x580   : > { %3061 = vmatprep.subr.bf16.mxu0 %v4093_v22  ;;  %3085 = vmatpush3.bf16.msra.mxu1 %v4098_v9 }
 0x581   : > { %3086 = vmatprep.subr.bf16.mxu1 %v3412_v45 }
 0x583   : > { %3063 = vmatpush1.bf16.msra.mxu0 %v4104_v41 }
 0x584   : > { %3065 = vmatprep.subr.bf16.mxu0 %v4109_v24  ;;  %3088 = vmatpush3.bf16.msra.mxu1 %v4114_v8 }
 0x585   : > { %3089 = vmatprep.subr.bf16.mxu1 %v3412_v45 }
 0x587   : > { %3067 = vmatpush1.bf16.msra.mxu0 %v4120_v62 }
 0x588   : > { %3093 = vmatprep.subr.bf16.mxu0 %v4002_v3  ;;  %3091 = vmatpush3.bf16.msra.mxu1 %v4126_v6 }
 0x589   : > { %3124 = vmatprep.subr.bf16.mxu1 %v3412_v45 }
 0x63d   : > { %v1423_v19 = vpop.f32.mrb[0].mxu0  ;;  %v1494_v33 = vpop.f32.mrb[0].mxu1 }
 0x63e   : > { %v1498_v59 = vadd.f32 %v1423_v19, %v1353_v16  ;;  %v1425_v26 = vpop.f32.mrb[1].mxu0  ;;  %v2618_v36 = vpop.f32.mrb[1].mxu1  ;;  %v1512_v0 = vadd.f32 %v4407_v61, %v1494_v33 }
 0x63f   : > { %v1505_v49 = vadd.f32 %v1425_v26, %v1354_v25  ;;  %v1528_v25 = vld [vmem:[#allocation2 + $0x40] sm:$0xff] }
 0x640   : > { %v2255_v34 = vmul.f32 -1.442695, %v1498_v59 }
 0x641   : > { %v2256_v51 = vmul.f32 -1.442695, %v1505_v49 }
 0x642   : > { %3311 = vpow2.f32 %v2255_v34 }
 0x643   : > { %3313 = vpow2.f32 %v2256_v51 }
 0x64c   : > { %v3312_v52 = vpop.eup %3311 }
 0x64d   : > { %v1502_v54 = vadd.f32 1.0, %v3312_v52  ;;  %v3314_v55 = vpop.eup %3313 }
 0x64e   : > { %v1509_v58 = vadd.f32 1.0, %v3314_v55  ;;  %v1872_v55 = vld [vmem:[#allocation2] sm:$0xff] }
 0x64f   : > { %3315 = vrcp.f32 %v1502_v54 }
 0x650   : > { %3317 = vrcp.f32 %v1509_v58 }
 0x659   : > { %v3316_v11 = vpop.eup %3315 }
 0x65a   : > { %v1513_v30 = vmul.f32 %v3316_v11, %v1512_v0  ;;  %v3318_v31 = vpop.eup %3317 }
 0x65b   : > { %v1516_v35 = vsub.f32 1.0, %v3318_v31  ;;  %v1518_v39 = vmul.f32 %v3318_v31, %v4130_v7 }
 0x65c   : > { %v1514_v14 = vadd.f32 %v1513_v30, %v1355_v18  ;;  %v1873_v18 = vld [vmem:[#allocation2 + $0x8] sm:$0xff] }
 0x65e   : > { %3319 = vtanh.f32 %v1514_v14 }
 0x668   : > { %v3320_v37 = vpop.eup %3319 }
 0x669   : > { %v1517_v40 = vmul.f32 %v3320_v37, %v1516_v35 }
 0x66b   : > { %v4174_v23 = vadd.f32 %v1518_v39, %v1517_v40 }
 0x66d   : > { %2257 = vst [vmem:[%s3546_s12 + $0x18] sm:$0xff] %v4174_v23  ;;  %1595 = vmatmul.mubr.f32.vlgmr.msra.gmra.mrb[2].mxu0 %v4174_v23  ;;  %2652 = vmatmul.mubr.f32.vlgmr.msra.gmra.mrb[2].mxu1 %v4174_v23 }
 0x66e   : > { %3095 = vmatpush1.bf16.msra.mxu0 %v4006_v27  ;;  %3126 = vmatpush3.bf16.msra.mxu1 %v4020_v43 }
 0x66f   : > { %3097 = vmatprep.subr.bf16.mxu0 %v4010_v28  ;;  %3127 = vmatprep.subr.bf16.mxu1 %v3412_v45 }
 0x670   : > { %1767 = vmatprep.mubr.f32.mxu0 %v3413_v48  ;;  %2686 = vmatprep.mubr.msk.f32.mxu1 %vm3414_vm2, %v3413_v48 }
 0x672   : > { %3099 = vmatpush1.bf16.msra.mxu0 %v4016_v29  ;;  %3129 = vmatpush3.bf16.msra.mxu1 %v4031_v46 }
 0x673   : > { %3101 = vmatprep.subr.bf16.mxu0 %v4025_v42  ;;  %3130 = vmatprep.subr.bf16.mxu1 %v3412_v45 }
 0x676   : > { %3103 = vmatpush1.bf16.msra.mxu0 %v4040_v44  ;;  %3132 = vmatpush3.bf16.msra.mxu1 %v4050_v50 }
 0x677   : > { %3105 = vmatprep.subr.bf16.mxu0 %v4045_v47  ;;  %3133 = vmatprep.subr.bf16.mxu1 %v3412_v45 }
 0x67a   : > { %3107 = vmatpush1.bf16.msra.mxu0 %v4056_v53  ;;  %3135 = vmatpush3.bf16.msra.mxu1 %v4066_v56 }
 0x67b   : > { %3109 = vmatprep.subr.bf16.mxu0 %v4061_v57  ;;  %3136 = vmatprep.subr.bf16.mxu1 %v3412_v45 }
 0x67e   : > { %3111 = vmatpush1.bf16.msra.mxu0 %v4072_v13  ;;  %3138 = vmatpush3.bf16.msra.mxu1 %v4082_v32 }
 0x67f   : > { %3113 = vmatprep.subr.bf16.mxu0 %v4077_v17  ;;  %3139 = vmatprep.subr.bf16.mxu1 %v3412_v45 }
 0x682   : > { %3115 = vmatpush1.bf16.msra.mxu0 %v4088_v38  ;;  %3141 = vmatpush3.bf16.msra.mxu1 %v4098_v9 }
 0x683   : > { %3117 = vmatprep.subr.bf16.mxu0 %v4093_v22  ;;  %3142 = vmatprep.subr.bf16.mxu1 %v3412_v45 }
 0x686   : > { %3119 = vmatpush1.bf16.msra.mxu0 %v4104_v41  ;;  %3144 = vmatpush3.bf16.msra.mxu1 %v4114_v8 }
 0x687   : > { %3121 = vmatprep.subr.bf16.mxu0 %v4109_v24  ;;  %3145 = vmatprep.subr.bf16.mxu1 %v3412_v45 }
 0x68a   : > { %3123 = vmatpush1.bf16.msra.mxu0 %v4120_v62  ;;  %3147 = vmatpush3.bf16.msra.mxu1 %v4126_v6 }
 0x68b   : > { %3149 = vmatprep.subr.bf16.mxu0 %v4002_v3  ;;  %3180 = vmatprep.subr.bf16.mxu1 %v3412_v45 }
 0x740   : > { %v1596_v60 = vpop.f32.mrb[2].mxu0  ;;  %v1667_v1 = vpop.f32.mrb[2].mxu1 }
 0x741   : > { %v1671_v15 = vadd.f32 %v1596_v60, %v1526_v10  ;;  %v1598_v12 = vpop.f32.mrb[3].mxu0  ;;  %v2653_v20 = vpop.f32.mrb[3].mxu1  ;;  %v1685_v19 = vadd.f32 %v4407_v61, %v1667_v1 }
 0x742   : > { %v1678_v5 = vadd.f32 %v1598_v12, %v1527_v21 }
 0x743   : > { %v2258_v4 = vmul.f32 -1.442695, %v1671_v15  ;;  %v1874_v15 = vld [vmem:[#allocation2 + $0x10] sm:$0xff] }
 0x744   : > { %v2259_v63 = vmul.f32 -1.442695, %v1678_v5 }
 0x745   : > { %3321 = vpow2.f32 %v2258_v4 }
 0x746   : > { %3323 = vpow2.f32 %v2259_v63 }
 0x74f   : > { %v3322_v2 = vpop.eup %3321 }
 0x750   : > { %v1675_v7 = vadd.f32 1.0, %v3322_v2  ;;  %v3324_v16 = vpop.eup %3323 }
 0x751   : > { %v1682_v3 = vadd.f32 1.0, %v3324_v16 }
 0x752   : > { %3325 = vrcp.f32 %v1675_v7 }
 0x753   : > { %3327 = vrcp.f32 %v1682_v3 }
 0x75c   : > { %v3326_v59 = vpop.eup %3325 }
 0x75d   : > { %v1686_v26 = vmul.f32 %v3326_v59, %v1685_v19  ;;  %v3328_v34 = vpop.eup %3327 }
 0x75e   : > { %v1689_v36 = vsub.f32 1.0, %v3328_v34  ;;  %v1691_v52 = vmul.f32 %v3328_v34, %v4174_v23 }
 0x75f   : > { %v1687_v33 = vadd.f32 %v1686_v26, %v1528_v25 }
 0x761   : > { %3329 = vtanh.f32 %v1687_v33 }
 0x76b   : > { %v3330_v49 = vpop.eup %3329 }
 0x76c   : > { %v1690_v51 = vmul.f32 %v3330_v49, %v1689_v36 }
 0x76e   : > { %v4217_v54 = vadd.f32 %v1691_v52, %v1690_v51 }
 0x770   : > { %2260 = vst [vmem:[%s3546_s12 + $0x10] sm:$0xff] %v4217_v54  ;;  %1768 = vmatmul.mubr.f32.vlgmr.msra.gmra.mrb[4].mxu0 %v4217_v54  ;;  %2687 = vmatmul.mubr.f32.vlgmr.msra.gmra.mrb[4].mxu1 %v4217_v54 }
 0x771   : > { %3151 = vmatpush1.bf16.msra.mxu0 %v4006_v27  ;;  %3182 = vmatpush3.bf16.msra.mxu1 %v4020_v43  ;;  %v1699_v27 = vld [vmem:[#allocation2 + $0x18] sm:$0xff] }
 0x772   : > { %3153 = vmatprep.subr.bf16.mxu0 %v4010_v28  ;;  %3183 = vmatprep.subr.bf16.mxu1 %v3412_v45 }
 0x773   : > { %1940 = vmatprep.mubr.f32.mxu0 %v3413_v48  ;;  %2721 = vmatprep.mubr.msk.f32.mxu1 %vm3414_vm2, %v3413_v48 }
 0x775   : > { %3155 = vmatpush1.bf16.msra.mxu0 %v4016_v29  ;;  %3185 = vmatpush3.bf16.msra.mxu1 %v4031_v46 }
 0x776   : > { %3157 = vmatprep.subr.bf16.mxu0 %v4025_v42  ;;  %3186 = vmatprep.subr.bf16.mxu1 %v3412_v45  ;;  %v1700_v42 = vld [vmem:[#allocation2 + $0x20] sm:$0xff] }
 0x779   : > { %3159 = vmatpush1.bf16.msra.mxu0 %v4040_v44  ;;  %3188 = vmatpush3.bf16.msra.mxu1 %v4050_v50 }
 0x77a   : > { %3161 = vmatprep.subr.bf16.mxu0 %v4045_v47  ;;  %3189 = vmatprep.subr.bf16.mxu1 %v3412_v45 }
 0x77d   : > { %3163 = vmatpush1.bf16.msra.mxu0 %v4056_v53  ;;  %3191 = vmatpush3.bf16.msra.mxu1 %v4066_v56 }
 0x77e   : > { %3165 = vmatprep.subr.bf16.mxu0 %v4061_v57  ;;  %3192 = vmatprep.subr.bf16.mxu1 %v3412_v45 }
 0x781   : > { %3167 = vmatpush1.bf16.msra.mxu0 %v4072_v13  ;;  %3194 = vmatpush3.bf16.msra.mxu1 %v4082_v32  ;;  %v1701_v32 = vld [vmem:[#allocation2 + $0x28] sm:$0xff] }
 0x782   : > { %3169 = vmatprep.subr.bf16.mxu0 %v4077_v17  ;;  %3195 = vmatprep.subr.bf16.mxu1 %v3412_v45 }
 0x785   : > { %3171 = vmatpush1.bf16.msra.mxu0 %v4088_v38  ;;  %3197 = vmatpush3.bf16.msra.mxu1 %v4098_v9 }
 0x786   : > { %3173 = vmatprep.subr.bf16.mxu0 %v4093_v22  ;;  %3198 = vmatprep.subr.bf16.mxu1 %v3412_v45 }
 0x789   : > { %3175 = vmatpush1.bf16.msra.mxu0 %v4104_v41  ;;  %3200 = vmatpush3.bf16.msra.mxu1 %v4114_v8 }
 0x78a   : > { %3177 = vmatprep.subr.bf16.mxu0 %v4109_v24  ;;  %3201 = vmatprep.subr.bf16.mxu1 %v3412_v45 }
 0x78d   : > { %3179 = vmatpush1.bf16.msra.mxu0 %v4120_v62  ;;  %3203 = vmatpush3.bf16.msra.mxu1 %v4126_v6 }
 0x843   : > { %v1769_v28 = vpop.f32.mrb[4].mxu0  ;;  %v1840_v29 = vpop.f32.mrb[4].mxu1 }
 0x844   : > { %v1844_v43 = vadd.f32 %v1769_v28, %v1699_v27  ;;  %v1771_v46 = vpop.f32.mrb[5].mxu0  ;;  %v2688_v48 = vpop.f32.mrb[5].mxu1  ;;  %v1858_v13 = vadd.f32 %v4407_v61, %v1840_v29 }
 0x845   : > { %v1851_v47 = vadd.f32 %v1771_v46, %v1700_v42 }
 0x846   : > { %v2261_v44 = vmul.f32 -1.442695, %v1844_v43 }
 0x847   : > { %v2262_v50 = vmul.f32 -1.442695, %v1851_v47 }
 0x848   : > { %3331 = vpow2.f32 %v2261_v44 }
 0x849   : > { %3333 = vpow2.f32 %v2262_v50 }
 0x852   : > { %v3332_v53 = vpop.eup %3331 }
 0x853   : > { %v1848_v57 = vadd.f32 1.0, %v3332_v53  ;;  %v3334_v45 = vpop.eup %3333 }
 0x854   : > { %v1855_v56 = vadd.f32 1.0, %v3334_v45 }
 0x855   : > { %3335 = vrcp.f32 %v1848_v57 }
 0x856   : > { %3337 = vrcp.f32 %v1855_v56 }
 0x85f   : > { %v3336_v17 = vpop.eup %3335 }
 0x860   : > { %v1859_v38 = vmul.f32 %v3336_v17, %v1858_v13  ;;  %v3338_v9 = vpop.eup %3337 }
 0x861   : > { %v1862_v41 = vsub.f32 1.0, %v3338_v9  ;;  %v1864_v62 = vmul.f32 %v3338_v9, %v4217_v54 }
 0x862   : > { %v1860_v22 = vadd.f32 %v1859_v38, %v1701_v32 }
 0x864   : > { %3339 = vtanh.f32 %v1860_v22 }
 0x86e   : > { %v3340_v24 = vpop.eup %3339 }
 0x86f   : > { %v1863_v8 = vmul.f32 %v3340_v24, %v1862_v41 }
 0x871   : > { %v1865_v6 = vadd.f32 %v1864_v62, %v1863_v8 }
 0x873   : > { %2263 = vst [vmem:[%s3546_s12 + $0x8] sm:$0xff] %v1865_v6  ;;  %1941 = vmatmul.mubr.f32.vlgmr.msra.gmra.mrb[6].mxu0 %v1865_v6  ;;  %2722 = vmatmul.mubr.f32.vlgmr.msra.gmra.mrb[6].mxu1 %v1865_v6 }
 0x946   : > { %v1942_v58 = vpop.f32.mrb[6].mxu0  ;;  %v2013_v0 = vpop.f32.mrb[6].mxu1 }
 0x947   : > { %v2017_v11 = vadd.f32 %v1942_v58, %v1872_v55  ;;  %v1944_v30 = vpop.f32.mrb[7].mxu0  ;;  %v2723_v14 = vpop.f32.mrb[7].mxu1  ;;  %v2031_v60 = vadd.f32 %v4407_v61, %v2013_v0 }
 0x948   : > { %v2024_v35 = vadd.f32 %v1944_v30, %v1873_v18 }
 0x949   : > { %v2264_v31 = vmul.f32 -1.442695, %v2017_v11 }
 0x94a   : > { %v2265_v37 = vmul.f32 -1.442695, %v2024_v35 }
 0x94b   : > { %3341 = vpow2.f32 %v2264_v31 }
 0x94c   : > { %3343 = vpow2.f32 %v2265_v37 }
 0x955   : > { %v3342_v39 = vpop.eup %3341 }
 0x956   : > { %v2021_v40 = vadd.f32 1.0, %v3342_v39  ;;  %v3344_v23 = vpop.eup %3343 }
 0x957   : > { %v2028_v10 = vadd.f32 1.0, %v3344_v23 }
 0x958   : > { %3345 = vrcp.f32 %v2021_v40 }
 0x959   : > { %3347 = vrcp.f32 %v2028_v10 }
 0x962   : > { %v3346_v1 = vpop.eup %3345 }
 0x963   : > { %v2032_v21 = vmul.f32 %v3346_v1, %v2031_v60  ;;  %v3348_v20 = vpop.eup %3347 }
 0x964   : > { %v2035_v4 = vsub.f32 1.0, %v3348_v20  ;;  %v2037_v2 = vmul.f32 %v3348_v20, %v1865_v6 }
 0x965   : > { %v2033_v12 = vadd.f32 %v2032_v21, %v1874_v15 }
 0x967   : > { %3349 = vtanh.f32 %v2033_v12 }
 0x971   : > { %v3350_v5 = vpop.eup %3349 }
 0x972   : > { %v2036_v63 = vmul.f32 %v3350_v5, %v2035_v4 }
 0x974   : > { %v2038_v7 = vadd.f32 %v2037_v2, %v2036_v63 }
 0x976   : > { %2039 = vst [vmem:[#allocation3] sm:$0xff] %v2038_v7  ;;  %2040 = vst [vmem:[%s3546_s12] sm:$0xff] %v2038_v7 }
 0x977 PF: > { %2047 = sbr.rel (!%p3497_p4) target bundleno = 2431 (0x97f), region = 56  ;;  %s2273_s22 = sshll.u32 (%p3497_p4), %s3513_s6, 3  ;;  %v2092_v16 = vld [vmem:[%s3546_s12 + $0x8] sm:$0xff] (%p3497_p4)  ;;  %v2094_v3 = vld [vmem:[%s3546_s12 + $0x10] sm:$0xff] (%p3497_p4)  ;;  %v2096_v19 = vld [vmem:[%s3546_s12 + $0x18] sm:$0xff] (%p3497_p4) }
 0x978   : > { %s2054_s26 = sadd.s32 (%p3497_p4), %s3393_s21, %s2273_s22 }
 0x979   : > { %s2270_s16 = sshll.u32 (%p3497_p4), %s2054_s26, 3 }
 0x97a   : > { %s2056_s9 = scalar_lea.vmem (%p3497_p4), %s4298_s5, %s2270_s16 }
 0x97b   : > { %2093 = vst [vmem:[%s2056_s9 + $0x10] sm:$0xff] (%p3497_p4), %v2092_v16  ;;  %2095 = vst [vmem:[%s2056_s9 + $0x20] sm:$0xff] (%p3497_p4), %v2094_v3 }
 0x97c   : > { %2097 = vst [vmem:[%s2056_s9 + $0x30] sm:$0xff] (%p3497_p4), %v2096_v19 }
 0x97d   : > { %v2090_v61 = vld [vmem:[%s3546_s12] sm:$0xff] (%p3497_p4) }
 0x97e   : > { %2091 = vst [vmem:[%s2056_s9] sm:$0xff] %v2090_v61 }
 0x97f PF: > { %s15_s24 = sadd.s32 1, %s3405_s24   ;;  %s4408_s11 = sld [smem:[#allocation9_spill]] }
 0x980   : > { %p12_p0 = scmp.ge.s32.totalorder %s15_s24, 6   ;;  %s4409_s20 = sld [smem:[#allocation5_spill]] }
 0x981   : > { %s4410_s21 = sld [smem:[#allocation6_spill]]  ;;  %s4411_s22 = sld [smem:[#allocation7_spill]] }
 0x982   : > { %s4412_s23 = sld [smem:[#allocation8_spill]]  ;;  %s4413_s18 = smov %s3385_s19 }
 0x983   :  { %14 = sbr.rel (!%p12_p0) target bundleno = 4 (0x4), region = 146 }
 0x985   : > { %s4414_s19 = smov %s4408_s11 }

// kernel: sentence_with_position_forward.3
= control target key start
LH: loop header
LB: loop body
LE: loop exit
PB: predicated region body
PF: predicated region fallthrough
CT: control target
= control target key end

     0   :  { %s3577_s18 = smov 0   ;;  %s3579_s19 = smov 0   ;;  %s4493_s0 = inlined_call_operand.vmem [shape: f32[8,8,256], index: 0, kind: input, shape index: {}]   ;;  %s4494_s1 = inlined_call_operand.vmem [shape: f32[2,256,384], index: 1, kind: input, shape index: {}]   ;;  %s4495_s2 = inlined_call_operand.vmem [shape: f32[2,1,384], index: 2, kind: input, shape index: {}]   ;;  %s4496_s3 = inlined_call_operand.vmem [shape: f32[2,128,384], index: 3, kind: input, shape index: {}]   ;;  %s4497_s4 = inlined_call_operand.vmem [shape: f32[2,1,128], index: 4, kind: input, shape index: {}]   ;;  %s4498_s5 = inlined_call_operand.vmem [shape: f32[8,8,256], index: 5, kind: output, shape index: {}]  }
   0x1   :  { %s3581_s20 = smov 0   ;;  %s3583_s21 = smov 0  }
   0x2   :  { %s3585_s22 = smov 0   ;;  %s3587_s23 = smov 0  }
   0x3   :  { %s3589_s24 = smov 0  }
   0x4 LB: > { %4532 = sst [smem:[#allocation5_spill]] %s3530_s22  ;;  %s24_s25 = sadd.s32 1, %s3530_s22  ;;  %s3538_s24 = sphi %s3589_s24, %s15_s24   ;;  %s3534_s23 = sphi %s3587_s23, %s4612_s23   ;;  %s3530_s22 = sphi %s3585_s22, %s4611_s22   ;;  %s3526_s21 = sphi %s3583_s21, %s4610_s21   ;;  %s3522_s20 = sphi %s3581_s20, %s4609_s20   ;;  %s3518_s19 = sphi %s3579_s19, %s4614_s19   ;;  %s3514_s18 = sphi %s3577_s18, %s4613_s18  }
   0x5   : > { %4533 = sst [smem:[#allocation6_spill]] %s3534_s23  ;;  %p25_p0 = scmp.ge.s32.totalorder %s24_s25, 2 }
   0x6   : > { %s27_s26 = sadd.s32 1, %s3534_s23  ;;  %s2283_s27 = sadd.s32 4294967295, %s3538_s24  }
   0x7   : > { %s2287_s28 = sshll.u32 %s3530_s22, 1  ;;  %s4616_s25 = smov (%p25_p0, %s24_s25), 0 }
   0x8   : > { %4534 = sst [smem:[#allocation7_spill]] %s4616_s25  ;;  %s4618_s26 = smov (!%p25_p0, %s27_s26), %s3534_s23 }
   0x9   : > { %s170_s29 = ssub.s32 1, %s2287_s28  ;;  %s2288_s30 = sshll.u32 %s4616_s25, 1 }
   0xa   : > { %p29_p1 = scmp.ge.s32.totalorder %s4618_s26, 2  ;;  %s171_s6 = smul.u32 %s3534_s23, %s170_s29 }
   0xb   : > { %s174_s7 = ssub.s32 1, %s2288_s30  ;;  %p192_p2 = scmp.ne.s32.totalorder %s3518_s19, %s3514_s18 }
   0xc   : > { %s4620_s26 = smov (%p29_p1, %s4618_s26), 0  ;;  %s172_s8 = sadd.s32 %s3530_s22, %s171_s6 }
   0xd   : > { %4535 = sst [smem:[#allocation8_spill]] %s4620_s26  ;;  %p193_p3 = scmp.eq.s32.totalorder %s2283_s27, 3 }
   0xe   : > { %s175_s9 = smul.u32 %s174_s7, %s4620_s26  ;;  %s178_s10 = ssub.s32 %s3534_s23, %s4620_s26 }
   0xf   : > { %p3629_p4 = por %p193_p3, %p192_p2  ;;  %p2291_p5 = scmp.ge.s32.totalorder %s3538_s24, 1 }
  0x10   : > { %s176_s12 = sadd.s32 %s175_s9, %s4616_s25  ;;  %p264_p6 = scmp.lt.s32.totalorder %s3538_s24, 5 }
  0x11   : > { %s177_s13 = ssub.s32 %s172_s8, %s176_s12  ;;  %s182_s14 = sadd.s32 1, %s3518_s19 }
  0x12   : > { %s179_s15 = sor.u32 %s178_s10, %s177_s13  ;;  %p265_p7 = pnand %p2291_p5, %p264_p6 }
  0x13   : > { %p180_p8 = scmp.eq.s32.totalorder %s179_s15, 0 }
  0x14   : > { %268 = sbr.rel (%p265_p7) target bundleno = 2479 (0x9af), region = 40 }
  0x15   : > { %s3638_s16 = scalar_select %p180_p8, %s3518_s19, %s182_s14  }
  0x17   : > { %4537 = sst [smem:[#allocation9_spill]] %s3638_s16 }
  0x1b   : > { %s310_s17 = sand.u32 1, %s3514_s18   ;;  %s2293_s27 = sshll.u32 %s3522_s20, 1 }
  0x1c   : > { %s2292_s28 = sshll.u32 %s310_s17, 5  ;;  %s314_s29 = ssub.s32 1, %s2293_s27 }
  0x1d   : > { %s315_s30 = smul.u32 %s3526_s21, %s314_s29  ;;  %p328_p9 = scmp.lt.s32.totalorder %s3526_s21, 1 }
  0x1e   : > { %s3678_s12 = scalar_lea.vmem [#allocation4], %s2292_s28  ;;  %p2299_p11 = scmp.ne.s32.totalorder %s3522_s20, 0 }
  0x1f   : > { %s3645_s6 = sadd.s32 %s3522_s20, %s315_s30  ;;  %v3540_v0 = vmov (!%p2299_p11), 0.0  }
  0x20   : > { %s2294_s7 = sshll.u32 %s3645_s6, 2  ;;  %354 = vst [vmem:[#allocation3] sm:$0xff] (!%p2299_p11), %v3540_v0 }
  0x21   : > { %p318_p10 = scmp.lt.s32.totalorder %s2294_s7, 7 }
  0x22   : > { %s3649_s8 = scalar_select %p328_p9, %s3526_s21, 1 }
  0x23   : > { %s4622_s7 = smov (!%p318_p10, %s2294_s7), 7  ;;  %353 = sbr.rel (%p2299_p11) target bundleno = 42 (0x2a), region = 44 }
  0x24   : > { %s3338_s9 = smul.u32 768, %s3649_s8  ;;  %s2332_s13 = sshll.u32 %s4622_s7, 4 }
  0x25   : > { %s3339_s14 = smul.u32 3, %s3649_s8  ;;  %s3660_s27 = scalar_lea.vmem %s4493_s0, %s2332_s13 }
  0x26   : > { %s3665_s26 = scalar_lea.vmem %s4494_s1, %s3338_s9  ;;  %s3340_s16 = smul.u32 384, %s3649_s8 }
  0x27   : > { %s3670_s22 = scalar_lea.vmem %s4495_s2, %s3339_s14 }
  0x28   : > { %s3676_s7 = scalar_lea.vmem %s4496_s3, %s3340_s16 }
  0x2a PF: > { %v364_v1 = vld [vmem:[%s3665_s26 + $0x8] sm:$0xff]  ;;  %v367_v2 = vld [vmem:[%s3665_s26 + $0x20] sm:$0xff]  ;;  %v366_v5 = vld [vmem:[%s3665_s26 + $0x18] sm:$0xff]  ;;  %s4567_s25 = scalar_lea.vmem %s4497_s4, %s3649_s8  ;;  %p2301_p12 = scmp.ne.s32.totalorder %s3526_s21, 0 }
  0x2b   : > { %v363_v3 = vld [vmem:[%s3665_s26] sm:$0xff]  ;;  %v2794_v4 = vpack.c.bf16 %v367_v2, %v364_v1  ;;  %v370_v6 = vld [vmem:[%s3665_s26 + $0x38] sm:$0xff]  ;;  %v373_v7 = vld [vmem:[%s3665_s26 + $0x50] sm:$0xff]  ;;  %vm3543_vm0 = vmmov (!%p2301_p12), 0  }
  0x2c   : > { %v2796_v8 = vpack.c.bf16 %v366_v5, %v363_v3  ;;  %v2798_v9 = vpack.c.bf16 %v373_v7, %v370_v6  ;;  %v369_v10 = vld [vmem:[%s3665_s26 + $0x30] sm:$0xff]  ;;  %v372_v11 = vld [vmem:[%s3665_s26 + $0x48] sm:$0xff]  ;;  %v379_v13 = vld [vmem:[%s3665_s26 + $0x80] sm:$0xff] }
  0x2d   : > { %v376_v12 = vld [vmem:[%s3665_s26 + $0x68] sm:$0xff]  ;;  %2795 = vmatprep.subr.bf16.mxu0 %v2794_v4  ;;  %v2800_v14 = vpack.c.bf16 %v372_v11, %v369_v10  ;;  %v375_v16 = vld [vmem:[%s3665_s26 + $0x60] sm:$0xff]  ;;  %v378_v17 = vld [vmem:[%s3665_s26 + $0x78] sm:$0xff] }
  0x2e   : > { %2797 = vmatpush1.bf16.msra.mxu0 %v2796_v8  ;;  %v2802_v15 = vpack.c.bf16 %v379_v13, %v376_v12  ;;  %v382_v18 = vld [vmem:[%s3665_s26 + $0x98] sm:$0xff]  ;;  %v385_v19 = vld [vmem:[%s3665_s26 + $0xb0] sm:$0xff]  ;;  %v2804_v20 = vpack.c.bf16 %v378_v17, %v375_v16  ;;  %v384_v23 = vld [vmem:[%s3665_s26 + $0xa8] sm:$0xff] }
  0x2f   : > { %2799 = vmatprep.subr.bf16.mxu0 %v2798_v9  ;;  %v2806_v21 = vpack.c.bf16 %v385_v19, %v382_v18  ;;  %v381_v22 = vld [vmem:[%s3665_s26 + $0x90] sm:$0xff]  ;;  %v388_v24 = vld [vmem:[%s3665_s26 + $0xc8] sm:$0xff]  ;;  %v391_v25 = vld [vmem:[%s3665_s26 + $0xe0] sm:$0xff] }
  0x30   : > { %v413_v26 = vld [vmem:[%s3665_s26 + $0x190] sm:$0xff]  ;;  %v416_v27 = vld [vmem:[%s3665_s26 + $0x1a8] sm:$0xff]  ;;  %v2808_v30 = vpack.c.bf16 %v384_v23, %v381_v22  ;;  %v387_v31 = vld [vmem:[%s3665_s26 + $0xc0] sm:$0xff]  ;;  %v2810_v35 = vpack.c.bf16 %v391_v25, %v388_v24 }
  0x31   : > { %v365_v28 = vld [vmem:[%s3665_s26 + $0x10] sm:$0xff]  ;;  %v368_v29 = vld [vmem:[%s3665_s26 + $0x28] sm:$0xff]  ;;  %v390_v32 = vld [vmem:[%s3665_s26 + $0xd8] sm:$0xff]  ;;  %v2858_v33 = vpack.c.bf16 %v416_v27, %v413_v26 }
  0x32   : > { %2801 = vmatpush1.bf16.msra.mxu0 %v2800_v14  ;;  %v2860_v34 = vpack.c.bf16 %v368_v29, %v365_v28  ;;  %v394_v36 = vld [vmem:[%s3665_s26 + $0xf8] sm:$0xff]  ;;  %v419_v37 = vld [vmem:[%s3665_s26 + $0x1c0] sm:$0xff]  ;;  %v397_v39 = vld [vmem:[%s3665_s26 + $0x110] sm:$0xff]  ;;  %v2812_v44 = vpack.c.bf16 %v390_v32, %v387_v31 }
  0x33   : > { %2803 = vmatprep.subr.bf16.mxu0 %v2802_v15  ;;  %v422_v38 = vld [vmem:[%s3665_s26 + $0x1d8] sm:$0xff]  ;;  %2859 = vmatprep.subr.bf16.mxu1 %v2858_v33  ;;  %v371_v41 = vld [vmem:[%s3665_s26 + $0x40] sm:$0xff]  ;;  %v425_v45 = vld [vmem:[%s3665_s26 + $0x1f0] sm:$0xff]  ;;  %v2814_v48 = vpack.c.bf16 %v397_v39, %v394_v36 }
  0x34   : > { %v2862_v40 = vpack.c.bf16 %v422_v38, %v419_v37  ;;  %v374_v42 = vld [vmem:[%s3665_s26 + $0x58] sm:$0xff]  ;;  %2861 = vmatpush3.bf16.msra.mxu1 %v2860_v34  ;;  %v428_v46 = vld [vmem:[%s3665_s26 + $0x208] sm:$0xff]  ;;  %v377_v47 = vld [vmem:[%s3665_s26 + $0x70] sm:$0xff] }
  0x35   : > { %v2864_v43 = vpack.c.bf16 %v374_v42, %v371_v41  ;;  %v393_v49 = vld [vmem:[%s3665_s26 + $0xf0] sm:$0xff]  ;;  %v396_v50 = vld [vmem:[%s3665_s26 + $0x108] sm:$0xff]  ;;  %v2866_v51 = vpack.c.bf16 %v428_v46, %v425_v45  ;;  %v403_v54 = vld [vmem:[%s3665_s26 + $0x140] sm:$0xff] }
  0x36   : > { %2805 = vmatpush1.bf16.msra.mxu0 %v2804_v20  ;;  %2863 = vmatprep.subr.bf16.mxu1 %v2862_v40  ;;  %v380_v52 = vld [vmem:[%s3665_s26 + $0x88] sm:$0xff]  ;;  %v431_v55 = vld [vmem:[%s3665_s26 + $0x220] sm:$0xff]  ;;  %v434_v57 = vld [vmem:[%s3665_s26 + $0x238] sm:$0xff]  ;;  %v2816_v58 = vpack.c.bf16 %v396_v50, %v393_v49 }
  0x37   : > { %2807 = vmatprep.subr.bf16.mxu0 %v2806_v21  ;;  %v400_v53 = vld [vmem:[%s3665_s26 + $0x128] sm:$0xff]  ;;  %v2868_v56 = vpack.c.bf16 %v380_v52, %v377_v47  ;;  %v399_v59 = vld [vmem:[%s3665_s26 + $0x120] sm:$0xff]  ;;  %v2870_v60 = vpack.c.bf16 %v434_v57, %v431_v55  ;;  %v386_v62 = vld [vmem:[%s3665_s26 + $0xb8] sm:$0xff] }
  0x38   : > { %2865 = vmatpush3.bf16.msra.mxu1 %v2864_v43  ;;  %v383_v61 = vld [vmem:[%s3665_s26 + $0xa0] sm:$0xff]  ;;  %v2818_v63 = vpack.c.bf16 %v403_v54, %v400_v53  ;;  %v402_v0 = vld [vmem:[%s3665_s26 + $0x138] sm:$0xff]  ;;  %v437_v1 = vld [vmem:[%s3665_s26 + $0x250] sm:$0xff] }
  0x39   : > { %2867 = vmatprep.subr.bf16.mxu1 %v2866_v51  ;;  %v440_v2 = vld [vmem:[%s3665_s26 + $0x268] sm:$0xff]  ;;  %v406_v3 = vld [vmem:[%s3665_s26 + $0x158] sm:$0xff]  ;;  %v409_v4 = vld [vmem:[%s3665_s26 + $0x170] sm:$0xff]  ;;  %v2872_v5 = vpack.c.bf16 %v386_v62, %v383_v61  ;;  %v2820_v6 = vpack.c.bf16 %v402_v0, %v399_v59 }
  0x3a   : > { %2809 = vmatpush1.bf16.msra.mxu0 %v2808_v30  ;;  %v405_v7 = vld [vmem:[%s3665_s26 + $0x150] sm:$0xff]  ;;  %v2874_v8 = vpack.c.bf16 %v440_v2, %v437_v1  ;;  %v392_v10 = vld [vmem:[%s3665_s26 + $0xe8] sm:$0xff]  ;;  %v2822_v11 = vpack.c.bf16 %v409_v4, %v406_v3  ;;  %v443_v13 = vld [vmem:[%s3665_s26 + $0x280] sm:$0xff] }
  0x3b   : > { %2811 = vmatprep.subr.bf16.mxu0 %v2810_v35  ;;  %v389_v9 = vld [vmem:[%s3665_s26 + $0xd0] sm:$0xff]  ;;  %v408_v12 = vld [vmem:[%s3665_s26 + $0x168] sm:$0xff]  ;;  %v446_v14 = vld [vmem:[%s3665_s26 + $0x298] sm:$0xff] }
  0x3c   : > { %2869 = vmatpush3.bf16.msra.mxu1 %v2868_v56  ;;  %v412_v15 = vld [vmem:[%s3665_s26 + $0x188] sm:$0xff]  ;;  %v415_v16 = vld [vmem:[%s3665_s26 + $0x1a0] sm:$0xff]  ;;  %v2876_v17 = vpack.c.bf16 %v392_v10, %v389_v9  ;;  %v2824_v18 = vpack.c.bf16 %v408_v12, %v405_v7  ;;  %v2878_v20 = vpack.c.bf16 %v446_v14, %v443_v13  ;;  %v398_v22 = vld [vmem:[%s3665_s26 + $0x118] sm:$0xff] }
  0x3d   : > { %2871 = vmatprep.subr.bf16.mxu1 %v2870_v60  ;;  %v411_v19 = vld [vmem:[%s3665_s26 + $0x180] sm:$0xff]  ;;  %v2826_v23 = vpack.c.bf16 %v415_v16, %v412_v15  ;;  %v414_v24 = vld [vmem:[%s3665_s26 + $0x198] sm:$0xff]  ;;  %v449_v25 = vld [vmem:[%s3665_s26 + $0x2b0] sm:$0xff] }
  0x3e   : > { %2813 = vmatpush1.bf16.msra.mxu0 %v2812_v44  ;;  %v395_v21 = vld [vmem:[%s3665_s26 + $0x100] sm:$0xff]  ;;  %v452_v26 = vld [vmem:[%s3665_s26 + $0x2c8] sm:$0xff]  ;;  %v418_v27 = vld [vmem:[%s3665_s26 + $0x1b8] sm:$0xff]  ;;  %v2828_v31 = vpack.c.bf16 %v414_v24, %v411_v19 }
  0x3f   : > { %2815 = vmatprep.subr.bf16.mxu0 %v2814_v48  ;;  %v421_v28 = vld [vmem:[%s3665_s26 + $0x1d0] sm:$0xff]  ;;  %v2880_v29 = vpack.c.bf16 %v398_v22, %v395_v21  ;;  %v356_v30 = vld [vmem:[%s3660_s27 + $0x8] sm:$0xff]  ;;  %v2882_v33 = vpack.c.bf16 %v452_v26, %v449_v25  ;;  %v455_v38 = vld [vmem:[%s3665_s26 + $0x2e0] sm:$0xff] }
  0x40   : > { %2873 = vmatpush3.bf16.msra.mxu1 %v2872_v5  ;;  %v417_v32 = vld [vmem:[%s3665_s26 + $0x1b0] sm:$0xff]  ;;  %v404_v35 = vld [vmem:[%s3665_s26 + $0x148] sm:$0xff]  ;;  %v2830_v36 = vpack.c.bf16 %v421_v28, %v418_v27  ;;  %v458_v39 = vld [vmem:[%s3665_s26 + $0x2f8] sm:$0xff]  ;;  %629 = vmatprep.mubr.f32.mxu1 %v356_v30 }
  0x41   : > { %2875 = vmatprep.subr.bf16.mxu1 %v2874_v8  ;;  %v401_v34 = vld [vmem:[%s3665_s26 + $0x130] sm:$0xff]  ;;  %v420_v37 = vld [vmem:[%s3665_s26 + $0x1c8] sm:$0xff]  ;;  %v427_v41 = vld [vmem:[%s3665_s26 + $0x200] sm:$0xff]  ;;  %540 = vmatprep.mubr.f32.mxu0 %v356_v30  ;;  %v2886_v44 = vpack.c.bf16 %v458_v39, %v455_v38 }
  0x42   : > { %2817 = vmatpush1.bf16.msra.mxu0 %v2816_v58  ;;  %v424_v40 = vld [vmem:[%s3665_s26 + $0x1e8] sm:$0xff]  ;;  %v2884_v42 = vpack.c.bf16 %v404_v35, %v401_v34  ;;  %v2832_v43 = vpack.c.bf16 %v420_v37, %v417_v32  ;;  %v407_v45 = vld [vmem:[%s3665_s26 + $0x160] sm:$0xff]  ;;  %v410_v46 = vld [vmem:[%s3665_s26 + $0x178] sm:$0xff] }
  0x43   : > { %2819 = vmatprep.subr.bf16.mxu0 %v2818_v63  ;;  %v2834_v47 = vpack.c.bf16 %v427_v41, %v424_v40  ;;  %v423_v48 = vld [vmem:[%s3665_s26 + $0x1e0] sm:$0xff]  ;;  %v426_v49 = vld [vmem:[%s3665_s26 + $0x1f8] sm:$0xff]  ;;  %v433_v51 = vld [vmem:[%s3665_s26 + $0x230] sm:$0xff]  ;;  %v2888_v52 = vpack.c.bf16 %v410_v46, %v407_v45 }
  0x44   : > { %2877 = vmatpush3.bf16.msra.mxu1 %v2876_v17  ;;  %v430_v50 = vld [vmem:[%s3665_s26 + $0x218] sm:$0xff]  ;;  %v2836_v53 = vpack.c.bf16 %v426_v49, %v423_v48  ;;  %v429_v55 = vld [vmem:[%s3665_s26 + $0x210] sm:$0xff]  ;;  %v432_v56 = vld [vmem:[%s3665_s26 + $0x228] sm:$0xff] }
  0x45   : > { %2879 = vmatprep.subr.bf16.mxu1 %v2878_v20  ;;  %v2838_v54 = vpack.c.bf16 %v433_v51, %v430_v50  ;;  %v436_v57 = vld [vmem:[%s3665_s26 + $0x248] sm:$0xff]  ;;  %v439_v58 = vld [vmem:[%s3665_s26 + $0x260] sm:$0xff]  ;;  %v2840_v60 = vpack.c.bf16 %v432_v56, %v429_v55  ;;  %v358_v61 = vld [vmem:[%s3660_s27 + $0x18] sm:$0xff] }
  0x46   : > { %2821 = vmatpush1.bf16.msra.mxu0 %v2820_v6  ;;  %v355_v59 = vld [vmem:[%s3660_s27] sm:$0xff]  ;;  %v2842_v62 = vpack.c.bf16 %v439_v58, %v436_v57  ;;  %v438_v0 = vld [vmem:[%s3665_s26 + $0x258] sm:$0xff]  ;;  %v445_v2 = vld [vmem:[%s3665_s26 + $0x290] sm:$0xff] }
  0x47   : > { %2823 = vmatprep.subr.bf16.mxu0 %v2822_v11  ;;  %v435_v63 = vld [vmem:[%s3665_s26 + $0x240] sm:$0xff]  ;;  %v442_v1 = vld [vmem:[%s3665_s26 + $0x278] sm:$0xff]  ;;  %v357_v3 = vld [vmem:[%s3660_s27 + $0x10] sm:$0xff] }
  0x48   : > { %2881 = vmatpush3.bf16.msra.mxu1 %v2880_v29  ;;  %v2844_v4 = vpack.c.bf16 %v438_v0, %v435_v63  ;;  %v360_v5 = vld [vmem:[%s3660_s27 + $0x28] sm:$0xff]  ;;  %v2846_v6 = vpack.c.bf16 %v445_v2, %v442_v1  ;;  %v441_v7 = vld [vmem:[%s3665_s26 + $0x270] sm:$0xff]  ;;  %v451_v10 = vld [vmem:[%s3665_s26 + $0x2c0] sm:$0xff] }
  0x49   : > { %2883 = vmatprep.subr.bf16.mxu1 %v2882_v33  ;;  %v444_v8 = vld [vmem:[%s3665_s26 + $0x288] sm:$0xff]  ;;  %v359_v11 = vld [vmem:[%s3660_s27 + $0x20] sm:$0xff]  ;;  %v362_v13 = vld [vmem:[%s3660_s27 + $0x38] sm:$0xff] }
  0x4a   : > { %2825 = vmatpush1.bf16.msra.mxu0 %v2824_v18  ;;  %v448_v9 = vld [vmem:[%s3665_s26 + $0x2a8] sm:$0xff]  ;;  %v2848_v12 = vpack.c.bf16 %v444_v8, %v441_v7  ;;  %v447_v15 = vld [vmem:[%s3665_s26 + $0x2a0] sm:$0xff]  ;;  %v450_v16 = vld [vmem:[%s3665_s26 + $0x2b8] sm:$0xff] }
  0x4b   : > { %2827 = vmatprep.subr.bf16.mxu0 %v2826_v23  ;;  %v2850_v14 = vpack.c.bf16 %v451_v10, %v448_v9  ;;  %v454_v17 = vld [vmem:[%s3665_s26 + $0x2d8] sm:$0xff]  ;;  %v457_v18 = vld [vmem:[%s3665_s26 + $0x2f0] sm:$0xff]  ;;  %v2852_v20 = vpack.c.bf16 %v450_v16, %v447_v15  ;;  %v456_v23 = vld [vmem:[%s3665_s26 + $0x2e8] sm:$0xff]  ;;  %v461_v10 = vlaneseq }
  0x4c   : > { %2885 = vmatpush3.bf16.msra.mxu1 %v2884_v42  ;;  %v361_v19 = vld [vmem:[%s3660_s27 + $0x30] sm:$0xff]  ;;  %v2854_v21 = vpack.c.bf16 %v457_v18, %v454_v17  ;;  %v3786_v25 = vld [vmem:[%s3676_s7] sm:$0xff]  ;;  %v3789_v26 = vld [vmem:[%s3676_s7 + $0x8] sm:$0xff] }
  0x4d   : > { %2887 = vmatprep.subr.bf16.mxu1 %v2886_v44  ;;  %v453_v22 = vld [vmem:[%s3665_s26 + $0x2d0] sm:$0xff]  ;;  %v3795_v28 = vld [vmem:[%s3676_s7 + $0x18] sm:$0xff]  ;;  %v3798_v29 = vld [vmem:[%s3676_s7 + $0x20] sm:$0xff] }
  0x4e   : > { %2829 = vmatpush1.bf16.msra.mxu0 %v2828_v31  ;;  %v2856_v24 = vpack.c.bf16 %v456_v23, %v453_v22  ;;  %v3792_v27 = vld [vmem:[%s3676_s7 + $0x10] sm:$0xff]  ;;  %v3801_v30 = vld [vmem:[%s3676_s7 + $0x28] sm:$0xff]  ;;  %v3807_v32 = vld [vmem:[%s3676_s7 + $0x38] sm:$0xff] }
  0x4f   : > { %2831 = vmatprep.subr.bf16.mxu0 %v2830_v36  ;;  %v3804_v31 = vld [vmem:[%s3676_s7 + $0x30] sm:$0xff]  ;;  %v3810_v33 = vld [vmem:[%s3676_s7 + $0x40] sm:$0xff]  ;;  %v3813_v34 = vld [vmem:[%s3676_s7 + $0x48] sm:$0xff] }
  0x50   : > { %2889 = vmatpush3.bf16.msra.mxu1 %v2888_v52  ;;  %v3816_v35 = vld [vmem:[%s3676_s7 + $0x50] sm:$0xff]  ;;  %v3819_v36 = vld [vmem:[%s3676_s7 + $0x58] sm:$0xff]  ;;  %v3822_v37 = vld [vmem:[%s3676_s7 + $0x60] sm:$0xff] }
  0x51   : > { %v3825_v38 = vld [vmem:[%s3676_s7 + $0x68] sm:$0xff]  ;;  %v3828_v39 = vld [vmem:[%s3676_s7 + $0x70] sm:$0xff]  ;;  %v3831_v40 = vld [vmem:[%s3676_s7 + $0x78] sm:$0xff] }
  0x52   : > { %2833 = vmatpush1.bf16.msra.mxu0 %v2832_v43  ;;  %v3834_v41 = vld [vmem:[%s3676_s7 + $0x80] sm:$0xff]  ;;  %v3837_v42 = vld [vmem:[%s3676_s7 + $0x88] sm:$0xff]  ;;  %v3840_v43 = vld [vmem:[%s3676_s7 + $0x90] sm:$0xff] }
  0x53   : > { %2835 = vmatprep.subr.bf16.mxu0 %v2834_v47  ;;  %630 = vmatmul.mubr.f32.vlgmr.msra.gmra.mrb[0].mxu1 %v355_v59  ;;  %4538 = vst [vmem:[#allocation10_spill] sm:$0xff] %v3837_v42  ;;  %4539 = vst [vmem:[#allocation11_spill] sm:$0xff] %v3840_v43  ;;  %v3843_v44 = vld [vmem:[%s3676_s7 + $0x98] sm:$0xff]  ;;  %v3846_v45 = vld [vmem:[%s3676_s7 + $0xa0] sm:$0xff] }
  0x54   : > { %634 = vmatprep.mubr.f32.mxu1 %v358_v61  ;;  %4540 = vst [vmem:[#allocation12_spill] sm:$0xff] %v3846_v45  ;;  %v3849_v46 = vld [vmem:[%s3676_s7 + $0xa8] sm:$0xff]  ;;  %v3852_v47 = vld [vmem:[%s3676_s7 + $0xb0] sm:$0xff]  ;;  %v3855_v48 = vld [vmem:[%s3676_s7 + $0xb8] sm:$0xff] }
  0x55   : > { %4541 = vst [vmem:[#allocation13_spill] sm:$0xff] %v3849_v46  ;;  %4542 = vst [vmem:[#allocation14_spill] sm:$0xff] %v3855_v48  ;;  %v3858_v49 = vld [vmem:[%s3676_s7 + $0xc0] sm:$0xff]  ;;  %v3861_v50 = vld [vmem:[%s3676_s7 + $0xc8] sm:$0xff] }
  0x56   : > { %2837 = vmatpush1.bf16.msra.mxu0 %v2836_v53  ;;  %4543 = vst [vmem:[#allocation15_spill] sm:$0xff] %v3858_v49  ;;  %4544 = vst [vmem:[#allocation16_spill] sm:$0xff] %v3861_v50  ;;  %v3864_v51 = vld [vmem:[%s3676_s7 + $0xd0] sm:$0xff]  ;;  %v3867_v52 = vld [vmem:[%s3676_s7 + $0xd8] sm:$0xff] }
  0x57   : > { %2839 = vmatprep.subr.bf16.mxu0 %v2838_v54  ;;  %635 = vmatmul.mubr.f32.gmra.mrb[2].mxu1 %v357_v3  ;;  %4545 = vst [vmem:[#allocation17_spill] sm:$0xff] %v3864_v51  ;;  %4546 = vst [vmem:[#allocation18_spill] sm:$0xff] %v3867_v52  ;;  %v3870_v53 = vld [vmem:[%s3676_s7 + $0xe0] sm:$0xff]  ;;  %v3873_v54 = vld [vmem:[%s3676_s7 + $0xe8] sm:$0xff] }
  0x58   : > { %639 = vmatprep.mubr.f32.mxu1 %v360_v5  ;;  %4547 = vst [vmem:[#allocation19_spill] sm:$0xff] %v3870_v53  ;;  %4548 = vst [vmem:[#allocation20_spill] sm:$0xff] %v3873_v54  ;;  %v3876_v55 = vld [vmem:[%s3676_s7 + $0xf0] sm:$0xff]  ;;  %v3879_v56 = vld [vmem:[%s3676_s7 + $0xf8] sm:$0xff] }
  0x59   : > { %4549 = vst [vmem:[#allocation21_spill] sm:$0xff] %v3876_v55  ;;  %4550 = vst [vmem:[#allocation22_spill] sm:$0xff] %v3879_v56  ;;  %v3882_v57 = vld [vmem:[%s3676_s7 + $0x100] sm:$0xff]  ;;  %v3885_v58 = vld [vmem:[%s3676_s7 + $0x108] sm:$0xff] }
  0x5a   : > { %2841 = vmatpush1.bf16.msra.mxu0 %v2840_v60  ;;  %4551 = vst [vmem:[#allocation23_spill] sm:$0xff] %v3882_v57  ;;  %4552 = vst [vmem:[#allocation24_spill] sm:$0xff] %v3885_v58  ;;  %v3891_v60 = vld [vmem:[%s3676_s7 + $0x118] sm:$0xff]  ;;  %v3900_v63 = vld [vmem:[%s3676_s7 + $0x130] sm:$0xff] }
  0x5b   : > { %2843 = vmatprep.subr.bf16.mxu0 %v2842_v62  ;;  %640 = vmatmul.mubr.f32.gmra.mrb[4].mxu1 %v359_v11  ;;  %4554 = vst [vmem:[#allocation26_spill] sm:$0xff] %v3891_v60  ;;  %v3897_v62 = vld [vmem:[%s3676_s7 + $0x128] sm:$0xff]  ;;  %4557 = vst [vmem:[#allocation29_spill] sm:$0xff] %v3900_v63  ;;  %v3903_v0 = vld [vmem:[%s3676_s7 + $0x138] sm:$0xff] }
  0x5c   : > { %644 = vmatprep.mubr.f32.mxu1 %v362_v13  ;;  %4556 = vst [vmem:[#allocation28_spill] sm:$0xff] %v3897_v62  ;;  %4558 = vst [vmem:[#allocation30_spill] sm:$0xff] %v3903_v0  ;;  %v3906_v1 = vld [vmem:[%s3676_s7 + $0x140] sm:$0xff]  ;;  %v3909_v2 = vld [vmem:[%s3676_s7 + $0x148] sm:$0xff] }
  0x5d   : > { %4559 = vst [vmem:[#allocation31_spill] sm:$0xff] %v3906_v1  ;;  %4560 = vst [vmem:[#allocation32_spill] sm:$0xff] %v3909_v2  ;;  %v3924_v7 = vld [vmem:[%s3676_s7 + $0x170] sm:$0xff]  ;;  %v3927_v8 = vld [vmem:[%s3676_s7 + $0x178] sm:$0xff] }
  0x5e   : > { %2845 = vmatpush1.bf16.msra.mxu0 %v2844_v4  ;;  %v3915_v4 = vld [vmem:[%s3676_s7 + $0x158] sm:$0xff]  ;;  %4565 = vst [vmem:[#allocation37_spill] sm:$0xff] %v3924_v7  ;;  %4566 = vst [vmem:[#allocation38_spill] sm:$0xff] %v3927_v8  ;;  %v3934_v9 = vld [vmem:[%s4567_s25] ss:$0 sm:$0xff] }
  0x5f   : > { %2847 = vmatprep.subr.bf16.mxu0 %v2846_v6  ;;  %645 = vmatmul.mubr.f32.gmra.mrb[6].mxu1 %v361_v19  ;;  %4562 = vst [vmem:[#allocation34_spill] sm:$0xff] %v3915_v4  ;;  %v3921_v6 = vld [vmem:[%s3676_s7 + $0x168] sm:$0xff]  ;;  %4568 = vst [vmem:[#allocation39_spill] sm:$0xff] %v3934_v9 }
  0x60   : > { %4564 = vst [vmem:[#allocation36_spill] sm:$0xff] %v3921_v6 }
  0x62   : > { %2849 = vmatpush1.bf16.msra.mxu0 %v2848_v12 }
  0x63   : > { %2851 = vmatprep.subr.bf16.mxu0 %v2850_v14 }
  0x66   : > { %2853 = vmatpush1.bf16.msra.mxu0 %v2852_v20 }
  0x67   : > { %2855 = vmatprep.subr.bf16.mxu0 %v2854_v21 }
  0x6a   : > { %2857 = vmatpush1.bf16.msra.mxu0 %v2856_v24 }
  0x6d   : > { %541 = vmatmul.mubr.f32.vlgmr.msra.gmra.mrb[0].mxu0 %v355_v59  ;;  %v3888_v59 = vld [vmem:[%s3676_s7 + $0x110] sm:$0xff] }
  0x6e   : > { %546 = vmatprep.mubr.f32.mxu0 %v358_v61  ;;  %4553 = vst [vmem:[#allocation25_spill] sm:$0xff] %v3888_v59  ;;  %v3894_v61 = vld [vmem:[%s3676_s7 + $0x120] sm:$0xff] }
  0x6f   : > { %4555 = vst [vmem:[#allocation27_spill] sm:$0xff] %v3894_v61 }
  0x71   : > { %547 = vmatmul.mubr.f32.gmra.mrb[2].mxu0 %v357_v3  ;;  %v3912_v3 = vld [vmem:[%s3676_s7 + $0x150] sm:$0xff] }
  0x72   : > { %552 = vmatprep.mubr.f32.mxu0 %v360_v5  ;;  %4561 = vst [vmem:[#allocation33_spill] sm:$0xff] %v3912_v3  ;;  %v3918_v5 = vld [vmem:[%s3676_s7 + $0x160] sm:$0xff] }
  0x73   : > { %4563 = vst [vmem:[#allocation35_spill] sm:$0xff] %v3918_v5 }
  0x75   : > { %553 = vmatmul.mubr.f32.gmra.mrb[4].mxu0 %v359_v11  ;;  %v462_v11 = vshrl.u32 %v461_v10, 7 }
  0x76   : > { %558 = vmatprep.mubr.f32.mxu0 %v362_v13  ;;  %v459_v13 = vld [vmem:[%s3670_s22] sm:$0x7] }
  0x77   : > { %v471_v12 = vsub.s32 2, %v462_v11  ;;  %v463_v10 = vsub.s32 0, %v462_v11  ;;  %v467_v2 = vsub.s32 1, %v462_v11 }
  0x79   : > { %559 = vmatmul.mubr.f32.gmra.mrb[6].mxu0 %v361_v19  ;;  %v472_v15 = vrot.slane %v459_v13, %v471_v12  ;;  %v464_v63 = vrot.slane %v459_v13, %v463_v10  ;;  %v3948_v10 = vpack.c.bf16 (!%p2301_p12), %v3816_v35, %v3807_v32 }
 0x126   : > { %v2366_v14 = vpop.f32.mrb[0].mxu1 }
 0x127   : > { %v2367_v16 = vpop.f32.mrb[1].mxu1 }
 0x128   : > { %v2368_v17 = vadd.f32 %v2367_v16, %v2366_v14  ;;  %v468_v14 = vrot.slane %v459_v13, %v467_v2 }
 0x12a   : > { %v632_v18 = vadd.f32 %v2368_v17, %v472_v15  ;;  %v2369_v19 = vpop.f32.mrb[2].mxu1 }
 0x12b   : > { %v2370_v20 = vpop.f32.mrb[3].mxu1 }
 0x12c   : > { %652 = vst [vmem:[#allocation2 + $0x10] sm:$0xff] %v632_v18  ;;  %v2371_v21 = vadd.f32 %v2370_v20, %v2369_v19 }
 0x12e   : > { %v637_v22 = vadd.f32 %v2371_v21, %v472_v15  ;;  %v2372_v23 = vpop.f32.mrb[4].mxu1 }
 0x12f   : > { %v2373_v24 = vpop.f32.mrb[5].mxu1 }
 0x130   : > { %655 = vst [vmem:[#allocation2 + $0x28] sm:$0xff] %v637_v22  ;;  %v2374_v8 = vadd.f32 %v2373_v24, %v2372_v23  ;;  %v3944_v24 = vpack.c.bf16 (!%p2301_p12), %v3795_v28, %v3786_v25 }
 0x132   : > { %v642_v5 = vadd.f32 %v2374_v8, %v472_v15  ;;  %v2375_v9 = vpop.f32.mrb[6].mxu1 }
 0x133   : > { %v2376_v6 = vpop.f32.mrb[7].mxu1 }
 0x134   : > { %658 = vst [vmem:[#allocation2 + $0x40] sm:$0xff] %v642_v5  ;;  %v2377_v3 = vadd.f32 %v2376_v6, %v2375_v9 }
 0x136   : > { %v647_v12 = vadd.f32 %v2377_v3, %v472_v15  ;;  %v3940_v15 = vpack.c.bf16 (!%p2301_p12), %v3798_v29, %v3789_v26 }
 0x138   : > { %661 = vst [vmem:[#allocation2 + $0x58] sm:$0xff] %v647_v12  ;;  %2891 = vmatprep.subr.bf16.mxu0 (!%p2301_p12), %v3940_v15  ;;  %v3958_v12 = vpack.c.bf16 (!%p2301_p12), %v3801_v30, %v3792_v27 }
 0x139   : > { %2893 = vmatpush1.bf16.msra.mxu0 (!%p2301_p12), %v3944_v24 }
 0x13a   : > { %2895 = vmatprep.subr.bf16.mxu0 (!%p2301_p12), %v3948_v10 }
 0x140   : > { %v542_v16 = vpop.f32.mrb[0].mxu0 }
 0x141   : > { %v543_v17 = vadd.f32 %v542_v16, %v464_v63  ;;  %v544_v18 = vpop.f32.mrb[1].mxu0  ;;  %v4527_v16 = vmov (!%p2301_p12), 0.0|0.0  }
 0x142   : > { %v545_v19 = vadd.f32 %v544_v18, %v468_v14  ;;  %2922 = vmatprep.subr.bf16.mxu1 (!%p2301_p12), %v4527_v16  ;;  %v4505_v18 = vmov (!%p2301_p12), 0.0  }
 0x143   : > { %650 = vst [vmem:[#allocation2] sm:$0xff] %v543_v17  ;;  %2924 = vmatpush3.bf16.msra.mxu1 (!%p2301_p12), %v3958_v12  ;;  %v3969_v17 = vpack.c.bf16 (!%p2301_p12), %v3819_v36, %v3810_v33  ;;  %792 = vmatprep.mubr.f32.mxu0 (!%p2301_p12), %v4505_v18 }
 0x144   : > { %651 = vst [vmem:[#allocation2 + $0x8] sm:$0xff] %v545_v19  ;;  %v548_v20 = vpop.f32.mrb[2].mxu0  ;;  %2925 = vmatprep.subr.bf16.mxu1 (!%p2301_p12), %v4527_v16  ;;  %2546 = vmatprep.mubr.msk.f32.mxu1 (!%p2301_p12), %vm3543_vm0, %v4505_v18  ;;  %v3978_v19 = vpack.c.bf16 (!%p2301_p12), %v3831_v40, %v3822_v37  ;;  %v4047_v18 = vpack.c.bf16 (!%p2301_p12), %v3924_v7, %v3915_v4  ;;  %v4573_v7 = vld [vmem:[#allocation35_spill] sm:$0xff] (!%p2301_p12)  ;;  %v4574_v4 = vld [vmem:[#allocation38_spill] sm:$0xff] (!%p2301_p12) }
 0x145   : > { %v549_v21 = vadd.f32 %v548_v20, %v464_v63  ;;  %v550_v22 = vpop.f32.mrb[3].mxu0  ;;  %v3983_v20 = vpack.c.bf16 (!%p2301_p12), %v3852_v47, %v3843_v44 }
 0x146   : > { %v551_v8 = vadd.f32 %v550_v22, %v468_v14  ;;  %v3994_v22 = vpack.c.bf16 (!%p2301_p12), %v3849_v46, %v3840_v43  ;;  %v726_v43 = vld [vmem:[#allocation2 + $0x10] sm:$0xff] (!%p2301_p12) }
 0x147   : > { %653 = vst [vmem:[#allocation2 + $0x18] sm:$0xff] %v549_v21  ;;  %2927 = vmatpush3.bf16.msra.mxu1 (!%p2301_p12), %v3969_v17  ;;  %v3988_v21 = vpack.c.bf16 (!%p2301_p12), %v3837_v42, %v3828_v39 }
 0x148   : > { %654 = vst [vmem:[#allocation2 + $0x20] sm:$0xff] %v551_v8  ;;  %v554_v23 = vpop.f32.mrb[4].mxu0  ;;  %2928 = vmatprep.subr.bf16.mxu1 (!%p2301_p12), %v4527_v16  ;;  %v3999_v8 = vpack.c.bf16 (!%p2301_p12), %v3870_v53, %v3861_v50  ;;  %v4576_v50 = vld [vmem:[#allocation39_spill] sm:$0xff] (!%p2301_p12) }
 0x149   : > { %v555_v5 = vadd.f32 %v554_v23, %v464_v63  ;;  %v556_v6 = vpop.f32.mrb[5].mxu0  ;;  %v4004_v23 = vpack.c.bf16 (!%p2301_p12), %v3855_v48, %v3846_v45 }
 0x14a   : > { %v557_v9 = vadd.f32 %v556_v6, %v468_v14  ;;  %720 = sbr.rel (%p2301_p12) target bundleno = 1399 (0x577), region = 48  ;;  %v4015_v6 = vpack.c.bf16 (!%p2301_p12), %v3888_v59, %v3879_v56 }
 0x14b   : > { %656 = vst [vmem:[#allocation2 + $0x30] sm:$0xff] %v555_v5  ;;  %2930 = vmatpush3.bf16.msra.mxu1 (!%p2301_p12), %v3988_v21  ;;  %v4010_v5 = vpack.c.bf16 (!%p2301_p12), %v3867_v52, %v3858_v49 }
 0x14c   : > { %657 = vst [vmem:[#allocation2 + $0x38] sm:$0xff] %v557_v9  ;;  %v560_v3 = vpop.f32.mrb[6].mxu0  ;;  %2931 = vmatprep.subr.bf16.mxu1 (!%p2301_p12), %v4527_v16  ;;  %v4020_v9 = vpack.c.bf16 (!%p2301_p12), %v3873_v54, %v3864_v51 }
 0x14d   : > { %v561_v2 = vadd.f32 %v560_v3, %v464_v63  ;;  %v562_v11 = vpop.f32.mrb[7].mxu0  ;;  %v3954_v63 = vpack.c.bf16 (!%p2301_p12), %v3813_v34, %v3804_v31  ;;  %v4026_v3 = vpack.c.bf16 (!%p2301_p12), %v3885_v58, %v3876_v55  ;;  %v4572_v58 = vld [vmem:[#allocation36_spill] sm:$0xff] (!%p2301_p12) }
 0x14e   : > { %v563_v13 = vadd.f32 %v562_v11, %v468_v14  ;;  %v3963_v14 = vpack.c.bf16 (!%p2301_p12), %v3834_v41, %v3825_v38  ;;  %v4036_v11 = vpack.c.bf16 (!%p2301_p12), %v3891_v60, %v3882_v57  ;;  %v4571_v57 = vld [vmem:[#allocation33_spill] sm:$0xff] (!%p2301_p12) }
 0x14f   : > { %659 = vst [vmem:[#allocation2 + $0x48] sm:$0xff] %v561_v2  ;;  %2897 = vmatpush1.bf16.msra.mxu0 (!%p2301_p12), %v3954_v63  ;;  %2933 = vmatpush3.bf16.msra.mxu1 (!%p2301_p12), %v4004_v23  ;;  %v4031_v2 = vpack.c.bf16 (!%p2301_p12), %v3906_v1, %v3897_v62  ;;  %v4569_v1 = vld [vmem:[#allocation29_spill] sm:$0xff] (!%p2301_p12)  ;;  %v4570_v62 = vld [vmem:[#allocation32_spill] sm:$0xff] (!%p2301_p12) }
 0x150   : > { %660 = vst [vmem:[#allocation2 + $0x50] sm:$0xff] %v563_v13  ;;  %2899 = vmatprep.subr.bf16.mxu0 (!%p2301_p12), %v3963_v14  ;;  %2934 = vmatprep.subr.bf16.mxu1 (!%p2301_p12), %v4527_v16  ;;  %v4042_v13 = vpack.c.bf16 (!%p2301_p12), %v3903_v0, %v3894_v61  ;;  %v4052_v60 = vpack.c.bf16 (!%p2301_p12), %v4570_v62, %v4569_v1  ;;  %v4068_v62 = vld [vmem:[#allocation3] sm:$0xff] (!%p2301_p12) }
 0x151   : > { %v4058_v0 = vpack.c.bf16 %v4572_v58, %v4571_v57  ;;  %v4064_v61 = vpack.c.bf16 %v4574_v4, %v4573_v7  ;;  %v4575_v57 = vmov 0.0   ;;  %v724_v58 = vld [vmem:[#allocation2] sm:$0xff]  ;;  %v725_v7 = vld [vmem:[#allocation2 + $0x8] sm:$0xff] }
 0x153   : > { %2901 = vmatpush1.bf16.msra.mxu0 %v3978_v19  ;;  %2936 = vmatpush3.bf16.msra.mxu1 %v4020_v9 }
 0x154   : > { %2903 = vmatprep.subr.bf16.mxu0 %v3983_v20  ;;  %2937 = vmatprep.subr.bf16.mxu1 %v4527_v16 }
 0x157   : > { %2905 = vmatpush1.bf16.msra.mxu0 %v3994_v22  ;;  %2939 = vmatpush3.bf16.msra.mxu1 %v4036_v11 }
 0x158   : > { %2907 = vmatprep.subr.bf16.mxu0 %v3999_v8  ;;  %2940 = vmatprep.subr.bf16.mxu1 %v4527_v16 }
 0x15b   : > { %2909 = vmatpush1.bf16.msra.mxu0 %v4010_v5  ;;  %2942 = vmatpush3.bf16.msra.mxu1 %v4052_v60 }
 0x15c   : > { %2911 = vmatprep.subr.bf16.mxu0 %v4015_v6  ;;  %2943 = vmatprep.subr.bf16.mxu1 %v4527_v16 }
 0x15f   : > { %2913 = vmatpush1.bf16.msra.mxu0 %v4026_v3  ;;  %2945 = vmatpush3.bf16.msra.mxu1 %v4064_v61 }
 0x160   : > { %2915 = vmatprep.subr.bf16.mxu0 %v4031_v2  ;;  %2978 = vmatprep.subr.bf16.mxu1 %v4527_v16 }
 0x162   : > { %2547 = vmatmul.mubr.f32.vlgmr.msra.gmra.mrb[0].mxu1 %v4068_v62 }
 0x163   : > { %2917 = vmatpush1.bf16.msra.mxu0 %v4042_v13  ;;  %2980 = vmatpush3.bf16.msra.mxu1 %v3958_v12 }
 0x164   : > { %2919 = vmatprep.subr.bf16.mxu0 %v4047_v18  ;;  %2581 = vmatprep.mubr.msk.f32.mxu1 %vm3543_vm0, %v4575_v57 }
 0x165   : > { %2981 = vmatprep.subr.bf16.mxu1 %v4527_v16 }
 0x167   : > { %2921 = vmatpush1.bf16.msra.mxu0 %v4058_v0  ;;  %2983 = vmatpush3.bf16.msra.mxu1 %v3969_v17 }
 0x168   : > { %2947 = vmatprep.subr.bf16.mxu0 %v3940_v15  ;;  %2984 = vmatprep.subr.bf16.mxu1 %v4527_v16 }
 0x16a   : > { %793 = vmatmul.mubr.f32.vlgmr.msra.gmra.mrb[0].mxu0 %v4068_v62 }
 0x16b   : > { %2949 = vmatpush1.bf16.msra.mxu0 %v3944_v24  ;;  %964 = vmatprep.mubr.f32.mxu0 %v4575_v57 }
 0x16c   : > { %2951 = vmatprep.subr.bf16.mxu0 %v3948_v10  ;;  %2986 = vmatpush3.bf16.msra.mxu1 %v3988_v21 }
 0x16d   : > { %2987 = vmatprep.subr.bf16.mxu1 %v4527_v16 }
 0x16f   : > { %2953 = vmatpush1.bf16.msra.mxu0 %v3954_v63 }
 0x170   : > { %2955 = vmatprep.subr.bf16.mxu0 %v3963_v14  ;;  %2989 = vmatpush3.bf16.msra.mxu1 %v4004_v23 }
 0x171   : > { %2990 = vmatprep.subr.bf16.mxu1 %v4527_v16 }
 0x173   : > { %2957 = vmatpush1.bf16.msra.mxu0 %v3978_v19 }
 0x174   : > { %2959 = vmatprep.subr.bf16.mxu0 %v3983_v20  ;;  %2992 = vmatpush3.bf16.msra.mxu1 %v4020_v9 }
 0x175   : > { %2993 = vmatprep.subr.bf16.mxu1 %v4527_v16 }
 0x177   : > { %2961 = vmatpush1.bf16.msra.mxu0 %v3994_v22 }
 0x178   : > { %2963 = vmatprep.subr.bf16.mxu0 %v3999_v8  ;;  %2995 = vmatpush3.bf16.msra.mxu1 %v4036_v11 }
 0x179   : > { %2996 = vmatprep.subr.bf16.mxu1 %v4527_v16 }
 0x17b   : > { %2965 = vmatpush1.bf16.msra.mxu0 %v4010_v5 }
 0x17c   : > { %2967 = vmatprep.subr.bf16.mxu0 %v4015_v6  ;;  %2998 = vmatpush3.bf16.msra.mxu1 %v4052_v60 }
 0x17d   : > { %2999 = vmatprep.subr.bf16.mxu1 %v4527_v16 }
 0x17f   : > { %2969 = vmatpush1.bf16.msra.mxu0 %v4026_v3 }
 0x180   : > { %2971 = vmatprep.subr.bf16.mxu0 %v4031_v2  ;;  %3001 = vmatpush3.bf16.msra.mxu1 %v4064_v61 }
 0x181   : > { %3034 = vmatprep.subr.bf16.mxu1 %v4527_v16 }
 0x183   : > { %2973 = vmatpush1.bf16.msra.mxu0 %v4042_v13 }
 0x184   : > { %2975 = vmatprep.subr.bf16.mxu0 %v4047_v18 }
 0x187   : > { %2977 = vmatpush1.bf16.msra.mxu0 %v4058_v0 }
 0x188   : > { %3003 = vmatprep.subr.bf16.mxu0 %v3940_v15 }
 0x235   : > { %v865_v54 = vpop.f32.mrb[0].mxu1 }
 0x236   : > { %v2548_v59 = vpop.f32.mrb[1].mxu1  ;;  %v883_v16 = vadd.f32 %v4576_v50, %v865_v54 }
 0x23d   : > { %v794_v1 = vpop.f32.mrb[0].mxu0 }
 0x23e   : > { %v869_v4 = vadd.f32 %v794_v1, %v724_v58  ;;  %v796_v55 = vpop.f32.mrb[1].mxu0 }
 0x23f   : > { %v876_v56 = vadd.f32 %v796_v55, %v725_v7 }
 0x240   : > { %v2302_v51 = vmul.f32 -1.442695, %v869_v4 }
 0x241   : > { %v2303_v52 = vmul.f32 -1.442695, %v876_v56 }
 0x242   : > { %3404 = vpow2.f32 %v2302_v51 }
 0x243   : > { %3406 = vpow2.f32 %v2303_v52 }
 0x24c   : > { %v3405_v49 = vpop.eup %3404 }
 0x24d   : > { %v873_v48 = vadd.f32 1.0, %v3405_v49  ;;  %v3407_v45 = vpop.eup %3406 }
 0x24e   : > { %v880_v53 = vadd.f32 1.0, %v3407_v45  ;;  %v896_v45 = vld [vmem:[#allocation2 + $0x18] sm:$0xff] }
 0x24f   : > { %3408 = vrcp.f32 %v873_v48 }
 0x250   : > { %3410 = vrcp.f32 %v880_v53  ;;  %v897_v53 = vld [vmem:[#allocation2 + $0x20] sm:$0xff] }
 0x259   : > { %v3409_v46 = vpop.eup %3408 }
 0x25a   : > { %v884_v58 = vmul.f32 %v3409_v46, %v883_v16  ;;  %v3411_v4 = vpop.eup %3410 }
 0x25b   : > { %v887_v59 = vsub.f32 1.0, %v3411_v4  ;;  %v889_v51 = vmul.f32 %v3411_v4, %v4068_v62 }
 0x25c   : > { %v885_v1 = vadd.f32 %v884_v58, %v726_v43  ;;  %v4577_v43 = vmov 0.0|0.0  }
 0x25e   : > { %3412 = vtanh.f32 %v885_v1 }
 0x268   : > { %v3413_v55 = vpop.eup %3412 }
 0x269   : > { %v888_v52 = vmul.f32 %v3413_v55, %v887_v59 }
 0x26b   : > { %v4112_v56 = vadd.f32 %v889_v51, %v888_v52  ;;  %v898_v52 = vld [vmem:[#allocation2 + $0x28] sm:$0xff] }
 0x26d   : > { %892 = vst [vmem:[%s3678_s12] sm:$0xff] %v4112_v56  ;;  %965 = vmatmul.mubr.f32.vlgmr.msra.gmra.mrb[2].mxu0 %v4112_v56  ;;  %2582 = vmatmul.mubr.f32.vlgmr.msra.gmra.mrb[2].mxu1 %v4112_v56 }
 0x26e   : > { %3005 = vmatpush1.bf16.msra.mxu0 %v3944_v24  ;;  %3036 = vmatpush3.bf16.msra.mxu1 %v3958_v12 }
 0x26f   : > { %3007 = vmatprep.subr.bf16.mxu0 %v3948_v10  ;;  %3037 = vmatprep.subr.bf16.mxu1 %v4577_v43 }
 0x270   : > { %1137 = vmatprep.mubr.f32.mxu0 %v4575_v57  ;;  %2616 = vmatprep.mubr.msk.f32.mxu1 %vm3543_vm0, %v4575_v57 }
 0x272   : > { %3009 = vmatpush1.bf16.msra.mxu0 %v3954_v63  ;;  %3039 = vmatpush3.bf16.msra.mxu1 %v3969_v17 }
 0x273   : > { %3011 = vmatprep.subr.bf16.mxu0 %v3963_v14  ;;  %3040 = vmatprep.subr.bf16.mxu1 %v4577_v43 }
 0x276   : > { %3013 = vmatpush1.bf16.msra.mxu0 %v3978_v19  ;;  %3042 = vmatpush3.bf16.msra.mxu1 %v3988_v21 }
 0x277   : > { %3015 = vmatprep.subr.bf16.mxu0 %v3983_v20  ;;  %3043 = vmatprep.subr.bf16.mxu1 %v4577_v43 }
 0x27a   : > { %3017 = vmatpush1.bf16.msra.mxu0 %v3994_v22  ;;  %3045 = vmatpush3.bf16.msra.mxu1 %v4004_v23 }
 0x27b   : > { %3019 = vmatprep.subr.bf16.mxu0 %v3999_v8  ;;  %3046 = vmatprep.subr.bf16.mxu1 %v4577_v43 }
 0x27e   : > { %3021 = vmatpush1.bf16.msra.mxu0 %v4010_v5  ;;  %3048 = vmatpush3.bf16.msra.mxu1 %v4020_v9 }
 0x27f   : > { %3023 = vmatprep.subr.bf16.mxu0 %v4015_v6  ;;  %3049 = vmatprep.subr.bf16.mxu1 %v4577_v43 }
 0x282   : > { %3025 = vmatpush1.bf16.msra.mxu0 %v4026_v3  ;;  %3051 = vmatpush3.bf16.msra.mxu1 %v4036_v11 }
 0x283   : > { %3027 = vmatprep.subr.bf16.mxu0 %v4031_v2  ;;  %3052 = vmatprep.subr.bf16.mxu1 %v4577_v43 }
 0x286   : > { %3029 = vmatpush1.bf16.msra.mxu0 %v4042_v13  ;;  %3054 = vmatpush3.bf16.msra.mxu1 %v4052_v60 }
 0x287   : > { %3031 = vmatprep.subr.bf16.mxu0 %v4047_v18  ;;  %3055 = vmatprep.subr.bf16.mxu1 %v4577_v43 }
 0x28a   : > { %3033 = vmatpush1.bf16.msra.mxu0 %v4058_v0  ;;  %3057 = vmatpush3.bf16.msra.mxu1 %v4064_v61 }
 0x28b   : > { %3059 = vmatprep.subr.bf16.mxu0 %v3940_v15  ;;  %3090 = vmatprep.subr.bf16.mxu1 %v4577_v43 }
 0x340   : > { %v966_v46 = vpop.f32.mrb[2].mxu0  ;;  %v1037_v48 = vpop.f32.mrb[2].mxu1 }
 0x341   : > { %v1041_v49 = vadd.f32 %v966_v46, %v896_v45  ;;  %v968_v54 = vpop.f32.mrb[3].mxu0  ;;  %v2583_v16 = vpop.f32.mrb[3].mxu1  ;;  %v1055_v55 = vadd.f32 %v4576_v50, %v1037_v48 }
 0x342   : > { %v1048_v7 = vadd.f32 %v968_v54, %v897_v53 }
 0x343   : > { %v2304_v62 = vmul.f32 -1.442695, %v1041_v49 }
 0x344   : > { %v2305_v58 = vmul.f32 -1.442695, %v1048_v7 }
 0x345   : > { %3414 = vpow2.f32 %v2304_v62 }
 0x346   : > { %3416 = vpow2.f32 %v2305_v58  ;;  %v1243_v58 = vld [vmem:[#allocation2 + $0x50] sm:$0xff] }
 0x34f   : > { %v3415_v1 = vpop.eup %3414 }
 0x350   : > { %v1045_v4 = vadd.f32 1.0, %v3415_v1  ;;  %v3417_v59 = vpop.eup %3416 }
 0x351   : > { %v1052_v15 = vadd.f32 1.0, %v3417_v59 }
 0x352   : > { %3418 = vrcp.f32 %v1045_v4 }
 0x353   : > { %3420 = vrcp.f32 %v1052_v15 }
 0x35c   : > { %v3419_v51 = vpop.eup %3418 }
 0x35d   : > { %v1056_v42 = vmul.f32 %v3419_v51, %v1055_v55  ;;  %v3421_v46 = vpop.eup %3420 }
 0x35e   : > { %v1059_v49 = vsub.f32 1.0, %v3421_v46  ;;  %v1061_v16 = vmul.f32 %v3421_v46, %v4112_v56  ;;  %v1242_v56 = vld [vmem:[#allocation2 + $0x48] sm:$0xff] }
 0x35f   : > { %v1057_v45 = vadd.f32 %v1056_v42, %v898_v52  ;;  %v1069_v42 = vld [vmem:[#allocation2 + $0x30] sm:$0xff] }
 0x361   : > { %3422 = vtanh.f32 %v1057_v45 }
 0x36b   : > { %v3423_v53 = vpop.eup %3422 }
 0x36c   : > { %v1060_v54 = vmul.f32 %v3423_v53, %v1059_v49 }
 0x36e   : > { %v4155_v62 = vadd.f32 %v1061_v16, %v1060_v54  ;;  %v1244_v54 = vld [vmem:[#allocation2 + $0x58] sm:$0xff] }
 0x370   : > { %2306 = vst [vmem:[%s3678_s12 + $0x8] sm:$0xff] %v4155_v62  ;;  %1138 = vmatmul.mubr.f32.vlgmr.msra.gmra.mrb[4].mxu0 %v4155_v62  ;;  %2617 = vmatmul.mubr.f32.vlgmr.msra.gmra.mrb[4].mxu1 %v4155_v62 }
 0x371   : > { %3061 = vmatpush1.bf16.msra.mxu0 %v3944_v24  ;;  %3092 = vmatpush3.bf16.msra.mxu1 %v3958_v12  ;;  %v1070_v12 = vld [vmem:[#allocation2 + $0x38] sm:$0xff] }
 0x372   : > { %3063 = vmatprep.subr.bf16.mxu0 %v3948_v10  ;;  %3093 = vmatprep.subr.bf16.mxu1 %v4577_v43 }
 0x373   : > { %1310 = vmatprep.mubr.f32.mxu0 %v4575_v57  ;;  %2651 = vmatprep.mubr.msk.f32.mxu1 %vm3543_vm0, %v4575_v57 }
 0x375   : > { %3065 = vmatpush1.bf16.msra.mxu0 %v3954_v63  ;;  %3095 = vmatpush3.bf16.msra.mxu1 %v3969_v17 }
 0x376   : > { %3067 = vmatprep.subr.bf16.mxu0 %v3963_v14  ;;  %3096 = vmatprep.subr.bf16.mxu1 %v4577_v43 }
 0x379   : > { %3069 = vmatpush1.bf16.msra.mxu0 %v3978_v19  ;;  %3098 = vmatpush3.bf16.msra.mxu1 %v3988_v21 }
 0x37a   : > { %3071 = vmatprep.subr.bf16.mxu0 %v3983_v20  ;;  %3099 = vmatprep.subr.bf16.mxu1 %v4577_v43 }
 0x37d   : > { %3073 = vmatpush1.bf16.msra.mxu0 %v3994_v22  ;;  %3101 = vmatpush3.bf16.msra.mxu1 %v4004_v23  ;;  %v1071_v23 = vld [vmem:[#allocation2 + $0x40] sm:$0xff] }
 0x37e   : > { %3075 = vmatprep.subr.bf16.mxu0 %v3999_v8  ;;  %3102 = vmatprep.subr.bf16.mxu1 %v4577_v43 }
 0x381   : > { %3077 = vmatpush1.bf16.msra.mxu0 %v4010_v5  ;;  %3104 = vmatpush3.bf16.msra.mxu1 %v4020_v9 }
 0x382   : > { %3079 = vmatprep.subr.bf16.mxu0 %v4015_v6  ;;  %3105 = vmatprep.subr.bf16.mxu1 %v4577_v43 }
 0x385   : > { %3081 = vmatpush1.bf16.msra.mxu0 %v4026_v3  ;;  %3107 = vmatpush3.bf16.msra.mxu1 %v4036_v11 }
 0x386   : > { %3083 = vmatprep.subr.bf16.mxu0 %v4031_v2  ;;  %3108 = vmatprep.subr.bf16.mxu1 %v4577_v43 }
 0x389   : > { %3085 = vmatpush1.bf16.msra.mxu0 %v4042_v13  ;;  %3110 = vmatpush3.bf16.msra.mxu1 %v4052_v60 }
 0x38a   : > { %3087 = vmatprep.subr.bf16.mxu0 %v4047_v18  ;;  %3111 = vmatprep.subr.bf16.mxu1 %v4577_v43 }
 0x38d   : > { %3089 = vmatpush1.bf16.msra.mxu0 %v4058_v0  ;;  %3113 = vmatpush3.bf16.msra.mxu1 %v4064_v61 }
 0x443   : > { %v1139_v24 = vpop.f32.mrb[4].mxu0  ;;  %v1210_v10 = vpop.f32.mrb[4].mxu1 }
 0x444   : > { %v1214_v63 = vadd.f32 %v1139_v24, %v1069_v42  ;;  %v1141_v14 = vpop.f32.mrb[5].mxu0  ;;  %v2618_v17 = vpop.f32.mrb[5].mxu1  ;;  %v1228_v61 = vadd.f32 %v4576_v50, %v1210_v10 }
 0x445   : > { %v1221_v20 = vadd.f32 %v1141_v14, %v1070_v12 }
 0x446   : > { %v2307_v19 = vmul.f32 -1.442695, %v1214_v63 }
 0x447   : > { %v2308_v21 = vmul.f32 -1.442695, %v1221_v20 }
 0x448   : > { %3424 = vpow2.f32 %v2307_v19 }
 0x449   : > { %3426 = vpow2.f32 %v2308_v21 }
 0x452   : > { %v3425_v60 = vpop.eup %3424 }
 0x453   : > { %v1218_v18 = vadd.f32 1.0, %v3425_v60  ;;  %v3427_v22 = vpop.eup %3426 }
 0x454   : > { %v1225_v0 = vadd.f32 1.0, %v3427_v22 }
 0x455   : > { %3428 = vrcp.f32 %v1218_v18 }
 0x456   : > { %3430 = vrcp.f32 %v1225_v0 }
 0x45f   : > { %v3429_v8 = vpop.eup %3428 }
 0x460   : > { %v1229_v5 = vmul.f32 %v3429_v8, %v1228_v61  ;;  %v3431_v9 = vpop.eup %3430 }
 0x461   : > { %v1232_v3 = vsub.f32 1.0, %v3431_v9  ;;  %v1234_v13 = vmul.f32 %v3431_v9, %v4155_v62 }
 0x462   : > { %v1230_v6 = vadd.f32 %v1229_v5, %v1071_v23 }
 0x464   : > { %3432 = vtanh.f32 %v1230_v6 }
 0x46e   : > { %v3433_v2 = vpop.eup %3432 }
 0x46f   : > { %v1233_v11 = vmul.f32 %v3433_v2, %v1232_v3 }
 0x471   : > { %v1235_v57 = vadd.f32 %v1234_v13, %v1233_v11 }
 0x473   : > { %2309 = vst [vmem:[%s3678_s12 + $0x10] sm:$0xff] %v1235_v57  ;;  %1311 = vmatmul.mubr.f32.vlgmr.msra.gmra.mrb[6].mxu0 %v1235_v57  ;;  %2652 = vmatmul.mubr.f32.vlgmr.msra.gmra.mrb[6].mxu1 %v1235_v57 }
 0x546   : > { %v1312_v43 = vpop.f32.mrb[6].mxu0  ;;  %v1383_v48 = vpop.f32.mrb[6].mxu1 }
 0x547   : > { %v1387_v7 = vadd.f32 %v1312_v43, %v1242_v56  ;;  %v1314_v1 = vpop.f32.mrb[7].mxu0  ;;  %v2653_v4 = vpop.f32.mrb[7].mxu1  ;;  %v1401_v49 = vadd.f32 %v4576_v50, %v1383_v48 }
 0x548   : > { %v1394_v15 = vadd.f32 %v1314_v1, %v1243_v58 }
 0x549   : > { %v2310_v59 = vmul.f32 -1.442695, %v1387_v7 }
 0x54a   : > { %v2311_v55 = vmul.f32 -1.442695, %v1394_v15 }
 0x54b   : > { %3434 = vpow2.f32 %v2310_v59 }
 0x54c   : > { %3436 = vpow2.f32 %v2311_v55 }
 0x555   : > { %v3435_v51 = vpop.eup %3434 }
 0x556   : > { %v1391_v52 = vadd.f32 1.0, %v3435_v51  ;;  %v3437_v45 = vpop.eup %3436 }
 0x557   : > { %v1398_v46 = vadd.f32 1.0, %v3437_v45 }
 0x558   : > { %3438 = vrcp.f32 %v1391_v52 }
 0x559   : > { %3440 = vrcp.f32 %v1398_v46 }
 0x562   : > { %v3439_v53 = vpop.eup %3438 }
 0x563   : > { %v1402_v16 = vmul.f32 %v3439_v53, %v1401_v49  ;;  %v3441_v42 = vpop.eup %3440 }
 0x564   : > { %v1405_v24 = vsub.f32 1.0, %v3441_v42  ;;  %v1407_v12 = vmul.f32 %v3441_v42, %v1235_v57 }
 0x565   : > { %v1403_v62 = vadd.f32 %v1402_v16, %v1244_v54 }
 0x567   : > { %3442 = vtanh.f32 %v1403_v62 }
 0x571   : > { %v3443_v10 = vpop.eup %3442 }
 0x572   : > { %v1406_v63 = vmul.f32 %v3443_v10, %v1405_v24 }
 0x574   : > { %v1408_v14 = vadd.f32 %v1407_v12, %v1406_v63 }
 0x576   : > { %1409 = vst [vmem:[#allocation3] sm:$0xff] %v1408_v14  ;;  %2312 = vst [vmem:[%s3678_s12 + $0x18] sm:$0xff] %v1408_v14 }
 0x577 PF: > { %p2313_p13 = scmp.ne.s32.totalorder %s3526_s21, 1 }
 0x578   : > { %v4202_v50 = vpack.c.bf16 (!%p2313_p13), %v3798_v29, %v3789_v26  ;;  %v4206_v17 = vpack.c.bf16 (!%p2313_p13), %v3795_v28, %v3786_v25  ;;  %v4210_v19 = vpack.c.bf16 (!%p2313_p13), %v3816_v35, %v3807_v32  ;;  %v4216_v20 = vpack.c.bf16 (!%p2313_p13), %v3813_v34, %v3804_v31  ;;  %v4578_v32 = vld [vmem:[#allocation10_spill] sm:$0xff] (!%p2313_p13)  ;;  %v4579_v34 = vld [vmem:[#allocation11_spill] sm:$0xff] (!%p2313_p13)  ;;  %v4580_v35 = vld [vmem:[#allocation13_spill] sm:$0xff] (!%p2313_p13) }
 0x579   : > { %1415 = sbr.rel (%p2313_p13) target bundleno = 2471 (0x9a7), region = 52  ;;  %v4220_v26 = vpack.c.bf16 (!%p2313_p13), %v3801_v30, %v3792_v27  ;;  %v4225_v25 = vpack.c.bf16 (!%p2313_p13), %v3834_v41, %v3825_v38  ;;  %v3544_v28 = vmov (!%p2313_p13), 0.0|0.0   ;;  %v4231_v29 = vpack.c.bf16 (!%p2313_p13), %v3819_v36, %v3810_v33  ;;  %v4582_v38 = vld [vmem:[#allocation19_spill] sm:$0xff] (!%p2313_p13)  ;;  %v4583_v41 = vld [vmem:[#allocation12_spill] sm:$0xff] (!%p2313_p13)  ;;  %v4586_v21 = vld [vmem:[#allocation18_spill] sm:$0xff] (!%p2313_p13) }
 0x57a   : > { %3115 = vmatprep.subr.bf16.mxu0 (!%p2313_p13), %v4202_v50  ;;  %3146 = vmatprep.subr.bf16.mxu1 (!%p2313_p13), %v3544_v28  ;;  %v3545_v31 = vmov (!%p2313_p13), 0.0   ;;  %vm3546_vm1 = vmmov (!%p2313_p13), 0   ;;  %v4240_v27 = vpack.c.bf16 (!%p2313_p13), %v3831_v40, %v3822_v37  ;;  %v4245_v30 = vpack.c.bf16 (!%p2313_p13), %v3852_v47, %v3843_v44  ;;  %v4581_v37 = vld [vmem:[#allocation16_spill] sm:$0xff] (!%p2313_p13)  ;;  %v4584_v44 = vld [vmem:[#allocation14_spill] sm:$0xff] (!%p2313_p13)  ;;  %v4585_v47 = vld [vmem:[#allocation15_spill] sm:$0xff] (!%p2313_p13) }
 0x57b   : > { %3117 = vmatpush1.bf16.msra.mxu0 (!%p2313_p13), %v4206_v17  ;;  %3148 = vmatpush3.bf16.msra.mxu1 (!%p2313_p13), %v4220_v26  ;;  %v4250_v33 = vpack.c.bf16 (!%p2313_p13), %v4578_v32, %v3828_v39  ;;  %v4256_v36 = vpack.c.bf16 (!%p2313_p13), %v4580_v35, %v4579_v34  ;;  %v4261_v40 = vpack.c.bf16 (!%p2313_p13), %v4582_v38, %v4581_v37  ;;  %v4587_v18 = vld [vmem:[#allocation22_spill] sm:$0xff] (!%p2313_p13)  ;;  %v4588_v22 = vld [vmem:[#allocation25_spill] sm:$0xff] (!%p2313_p13)  ;;  %v4590_v8 = vld [vmem:[#allocation20_spill] sm:$0xff] (!%p2313_p13) }
 0x57c   : > { %3119 = vmatprep.subr.bf16.mxu0 (!%p2313_p13), %v4210_v19  ;;  %1487 = vmatprep.mubr.f32.mxu0 (!%p2313_p13), %v3545_v31  ;;  %v4266_v39 = vpack.c.bf16 (!%p2313_p13), %v4584_v44, %v4583_v41  ;;  %v4272_v60 = vpack.c.bf16 (!%p2313_p13), %v4586_v21, %v4585_v47  ;;  %v4277_v0 = vpack.c.bf16 (!%p2313_p13), %v4588_v22, %v4587_v18  ;;  %v4589_v61 = vld [vmem:[#allocation17_spill] sm:$0xff] (!%p2313_p13)  ;;  %v4592_v6 = vld [vmem:[#allocation24_spill] sm:$0xff] (!%p2313_p13)  ;;  %v4594_v2 = vld [vmem:[#allocation31_spill] sm:$0xff] (!%p2313_p13) }
 0x57d   : > { %3149 = vmatprep.subr.bf16.mxu1 (!%p2313_p13), %v3544_v28  ;;  %2686 = vmatprep.mubr.msk.f32.mxu1 (!%p2313_p13), %vm3546_vm1, %v3545_v31  ;;  %v4282_v23 = vpack.c.bf16 (!%p2313_p13), %v4590_v8, %v4589_v61  ;;  %v4591_v5 = vld [vmem:[#allocation21_spill] sm:$0xff] (!%p2313_p13)  ;;  %v4593_v3 = vld [vmem:[#allocation28_spill] sm:$0xff] (!%p2313_p13)  ;;  %v4595_v13 = vld [vmem:[#allocation23_spill] sm:$0xff] (!%p2313_p13) }
 0x57e   : > { %v4288_v9 = vpack.c.bf16 (!%p2313_p13), %v4592_v6, %v4591_v5  ;;  %v4293_v11 = vpack.c.bf16 (!%p2313_p13), %v4594_v2, %v4593_v3  ;;  %v4596_v57 = vld [vmem:[#allocation26_spill] sm:$0xff] (!%p2313_p13)  ;;  %v4597_v43 = vld [vmem:[#allocation27_spill] sm:$0xff] (!%p2313_p13)  ;;  %v4600_v1 = vld [vmem:[#allocation37_spill] sm:$0xff] (!%p2313_p13) }
 0x57f   : > { %3121 = vmatpush1.bf16.msra.mxu0 (!%p2313_p13), %v4216_v20  ;;  %3151 = vmatpush3.bf16.msra.mxu1 (!%p2313_p13), %v4231_v29  ;;  %v4298_v56 = vpack.c.bf16 (!%p2313_p13), %v4596_v57, %v4595_v13  ;;  %v4598_v48 = vld [vmem:[#allocation30_spill] sm:$0xff] (!%p2313_p13)  ;;  %v4601_v59 = vld [vmem:[#allocation29_spill] sm:$0xff] (!%p2313_p13)  ;;  %v4602_v15 = vld [vmem:[#allocation32_spill] sm:$0xff] (!%p2313_p13) }
 0x580   : > { %3123 = vmatprep.subr.bf16.mxu0 %v4225_v25  ;;  %3152 = vmatprep.subr.bf16.mxu1 %v3544_v28  ;;  %v4304_v7 = vpack.c.bf16 %v4598_v48, %v4597_v43  ;;  %v4599_v58 = vld [vmem:[#allocation34_spill] sm:$0xff]  ;;  %v4314_v55 = vpack.c.bf16 %v4602_v15, %v4601_v59  ;;  %v4603_v51 = vld [vmem:[#allocation33_spill] sm:$0xff]  ;;  %v4604_v52 = vld [vmem:[#allocation36_spill] sm:$0xff] }
 0x581   : > { %v4309_v4 = vpack.c.bf16 %v4600_v1, %v4599_v58  ;;  %v4320_v45 = vpack.c.bf16 %v4604_v52, %v4603_v51  ;;  %v4605_v46 = vld [vmem:[#allocation35_spill] sm:$0xff]  ;;  %v4606_v49 = vld [vmem:[#allocation38_spill] sm:$0xff]  ;;  %v4330_v54 = vld [vmem:[#allocation3] sm:$0xff] }
 0x582   : > { %v4326_v53 = vpack.c.bf16 %v4606_v49, %v4605_v46  ;;  %v1419_v16 = vld [vmem:[#allocation2 + $0x48] sm:$0xff]  ;;  %v1420_v24 = vld [vmem:[#allocation2 + $0x50] sm:$0xff]  ;;  %v1421_v18 = vld [vmem:[#allocation2 + $0x58] sm:$0xff] }
 0x583   : > { %3125 = vmatpush1.bf16.msra.mxu0 %v4240_v27  ;;  %3154 = vmatpush3.bf16.msra.mxu1 %v4250_v33  ;;  %v4607_v44 = vld [vmem:[#allocation39_spill] sm:$0xff]  ;;  %v1593_v1 = vld [vmem:[#allocation2 + $0x38] sm:$0xff] }
 0x584   : > { %3127 = vmatprep.subr.bf16.mxu0 %v4245_v30  ;;  %3155 = vmatprep.subr.bf16.mxu1 %v3544_v28  ;;  %v1592_v57 = vld [vmem:[#allocation2 + $0x30] sm:$0xff] }
 0x587   : > { %3129 = vmatpush1.bf16.msra.mxu0 %v4256_v36  ;;  %3157 = vmatpush3.bf16.msra.mxu1 %v4266_v39 }
 0x588   : > { %3131 = vmatprep.subr.bf16.mxu0 %v4261_v40  ;;  %3158 = vmatprep.subr.bf16.mxu1 %v3544_v28 }
 0x58b   : > { %3133 = vmatpush1.bf16.msra.mxu0 %v4272_v60  ;;  %3160 = vmatpush3.bf16.msra.mxu1 %v4282_v23 }
 0x58c   : > { %3135 = vmatprep.subr.bf16.mxu0 %v4277_v0  ;;  %3161 = vmatprep.subr.bf16.mxu1 %v3544_v28 }
 0x58f   : > { %3137 = vmatpush1.bf16.msra.mxu0 %v4288_v9  ;;  %3163 = vmatpush3.bf16.msra.mxu1 %v4298_v56 }
 0x590   : > { %3139 = vmatprep.subr.bf16.mxu0 %v4293_v11  ;;  %3164 = vmatprep.subr.bf16.mxu1 %v3544_v28 }
 0x593   : > { %3141 = vmatpush1.bf16.msra.mxu0 %v4304_v7  ;;  %3166 = vmatpush3.bf16.msra.mxu1 %v4314_v55 }
 0x594   : > { %3143 = vmatprep.subr.bf16.mxu0 %v4309_v4  ;;  %3167 = vmatprep.subr.bf16.mxu1 %v3544_v28 }
 0x597   : > { %3145 = vmatpush1.bf16.msra.mxu0 %v4320_v45  ;;  %3169 = vmatpush3.bf16.msra.mxu1 %v4326_v53 }
 0x598   : > { %3171 = vmatprep.subr.bf16.mxu0 %v4202_v50  ;;  %3202 = vmatprep.subr.bf16.mxu1 %v3544_v28 }
 0x59a   : > { %1488 = vmatmul.mubr.f32.vlgmr.msra.gmra.mrb[0].mxu0 %v4330_v54  ;;  %2687 = vmatmul.mubr.f32.vlgmr.msra.gmra.mrb[0].mxu1 %v4330_v54 }
 0x59b   : > { %3173 = vmatpush1.bf16.msra.mxu0 %v4206_v17  ;;  %1660 = vmatprep.mubr.f32.mxu0 %v3545_v31 }
 0x59c   : > { %3175 = vmatprep.subr.bf16.mxu0 %v4210_v19  ;;  %3204 = vmatpush3.bf16.msra.mxu1 %v4220_v26 }
 0x59d   : > { %2721 = vmatprep.mubr.msk.f32.mxu1 %vm3546_vm1, %v3545_v31  ;;  %3205 = vmatprep.subr.bf16.mxu1 %v3544_v28 }
 0x59f   : > { %3177 = vmatpush1.bf16.msra.mxu0 %v4216_v20 }
 0x5a0   : > { %3179 = vmatprep.subr.bf16.mxu0 %v4225_v25  ;;  %3207 = vmatpush3.bf16.msra.mxu1 %v4231_v29 }
 0x5a1   : > { %3208 = vmatprep.subr.bf16.mxu1 %v3544_v28 }
 0x5a3   : > { %3181 = vmatpush1.bf16.msra.mxu0 %v4240_v27 }
 0x5a4   : > { %3183 = vmatprep.subr.bf16.mxu0 %v4245_v30  ;;  %3210 = vmatpush3.bf16.msra.mxu1 %v4250_v33 }
 0x5a5   : > { %3211 = vmatprep.subr.bf16.mxu1 %v3544_v28 }
 0x5a7   : > { %3185 = vmatpush1.bf16.msra.mxu0 %v4256_v36 }
 0x5a8   : > { %3187 = vmatprep.subr.bf16.mxu0 %v4261_v40  ;;  %3213 = vmatpush3.bf16.msra.mxu1 %v4266_v39 }
 0x5a9   : > { %3214 = vmatprep.subr.bf16.mxu1 %v3544_v28 }
 0x5ab   : > { %3189 = vmatpush1.bf16.msra.mxu0 %v4272_v60 }
 0x5ac   : > { %3191 = vmatprep.subr.bf16.mxu0 %v4277_v0  ;;  %3216 = vmatpush3.bf16.msra.mxu1 %v4282_v23 }
 0x5ad   : > { %3217 = vmatprep.subr.bf16.mxu1 %v3544_v28 }
 0x5af   : > { %3193 = vmatpush1.bf16.msra.mxu0 %v4288_v9 }
 0x5b0   : > { %3195 = vmatprep.subr.bf16.mxu0 %v4293_v11  ;;  %3219 = vmatpush3.bf16.msra.mxu1 %v4298_v56 }
 0x5b1   : > { %3220 = vmatprep.subr.bf16.mxu1 %v3544_v28 }
 0x5b3   : > { %3197 = vmatpush1.bf16.msra.mxu0 %v4304_v7 }
 0x5b4   : > { %3199 = vmatprep.subr.bf16.mxu0 %v4309_v4  ;;  %3222 = vmatpush3.bf16.msra.mxu1 %v4314_v55 }
 0x5b5   : > { %3223 = vmatprep.subr.bf16.mxu1 %v3544_v28 }
 0x5b7   : > { %3201 = vmatpush1.bf16.msra.mxu0 %v4320_v45 }
 0x5b8   : > { %3227 = vmatprep.subr.bf16.mxu0 %v4202_v50  ;;  %3225 = vmatpush3.bf16.msra.mxu1 %v4326_v53 }
 0x5b9   : > { %3258 = vmatprep.subr.bf16.mxu1 %v3544_v28 }
 0x66d   : > { %v1489_v62 = vpop.f32.mrb[0].mxu0  ;;  %v1560_v63 = vpop.f32.mrb[0].mxu1 }
 0x66e   : > { %v1564_v42 = vadd.f32 %v1489_v62, %v1419_v16  ;;  %v1491_v10 = vpop.f32.mrb[1].mxu0  ;;  %v2688_v14 = vpop.f32.mrb[1].mxu1  ;;  %v1578_v47 = vadd.f32 %v4607_v44, %v1560_v63 }
 0x66f   : > { %v1571_v32 = vadd.f32 %v1491_v10, %v1420_v24  ;;  %v1594_v24 = vld [vmem:[#allocation2 + $0x40] sm:$0xff] }
 0x670   : > { %v2314_v12 = vmul.f32 -1.442695, %v1564_v42 }
 0x671   : > { %v2315_v34 = vmul.f32 -1.442695, %v1571_v32 }
 0x672   : > { %3444 = vpow2.f32 %v2314_v12 }
 0x673   : > { %3446 = vpow2.f32 %v2315_v34 }
 0x67c   : > { %v3445_v35 = vpop.eup %3444 }
 0x67d   : > { %v1568_v37 = vadd.f32 1.0, %v3445_v35  ;;  %v3447_v38 = vpop.eup %3446 }
 0x67e   : > { %v1575_v41 = vadd.f32 1.0, %v3447_v38  ;;  %v1938_v38 = vld [vmem:[#allocation2] sm:$0xff] }
 0x67f   : > { %3448 = vrcp.f32 %v1568_v37 }
 0x680   : > { %3450 = vrcp.f32 %v1575_v41 }
 0x689   : > { %v3449_v21 = vpop.eup %3448 }
 0x68a   : > { %v1579_v22 = vmul.f32 %v3449_v21, %v1578_v47  ;;  %v3451_v8 = vpop.eup %3450 }
 0x68b   : > { %v1582_v5 = vsub.f32 1.0, %v3451_v8  ;;  %v1584_v3 = vmul.f32 %v3451_v8, %v4330_v54 }
 0x68c   : > { %v1580_v61 = vadd.f32 %v1579_v22, %v1421_v18  ;;  %v1939_v18 = vld [vmem:[#allocation2 + $0x8] sm:$0xff] }
 0x68e   : > { %3452 = vtanh.f32 %v1580_v61 }
 0x698   : > { %v3453_v6 = vpop.eup %3452 }
 0x699   : > { %v1583_v2 = vmul.f32 %v3453_v6, %v1582_v5 }
 0x69b   : > { %v4374_v13 = vadd.f32 %v1584_v3, %v1583_v2 }
 0x69d   : > { %2316 = vst [vmem:[%s3678_s12 + $0x18] sm:$0xff] %v4374_v13  ;;  %1661 = vmatmul.mubr.f32.vlgmr.msra.gmra.mrb[2].mxu0 %v4374_v13  ;;  %2722 = vmatmul.mubr.f32.vlgmr.msra.gmra.mrb[2].mxu1 %v4374_v13 }
 0x69e   : > { %3229 = vmatpush1.bf16.msra.mxu0 %v4206_v17  ;;  %3260 = vmatpush3.bf16.msra.mxu1 %v4220_v26 }
 0x69f   : > { %3231 = vmatprep.subr.bf16.mxu0 %v4210_v19  ;;  %3261 = vmatprep.subr.bf16.mxu1 %v3544_v28 }
 0x6a0   : > { %1833 = vmatprep.mubr.f32.mxu0 %v3545_v31  ;;  %2756 = vmatprep.mubr.msk.f32.mxu1 %vm3546_vm1, %v3545_v31 }
 0x6a2   : > { %3233 = vmatpush1.bf16.msra.mxu0 %v4216_v20  ;;  %3263 = vmatpush3.bf16.msra.mxu1 %v4231_v29 }
 0x6a3   : > { %3235 = vmatprep.subr.bf16.mxu0 %v4225_v25  ;;  %3264 = vmatprep.subr.bf16.mxu1 %v3544_v28 }
 0x6a6   : > { %3237 = vmatpush1.bf16.msra.mxu0 %v4240_v27  ;;  %3266 = vmatpush3.bf16.msra.mxu1 %v4250_v33 }
 0x6a7   : > { %3239 = vmatprep.subr.bf16.mxu0 %v4245_v30  ;;  %3267 = vmatprep.subr.bf16.mxu1 %v3544_v28 }
 0x6aa   : > { %3241 = vmatpush1.bf16.msra.mxu0 %v4256_v36  ;;  %3269 = vmatpush3.bf16.msra.mxu1 %v4266_v39 }
 0x6ab   : > { %3243 = vmatprep.subr.bf16.mxu0 %v4261_v40  ;;  %3270 = vmatprep.subr.bf16.mxu1 %v3544_v28 }
 0x6ae   : > { %3245 = vmatpush1.bf16.msra.mxu0 %v4272_v60  ;;  %3272 = vmatpush3.bf16.msra.mxu1 %v4282_v23 }
 0x6af   : > { %3247 = vmatprep.subr.bf16.mxu0 %v4277_v0  ;;  %3273 = vmatprep.subr.bf16.mxu1 %v3544_v28 }
 0x6b2   : > { %3249 = vmatpush1.bf16.msra.mxu0 %v4288_v9  ;;  %3275 = vmatpush3.bf16.msra.mxu1 %v4298_v56 }
 0x6b3   : > { %3251 = vmatprep.subr.bf16.mxu0 %v4293_v11  ;;  %3276 = vmatprep.subr.bf16.mxu1 %v3544_v28 }
 0x6b6   : > { %3253 = vmatpush1.bf16.msra.mxu0 %v4304_v7  ;;  %3278 = vmatpush3.bf16.msra.mxu1 %v4314_v55 }
 0x6b7   : > { %3255 = vmatprep.subr.bf16.mxu0 %v4309_v4  ;;  %3279 = vmatprep.subr.bf16.mxu1 %v3544_v28 }
 0x6ba   : > { %3257 = vmatpush1.bf16.msra.mxu0 %v4320_v45  ;;  %3281 = vmatpush3.bf16.msra.mxu1 %v4326_v53 }
 0x6bb   : > { %3283 = vmatprep.subr.bf16.mxu0 %v4202_v50  ;;  %3314 = vmatprep.subr.bf16.mxu1 %v3544_v28 }
 0x770   : > { %v1662_v43 = vpop.f32.mrb[2].mxu0  ;;  %v1733_v48 = vpop.f32.mrb[2].mxu1 }
 0x771   : > { %v1737_v58 = vadd.f32 %v1662_v43, %v1592_v57  ;;  %v1664_v59 = vpop.f32.mrb[3].mxu0  ;;  %v2723_v15 = vpop.f32.mrb[3].mxu1  ;;  %v1751_v62 = vadd.f32 %v4607_v44, %v1733_v48 }
 0x772   : > { %v1744_v52 = vadd.f32 %v1664_v59, %v1593_v1 }
 0x773   : > { %v2317_v51 = vmul.f32 -1.442695, %v1737_v58  ;;  %v1940_v58 = vld [vmem:[#allocation2 + $0x10] sm:$0xff] }
 0x774   : > { %v2318_v46 = vmul.f32 -1.442695, %v1744_v52 }
 0x775   : > { %3454 = vpow2.f32 %v2317_v51 }
 0x776   : > { %3456 = vpow2.f32 %v2318_v46 }
 0x77f   : > { %v3455_v49 = vpop.eup %3454 }
 0x780   : > { %v1741_v54 = vadd.f32 1.0, %v3455_v49  ;;  %v3457_v16 = vpop.eup %3456 }
 0x781   : > { %v1748_v50 = vadd.f32 1.0, %v3457_v16 }
 0x782   : > { %3458 = vrcp.f32 %v1741_v54 }
 0x783   : > { %3460 = vrcp.f32 %v1748_v50 }
 0x78c   : > { %v3459_v42 = vpop.eup %3458 }
 0x78d   : > { %v1752_v10 = vmul.f32 %v3459_v42, %v1751_v62  ;;  %v3461_v12 = vpop.eup %3460 }
 0x78e   : > { %v1755_v14 = vsub.f32 1.0, %v3461_v12  ;;  %v1757_v35 = vmul.f32 %v3461_v12, %v4374_v13 }
 0x78f   : > { %v1753_v63 = vadd.f32 %v1752_v10, %v1594_v24 }
 0x791   : > { %3462 = vtanh.f32 %v1753_v63 }
 0x79b   : > { %v3463_v32 = vpop.eup %3462 }
 0x79c   : > { %v1756_v34 = vmul.f32 %v3463_v32, %v1755_v14 }
 0x79e   : > { %v4417_v37 = vadd.f32 %v1757_v35, %v1756_v34 }
 0x7a0   : > { %2319 = vst [vmem:[%s3678_s12 + $0x10] sm:$0xff] %v4417_v37  ;;  %1834 = vmatmul.mubr.f32.vlgmr.msra.gmra.mrb[4].mxu0 %v4417_v37  ;;  %2757 = vmatmul.mubr.f32.vlgmr.msra.gmra.mrb[4].mxu1 %v4417_v37 }
 0x7a1   : > { %3285 = vmatpush1.bf16.msra.mxu0 %v4206_v17  ;;  %3316 = vmatpush3.bf16.msra.mxu1 %v4220_v26  ;;  %v1765_v17 = vld [vmem:[#allocation2 + $0x18] sm:$0xff] }
 0x7a2   : > { %3287 = vmatprep.subr.bf16.mxu0 %v4210_v19  ;;  %3317 = vmatprep.subr.bf16.mxu1 %v3544_v28 }
 0x7a3   : > { %2006 = vmatprep.mubr.f32.mxu0 %v3545_v31  ;;  %2791 = vmatprep.mubr.msk.f32.mxu1 %vm3546_vm1, %v3545_v31 }
 0x7a5   : > { %3289 = vmatpush1.bf16.msra.mxu0 %v4216_v20  ;;  %3319 = vmatpush3.bf16.msra.mxu1 %v4231_v29 }
 0x7a6   : > { %3291 = vmatprep.subr.bf16.mxu0 %v4225_v25  ;;  %3320 = vmatprep.subr.bf16.mxu1 %v3544_v28  ;;  %v1766_v25 = vld [vmem:[#allocation2 + $0x20] sm:$0xff] }
 0x7a9   : > { %3293 = vmatpush1.bf16.msra.mxu0 %v4240_v27  ;;  %3322 = vmatpush3.bf16.msra.mxu1 %v4250_v33 }
 0x7aa   : > { %3295 = vmatprep.subr.bf16.mxu0 %v4245_v30  ;;  %3323 = vmatprep.subr.bf16.mxu1 %v3544_v28 }
 0x7ad   : > { %3297 = vmatpush1.bf16.msra.mxu0 %v4256_v36  ;;  %3325 = vmatpush3.bf16.msra.mxu1 %v4266_v39 }
 0x7ae   : > { %3299 = vmatprep.subr.bf16.mxu0 %v4261_v40  ;;  %3326 = vmatprep.subr.bf16.mxu1 %v3544_v28 }
 0x7b1   : > { %3301 = vmatpush1.bf16.msra.mxu0 %v4272_v60  ;;  %3328 = vmatpush3.bf16.msra.mxu1 %v4282_v23  ;;  %v1767_v23 = vld [vmem:[#allocation2 + $0x28] sm:$0xff] }
 0x7b2   : > { %3303 = vmatprep.subr.bf16.mxu0 %v4277_v0  ;;  %3329 = vmatprep.subr.bf16.mxu1 %v3544_v28 }
 0x7b5   : > { %3305 = vmatpush1.bf16.msra.mxu0 %v4288_v9  ;;  %3331 = vmatpush3.bf16.msra.mxu1 %v4298_v56 }
 0x7b6   : > { %3307 = vmatprep.subr.bf16.mxu0 %v4293_v11  ;;  %3332 = vmatprep.subr.bf16.mxu1 %v3544_v28 }
 0x7b9   : > { %3309 = vmatpush1.bf16.msra.mxu0 %v4304_v7  ;;  %3334 = vmatpush3.bf16.msra.mxu1 %v4314_v55 }
 0x7ba   : > { %3311 = vmatprep.subr.bf16.mxu0 %v4309_v4  ;;  %3335 = vmatprep.subr.bf16.mxu1 %v3544_v28 }
 0x7bd   : > { %3313 = vmatpush1.bf16.msra.mxu0 %v4320_v45  ;;  %3337 = vmatpush3.bf16.msra.mxu1 %v4326_v53 }
 0x873   : > { %v1835_v19 = vpop.f32.mrb[4].mxu0  ;;  %v1906_v20 = vpop.f32.mrb[4].mxu1 }
 0x874   : > { %v1910_v26 = vadd.f32 %v1835_v19, %v1765_v17  ;;  %v1837_v29 = vpop.f32.mrb[5].mxu0  ;;  %v2758_v31 = vpop.f32.mrb[5].mxu1  ;;  %v1924_v60 = vadd.f32 %v4607_v44, %v1906_v20 }
 0x875   : > { %v1917_v30 = vadd.f32 %v1837_v29, %v1766_v25 }
 0x876   : > { %v2320_v27 = vmul.f32 -1.442695, %v1910_v26 }
 0x877   : > { %v2321_v33 = vmul.f32 -1.442695, %v1917_v30 }
 0x878   : > { %3464 = vpow2.f32 %v2320_v27 }
 0x879   : > { %3466 = vpow2.f32 %v2321_v33 }
 0x882   : > { %v3465_v36 = vpop.eup %3464 }
 0x883   : > { %v1914_v40 = vadd.f32 1.0, %v3465_v36  ;;  %v3467_v28 = vpop.eup %3466 }
 0x884   : > { %v1921_v39 = vadd.f32 1.0, %v3467_v28 }
 0x885   : > { %3468 = vrcp.f32 %v1914_v40 }
 0x886   : > { %3470 = vrcp.f32 %v1921_v39 }
 0x88f   : > { %v3469_v0 = vpop.eup %3468 }
 0x890   : > { %v1925_v9 = vmul.f32 %v3469_v0, %v1924_v60  ;;  %v3471_v56 = vpop.eup %3470 }
 0x891   : > { %v1928_v7 = vsub.f32 1.0, %v3471_v56  ;;  %v1930_v45 = vmul.f32 %v3471_v56, %v4417_v37 }
 0x892   : > { %v1926_v11 = vadd.f32 %v1925_v9, %v1767_v23 }
 0x894   : > { %3472 = vtanh.f32 %v1926_v11 }
 0x89e   : > { %v3473_v4 = vpop.eup %3472 }
 0x89f   : > { %v1929_v55 = vmul.f32 %v3473_v4, %v1928_v7 }
 0x8a1   : > { %v1931_v53 = vadd.f32 %v1930_v45, %v1929_v55 }
 0x8a3   : > { %2322 = vst [vmem:[%s3678_s12 + $0x8] sm:$0xff] %v1931_v53  ;;  %2007 = vmatmul.mubr.f32.vlgmr.msra.gmra.mrb[6].mxu0 %v1931_v53  ;;  %2792 = vmatmul.mubr.f32.vlgmr.msra.gmra.mrb[6].mxu1 %v1931_v53 }
 0x976   : > { %v2008_v41 = vpop.f32.mrb[6].mxu0  ;;  %v2079_v47 = vpop.f32.mrb[6].mxu1 }
 0x977   : > { %v2083_v21 = vadd.f32 %v2008_v41, %v1938_v38  ;;  %v2010_v22 = vpop.f32.mrb[7].mxu0  ;;  %v2793_v61 = vpop.f32.mrb[7].mxu1  ;;  %v2097_v43 = vadd.f32 %v4607_v44, %v2079_v47 }
 0x978   : > { %v2090_v5 = vadd.f32 %v2010_v22, %v1939_v18 }
 0x979   : > { %v2323_v8 = vmul.f32 -1.442695, %v2083_v21 }
 0x97a   : > { %v2324_v6 = vmul.f32 -1.442695, %v2090_v5 }
 0x97b   : > { %3474 = vpow2.f32 %v2323_v8 }
 0x97c   : > { %3476 = vpow2.f32 %v2324_v6 }
 0x985   : > { %v3475_v3 = vpop.eup %3474 }
 0x986   : > { %v2087_v2 = vadd.f32 1.0, %v3475_v3  ;;  %v3477_v13 = vpop.eup %3476 }
 0x987   : > { %v2094_v57 = vadd.f32 1.0, %v3477_v13 }
 0x988   : > { %3478 = vrcp.f32 %v2087_v2 }
 0x989   : > { %3480 = vrcp.f32 %v2094_v57 }
 0x992   : > { %v3479_v48 = vpop.eup %3478 }
 0x993   : > { %v2098_v1 = vmul.f32 %v3479_v48, %v2097_v43  ;;  %v3481_v15 = vpop.eup %3480 }
 0x994   : > { %v2101_v51 = vsub.f32 1.0, %v3481_v15  ;;  %v2103_v49 = vmul.f32 %v3481_v15, %v1931_v53 }
 0x995   : > { %v2099_v59 = vadd.f32 %v2098_v1, %v1940_v58 }
 0x997   : > { %3482 = vtanh.f32 %v2099_v59 }
 0x9a1   : > { %v3483_v52 = vpop.eup %3482 }
 0x9a2   : > { %v2102_v46 = vmul.f32 %v3483_v52, %v2101_v51 }
 0x9a4   : > { %v2104_v54 = vadd.f32 %v2103_v49, %v2102_v46 }
 0x9a6   : > { %2105 = vst [vmem:[#allocation3] sm:$0xff] %v2104_v54  ;;  %2106 = vst [vmem:[%s3678_s12] sm:$0xff] %v2104_v54 }
 0x9a7 PF: > { %2113 = sbr.rel (!%p3629_p4) target bundleno = 2479 (0x9af), region = 56  ;;  %s2333_s22 = sshll.u32 (%p3629_p4), %s3645_s6, 3  ;;  %v2158_v16 = vld [vmem:[%s3678_s12 + $0x8] sm:$0xff] (%p3629_p4)  ;;  %v2160_v50 = vld [vmem:[%s3678_s12 + $0x10] sm:$0xff] (%p3629_p4)  ;;  %v2162_v62 = vld [vmem:[%s3678_s12 + $0x18] sm:$0xff] (%p3629_p4) }
 0x9a8   : > { %s2120_s26 = sadd.s32 (%p3629_p4), %s3526_s21, %s2333_s22 }
 0x9a9   : > { %s2329_s16 = sshll.u32 (%p3629_p4), %s2120_s26, 3 }
 0x9aa   : > { %s2122_s9 = scalar_lea.vmem (%p3629_p4), %s4498_s5, %s2329_s16 }
 0x9ab   : > { %2159 = vst [vmem:[%s2122_s9 + $0x10] sm:$0xff] (%p3629_p4), %v2158_v16  ;;  %2161 = vst [vmem:[%s2122_s9 + $0x20] sm:$0xff] (%p3629_p4), %v2160_v50 }
 0x9ac   : > { %2163 = vst [vmem:[%s2122_s9 + $0x30] sm:$0xff] (%p3629_p4), %v2162_v62 }
 0x9ad   : > { %v2156_v44 = vld [vmem:[%s3678_s12] sm:$0xff] (%p3629_p4) }
 0x9ae   : > { %2157 = vst [vmem:[%s2122_s9] sm:$0xff] %v2156_v44 }
 0x9af PF: > { %s15_s24 = sadd.s32 1, %s3538_s24   ;;  %s4608_s11 = sld [smem:[#allocation9_spill]] }
 0x9b0   : > { %p12_p0 = scmp.ge.s32.totalorder %s15_s24, 6   ;;  %s4609_s20 = sld [smem:[#allocation5_spill]] }
 0x9b1   : > { %s4610_s21 = sld [smem:[#allocation6_spill]]  ;;  %s4611_s22 = sld [smem:[#allocation7_spill]] }
 0x9b2   : > { %s4612_s23 = sld [smem:[#allocation8_spill]]  ;;  %s4613_s18 = smov %s3518_s19 }
 0x9b3   :  { %14 = sbr.rel (!%p12_p0) target bundleno = 4 (0x4), region = 146 }
 0x9b5   : > { %s4614_s19 = smov %s4608_s11 }

</bundles_post_ra>
